<compile_context>
chip_gen: v5e
topology: v5e:2x2
jax: 0.10.0
libtpu: 0.0.40
codegen_flags: <defaults>
</compile_context>

<pallas_src>
from functools import partial

import jax
import jax.numpy as jnp
from jax.experimental import pallas as pl
from jax.experimental.pallas import tpu as pltpu


# --------------------------------------------------------------------------
# Fused kernel: one program = one (batch, channel-group) full spatial plane.
# --------------------------------------------------------------------------
def _fused_kernel(w_ref, b_ref, x_ref, o_ref, xpad_ref, *, H, W, PH, PW, taps):
    """Fused inception depthwise conv on a (H, W, Cb) plane.

    w_ref:   (T, Cb)  VMEM  per-tap, per-channel weights (zero where unused)
    b_ref:   (1, Cb)  VMEM  per-channel bias (zero for identity channels)
    x_ref:   (1, H, W, Cb)  VMEM input block
    o_ref:   (1, H, W, Cb)  VMEM output block
    xpad_ref:(H+2*PH, W+2*PW, Cb) VMEM scratch for the zero halo
    """
    Cb = o_ref.shape[-1]

    # In-kernel halo: zero the padded scratch once per step, then fill the
    # interior. The f32 cast happens exactly once here (hoisted out of taps).
    xpad_ref[...] = jnp.zeros_like(xpad_ref)
    xpad_ref[PH:PH + H, PW:PW + W, :] = x_ref[0].astype(jnp.float32)
    xp = xpad_ref[...]                                  # (Hp, Wp, Cb) f32

    # Accumulator initialized with the bias (single broadcasted add, hoisted).
    acc = jnp.zeros((H, W, Cb), jnp.float32) + b_ref[...]

    # Static unroll over the union of non-zero tap positions of all branches.
    # Each tap is a shifted (H, W, Cb) window times a (1, Cb) lane vector:
    # a full-lane vmul on the VPU.
    for t, (ki, kj) in enumerate(taps):
        wt = w_ref[t:t + 1, :]                          # (1, Cb)
        acc = acc + xp[ki:ki + H, kj:kj + W, :] * wt

    o_ref[0] = acc.astype(o_ref.dtype)


def _inception_dw_fused(x_nhwc, tap_w, bias, *, pad, taps, c_block):
    """x_nhwc: (N, H, W, Cp) with Cp % c_block == 0. Returns (N, H, W, Cp)."""
    N, H, W, Cp = x_nhwc.shape
    T = tap_w.shape[0]
    n_cg = Cp // c_block
    Hp, Wp = H + 2 * pad, W + 2 * pad

    kernel = partial(_fused_kernel, H=H, W=W, PH=pad, PW=pad, taps=taps)

    # VMEM budget: double-buffered in/out blocks + halo scratch + weight table.
    vmem_bytes = 4 * (4 * H * W * c_block + Hp * Wp * c_block
                      + 4 * (T + 1) * c_block) + (2 << 20)
    vmem_bytes = int(min(max(vmem_bytes, 16 * 2**20), 64 * 2**20))

    return pl.pallas_call(
        kernel,
        out_shape=jax.ShapeDtypeStruct((N, H, W, Cp), x_nhwc.dtype),
        grid=(N, n_cg),
        in_specs=[
            pl.BlockSpec((T, c_block), lambda n, g: (0, g)),          # taps
            pl.BlockSpec((1, c_block), lambda n, g: (0, g)),          # bias
            pl.BlockSpec((1, H, W, c_block), lambda n, g: (n, 0, 0, g)),
        ],
        out_specs=pl.BlockSpec((1, H, W, c_block), lambda n, g: (n, 0, 0, g)),
        scratch_shapes=[pltpu.VMEM((Hp, Wp, c_block), jnp.float32)],
        compiler_params=pltpu.CompilerParams(
            dimension_semantics=("parallel", "parallel"),
            vmem_limit_bytes=vmem_bytes),
    )(tap_w, bias, x_nhwc)


# --------------------------------------------------------------------------
# Fused tap-table construction (identity + square + two band kernels).
# --------------------------------------------------------------------------
def _build_fused_taps(c_id, w_hw, b_hw, w_w, b_w, w_h, b_h, sk, bk):
    gc = w_hw.shape[0]
    K = max(sk, bk)
    ctr = K // 2
    rs, rb = sk // 2, bk // 2

    pos = {(ctr, ctr)}                                   # identity
    for a in range(sk):                                  # sk x sk branch
        for b in range(sk):
            pos.add((ctr - rs + a, ctr - rs + b))
    for b in range(bk):                                  # 1 x bk branch
        pos.add((ctr, ctr - rb + b))
    for a in range(bk):                                  # bk x 1 branch
        pos.add((ctr - rb + a, ctr))
    taps = tuple(sorted(pos))

    zgc = jnp.zeros((gc,), jnp.float32)
    rows = []
    for (ki, kj) in taps:
        parts = [jnp.full((c_id,), 1.0 if (ki, kj) == (ctr, ctr) else 0.0,
                          jnp.float32)]
        a, b = ki - (ctr - rs), kj - (ctr - rs)
        parts.append(w_hw[:, 0, a, b].astype(jnp.float32)
                     if (0 <= a < sk and 0 <= b < sk) else zgc)
        b2 = kj - (ctr - rb)
        parts.append(w_w[:, 0, 0, b2].astype(jnp.float32)
                     if (ki == ctr and 0 <= b2 < bk) else zgc)
        a2 = ki - (ctr - rb)
        parts.append(w_h[:, 0, a2, 0].astype(jnp.float32)
                     if (kj == ctr and 0 <= a2 < bk) else zgc)
        rows.append(jnp.concatenate(parts))

    tap_w = jnp.stack(rows)                              # (T, C)
    bias = jnp.concatenate([jnp.zeros((c_id,), jnp.float32),
                            b_hw.astype(jnp.float32),
                            b_w.astype(jnp.float32),
                            b_h.astype(jnp.float32)])[None, :]   # (1, C)
    return taps, tap_w, bias, ctr


# --------------------------------------------------------------------------
# Module
# --------------------------------------------------------------------------
class InceptionDWConv2dPallas:
    """JAX/Pallas port of InceptionDWConv2d (forward only, NCHW in/out)."""

    def __init__(self, in_channels, square_kernel_size=3, band_kernel_size=7,
                 branch_ratio=0.125, key=None):
        gc = int(in_channels * branch_ratio)
        self.in_channels = in_channels
        self.gc = gc
        self.split_indexes = (in_channels - 3 * gc, gc, gc, gc)

        if key is None:
            key = jax.random.PRNGKey(0)
        k = jax.random.split(key, 6)
        sk, bk = square_kernel_size, band_kernel_size
        self.w_hw = 0.1 * jax.random.normal(k[0], (gc, 1, sk, sk), jnp.float32)
        self.b_hw = 0.1 * jax.random.normal(k[1], (gc,), jnp.float32)
        self.w_w = 0.1 * jax.random.normal(k[2], (gc, 1, 1, bk), jnp.float32)
        self.b_w = 0.1 * jax.random.normal(k[3], (gc,), jnp.float32)
        self.w_h = 0.1 * jax.random.normal(k[4], (gc, 1, bk, 1), jnp.float32)
        self.b_h = 0.1 * jax.random.normal(k[5], (gc,), jnp.float32)

        taps, tap_w, bias, ctr = _build_fused_taps(
            self.split_indexes[0], self.w_hw, self.b_hw, self.w_w, self.b_w,
            self.w_h, self.b_h, sk, bk)
        self.taps = taps
        self.pad = ctr

        # Channel tiling: channels are the lane dim. Whole C if <=128,
        # otherwise 128-wide groups (pad C with zero channels).
        C = in_channels
        self.c_block = C if C <= 128 else 128
        self.c_padded = -(-C // self.c_block) * self.c_block
        padc = self.c_padded - C
        if padc:
            tap_w = jnp.pad(tap_w, ((0, 0), (0, padc)))
            bias = jnp.pad(bias, ((0, 0), (0, padc)))
        self.tap_w = tap_w
        self.bias = bias

    def __call__(self, x):
        N, C, H, W = x.shape
        # Layout plumbing only: channels -> lane dim for the kernel.
        x_nhwc = jnp.transpose(x, (0, 2, 3, 1))
        if self.c_padded != C:
            x_nhwc = jnp.pad(
                x_nhwc, ((0, 0), (0, 0), (0, 0), (0, self.c_padded - C)))
        y = _inception_dw_fused(x_nhwc, self.tap_w, self.bias,
                                pad=self.pad, taps=self.taps,
                                c_block=self.c_block)
        if self.c_padded != C:
            y = y[..., :C]
        return jnp.transpose(y, (0, 3, 1, 2))


# --------------------------------------------------------------------------
# Reference (plain JAX) and test
# --------------------------------------------------------------------------
def _ref_dwconv(x, w, b):
    kh, kw = w.shape[-2], w.shape[-1]
    out = jax.lax.conv_general_dilated(
        x, w, window_strides=(1, 1),
        padding=((kh // 2, kh // 2), (kw // 2, kw // 2)),
        dimension_numbers=("NCHW", "OIHW", "NCHW"),
        feature_group_count=x.shape[1])
    return out + b[None, :, None, None]


if __name__ == "__main__":
    key = jax.random.PRNGKey(0)
    in_channels = 32          # gc = 4, identity channels = 20
    N, H, W = 2, 16, 16
    x = jax.random.normal(jax.random.fold_in(key, 7),
                          (N, in_channels, H, W), jnp.float32)

    mod = InceptionDWConv2dPallas(in_channels, key=key)
    fwd = jax.jit(lambda xx: mod(xx))
    out = jax.block_until_ready(fwd(x))

    # Reference forward (plain JAX) to verify semantics.
    i0 = mod.split_indexes[0]
    gc = mod.gc
    ref = jnp.concatenate(
        (x[:, :i0],
         _ref_dwconv(x[:, i0:i0 + gc], mod.w_hw, mod.b_hw),
         _ref_dwconv(x[:, i0 + gc:i0 + 2 * gc], mod.w_w, mod.b_w),
         _ref_dwconv(x[:, i0 + 2 * gc:], mod.w_h, mod.b_h)),
        axis=1)

    assert out.shape == (N, in_channels, H, W)
    assert jnp.allclose(out, ref, atol=1e-4, rtol=1e-4)
    print("KERNEL_OK")
</pallas_src>

<mosaic_0001>
module attributes {stable_mosaic.version = 11 : i64} {
  func.func @_fused_kernel(%arg0: i32, %arg1: i32, %arg2: memref<17x32xf32, #tpu.memory_space<vmem>>, %arg3: memref<1x32xf32, #tpu.memory_space<vmem>>, %arg4: memref<1x16x16x32xf32, #tpu.memory_space<vmem>>, %arg5: memref<1x16x16x32xf32, #tpu.memory_space<vmem>>, %arg6: memref<22x22x32xf32, #tpu.memory_space<vmem>>) attributes {dimension_semantics = [#tpu.dimension_semantics<parallel>, #tpu.dimension_semantics<parallel>], iteration_bounds = array<i64: 2, 1>, scalar_prefetch = 0 : i64, scratch_operands = 1 : i64, tpu.core_type = #tpu.core_type<tc>, window_params = [{transform_indices = @transform_0, window_bounds = array<i64: 17, 32>}, {transform_indices = @transform_1, window_bounds = array<i64: 1, 32>}, {transform_indices = @transform_2, window_bounds = array<i64: 1, 16, 16, 32>}, {transform_indices = @transform_3, window_bounds = array<i64: 1, 16, 16, 32>}]} {
    %cst = arith.constant 0.000000e+00 : f32
    %0 = vector.broadcast %cst : f32 to vector<22x22x32xf32>
    %c0 = arith.constant 0 : index
    %c0_0 = arith.constant 0 : index
    %c0_1 = arith.constant 0 : index
    %1 = vector.load %arg6[%c0, %c0_0, %c0_1] : memref<22x22x32xf32, #tpu.memory_space<vmem>>, vector<22x22x32xf32>
    tpu.vector_store %arg6[%c0, %c0_0, %c0_1], %0 {strides = array<i32>} : memref<22x22x32xf32, #tpu.memory_space<vmem>>, vector<22x22x32xf32>,
    %c0_2 = arith.constant 0 : index
    %c0_3 = arith.constant 0 : index
    %c0_4 = arith.constant 0 : index
    %c0_5 = arith.constant 0 : index
    %2 = vector.load %arg4[%c0_2, %c0_3, %c0_4, %c0_5] : memref<1x16x16x32xf32, #tpu.memory_space<vmem>>, vector<1x16x16x32xf32>
    %3 = vector.shape_cast %2 : vector<1x16x16x32xf32> to vector<16x16x32xf32>
    %c3 = arith.constant 3 : index
    %c3_6 = arith.constant 3 : index
    %c0_7 = arith.constant 0 : index
    %4 = vector.load %arg6[%c3, %c3_6, %c0_7] : memref<22x22x32xf32, #tpu.memory_space<vmem>>, vector<16x16x32xf32>
    tpu.vector_store %arg6[%c3, %c3_6, %c0_7], %3 {strides = array<i32>} : memref<22x22x32xf32, #tpu.memory_space<vmem>>, vector<16x16x32xf32>,
    %c0_8 = arith.constant 0 : index
    %c0_9 = arith.constant 0 : index
    %c0_10 = arith.constant 0 : index
    %5 = vector.load %arg6[%c0_8, %c0_9, %c0_10] : memref<22x22x32xf32, #tpu.memory_space<vmem>>, vector<22x22x32xf32>
    %cst_11 = arith.constant 0.000000e+00 : f32
    %6 = vector.broadcast %cst_11 : f32 to vector<16x16x32xf32>
    %c0_12 = arith.constant 0 : index
    %c0_13 = arith.constant 0 : index
    %7 = vector.load %arg3[%c0_12, %c0_13] : memref<1x32xf32, #tpu.memory_space<vmem>>, vector<1x32xf32>
    %8 = vector.shape_cast %7 : vector<1x32xf32> to vector<1x1x32xf32>
    %9 = vector.broadcast %8 : vector<1x1x32xf32> to vector<16x16x32xf32>
    %10 = arith.addf %6, %9 : vector<16x16x32xf32>
    %c0_14 = arith.constant 0 : index
    %c0_15 = arith.constant 0 : index
    %11 = vector.load %arg2[%c0_14, %c0_15] : memref<17x32xf32, #tpu.memory_space<vmem>>, vector<1x32xf32>
    %12 = vector.extract_strided_slice %5 {offsets = [0, 3, 0], sizes = [16, 16, 32], strides = [1, 1, 1]} : vector<22x22x32xf32> to vector<16x16x32xf32>
    %13 = vector.shape_cast %11 : vector<1x32xf32> to vector<1x1x32xf32>
    %14 = vector.broadcast %13 : vector<1x1x32xf32> to vector<16x16x32xf32>
    %15 = arith.mulf %12, %14 : vector<16x16x32xf32>
    %16 = arith.addf %10, %15 : vector<16x16x32xf32>
    %c1 = arith.constant 1 : index
    %c0_16 = arith.constant 0 : index
    %17 = vector.load %arg2[%c1, %c0_16] : memref<17x32xf32, #tpu.memory_space<vmem>>, vector<1x32xf32>
    %18 = vector.extract_strided_slice %5 {offsets = [1, 3, 0], sizes = [16, 16, 32], strides = [1, 1, 1]} : vector<22x22x32xf32> to vector<16x16x32xf32>
    %19 = vector.shape_cast %17 : vector<1x32xf32> to vector<1x1x32xf32>
    %20 = vector.broadcast %19 : vector<1x1x32xf32> to vector<16x16x32xf32>
    %21 = arith.mulf %18, %20 : vector<16x16x32xf32>
    %22 = arith.addf %16, %21 : vector<16x16x32xf32>
    %c2 = arith.constant 2 : index
    %c0_17 = arith.constant 0 : index
    %23 = vector.load %arg2[%c2, %c0_17] : memref<17x32xf32, #tpu.memory_space<vmem>>, vector<1x32xf32>
    %24 = vector.extract_strided_slice %5 {offsets = [2, 2, 0], sizes = [16, 16, 32], strides = [1, 1, 1]} : vector<22x22x32xf32> to vector<16x16x32xf32>
    %25 = vector.shape_cast %23 : vector<1x32xf32> to vector<1x1x32xf32>
    %26 = vector.broadcast %25 : vector<1x1x32xf32> to vector<16x16x32xf32>
    %27 = arith.mulf %24, %26 : vector<16x16x32xf32>
    %28 = arith.addf %22, %27 : vector<16x16x32xf32>
    %c3_18 = arith.constant 3 : index
    %c0_19 = arith.constant 0 : index
    %29 = vector.load %arg2[%c3_18, %c0_19] : memref<17x32xf32, #tpu.memory_space<vmem>>, vector<1x32xf32>
    %30 = vector.extract_strided_slice %5 {offsets = [2, 3, 0], sizes = [16, 16, 32], strides = [1, 1, 1]} : vector<22x22x32xf32> to vector<16x16x32xf32>
    %31 = vector.shape_cast %29 : vector<1x32xf32> to vector<1x1x32xf32>
    %32 = vector.broadcast %31 : vector<1x1x32xf32> to vector<16x16x32xf32>
    %33 = arith.mulf %30, %32 : vector<16x16x32xf32>
    %34 = arith.addf %28, %33 : vector<16x16x32xf32>
    %c4 = arith.constant 4 : index
    %c0_20 = arith.constant 0 : index
    %35 = vector.load %arg2[%c4, %c0_20] : memref<17x32xf32, #tpu.memory_space<vmem>>, vector<1x32xf32>
    %36 = vector.extract_strided_slice %5 {offsets = [2, 4, 0], sizes = [16, 16, 32], strides = [1, 1, 1]} : vector<22x22x32xf32> to vector<16x16x32xf32>
    %37 = vector.shape_cast %35 : vector<1x32xf32> to vector<1x1x32xf32>
    %38 = vector.broadcast %37 : vector<1x1x32xf32> to vector<16x16x32xf32>
    %39 = arith.mulf %36, %38 : vector<16x16x32xf32>
    %40 = arith.addf %34, %39 : vector<16x16x32xf32>
    %c5 = arith.constant 5 : index
    %c0_21 = arith.constant 0 : index
    %41 = vector.load %arg2[%c5, %c0_21] : memref<17x32xf32, #tpu.memory_space<vmem>>, vector<1x32xf32>
    %42 = vector.extract_strided_slice %5 {offsets = [3, 0, 0], sizes = [16, 16, 32], strides = [1, 1, 1]} : vector<22x22x32xf32> to vector<16x16x32xf32>
    %43 = vector.shape_cast %41 : vector<1x32xf32> to vector<1x1x32xf32>
    %44 = vector.broadcast %43 : vector<1x1x32xf32> to vector<16x16x32xf32>
    %45 = arith.mulf %42, %44 : vector<16x16x32xf32>
    %46 = arith.addf %40, %45 : vector<16x16x32xf32>
    %c6 = arith.constant 6 : index
    %c0_22 = arith.constant 0 : index
    %47 = vector.load %arg2[%c6, %c0_22] : memref<17x32xf32, #tpu.memory_space<vmem>>, vector<1x32xf32>
    %48 = vector.extract_strided_slice %5 {offsets = [3, 1, 0], sizes = [16, 16, 32], strides = [1, 1, 1]} : vector<22x22x32xf32> to vector<16x16x32xf32>
    %49 = vector.shape_cast %47 : vector<1x32xf32> to vector<1x1x32xf32>
    %50 = vector.broadcast %49 : vector<1x1x32xf32> to vector<16x16x32xf32>
    %51 = arith.mulf %48, %50 : vector<16x16x32xf32>
    %52 = arith.addf %46, %51 : vector<16x16x32xf32>
    %c7 = arith.constant 7 : index
    %c0_23 = arith.constant 0 : index
    %53 = vector.load %arg2[%c7, %c0_23] : memref<17x32xf32, #tpu.memory_space<vmem>>, vector<1x32xf32>
    %54 = vector.extract_strided_slice %5 {offsets = [3, 2, 0], sizes = [16, 16, 32], strides = [1, 1, 1]} : vector<22x22x32xf32> to vector<16x16x32xf32>
    %55 = vector.shape_cast %53 : vector<1x32xf32> to vector<1x1x32xf32>
    %56 = vector.broadcast %55 : vector<1x1x32xf32> to vector<16x16x32xf32>
    %57 = arith.mulf %54, %56 : vector<16x16x32xf32>
    %58 = arith.addf %52, %57 : vector<16x16x32xf32>
    %c8 = arith.constant 8 : index
    %c0_24 = arith.constant 0 : index
    %59 = vector.load %arg2[%c8, %c0_24] : memref<17x32xf32, #tpu.memory_space<vmem>>, vector<1x32xf32>
    %60 = vector.extract_strided_slice %5 {offsets = [3, 3, 0], sizes = [16, 16, 32], strides = [1, 1, 1]} : vector<22x22x32xf32> to vector<16x16x32xf32>
    %61 = vector.shape_cast %59 : vector<1x32xf32> to vector<1x1x32xf32>
    %62 = vector.broadcast %61 : vector<1x1x32xf32> to vector<16x16x32xf32>
    %63 = arith.mulf %60, %62 : vector<16x16x32xf32>
    %64 = arith.addf %58, %63 : vector<16x16x32xf32>
    %c9 = arith.constant 9 : index
    %c0_25 = arith.constant 0 : index
    %65 = vector.load %arg2[%c9, %c0_25] : memref<17x32xf32, #tpu.memory_space<vmem>>, vector<1x32xf32>
    %66 = vector.extract_strided_slice %5 {offsets = [3, 4, 0], sizes = [16, 16, 32], strides = [1, 1, 1]} : vector<22x22x32xf32> to vector<16x16x32xf32>
    %67 = vector.shape_cast %65 : vector<1x32xf32> to vector<1x1x32xf32>
    %68 = vector.broadcast %67 : vector<1x1x32xf32> to vector<16x16x32xf32>
    %69 = arith.mulf %66, %68 : vector<16x16x32xf32>
    %70 = arith.addf %64, %69 : vector<16x16x32xf32>
    %c10 = arith.constant 10 : index
    %c0_26 = arith.constant 0 : index
    %71 = vector.load %arg2[%c10, %c0_26] : memref<17x32xf32, #tpu.memory_space<vmem>>, vector<1x32xf32>
    %72 = vector.extract_strided_slice %5 {offsets = [3, 5, 0], sizes = [16, 16, 32], strides = [1, 1, 1]} : vector<22x22x32xf32> to vector<16x16x32xf32>
    %73 = vector.shape_cast %71 : vector<1x32xf32> to vector<1x1x32xf32>
    %74 = vector.broadcast %73 : vector<1x1x32xf32> to vector<16x16x32xf32>
    %75 = arith.mulf %72, %74 : vector<16x16x32xf32>
    %76 = arith.addf %70, %75 : vector<16x16x32xf32>
    %c11 = arith.constant 11 : index
    %c0_27 = arith.constant 0 : index
    %77 = vector.load %arg2[%c11, %c0_27] : memref<17x32xf32, #tpu.memory_space<vmem>>, vector<1x32xf32>
    %78 = vector.extract_strided_slice %5 {offsets = [3, 6, 0], sizes = [16, 16, 32], strides = [1, 1, 1]} : vector<22x22x32xf32> to vector<16x16x32xf32>
    %79 = vector.shape_cast %77 : vector<1x32xf32> to vector<1x1x32xf32>
    %80 = vector.broadcast %79 : vector<1x1x32xf32> to vector<16x16x32xf32>
    %81 = arith.mulf %78, %80 : vector<16x16x32xf32>
    %82 = arith.addf %76, %81 : vector<16x16x32xf32>
    %c12 = arith.constant 12 : index
    %c0_28 = arith.constant 0 : index
    %83 = vector.load %arg2[%c12, %c0_28] : memref<17x32xf32, #tpu.memory_space<vmem>>, vector<1x32xf32>
    %84 = vector.extract_strided_slice %5 {offsets = [4, 2, 0], sizes = [16, 16, 32], strides = [1, 1, 1]} : vector<22x22x32xf32> to vector<16x16x32xf32>
    %85 = vector.shape_cast %83 : vector<1x32xf32> to vector<1x1x32xf32>
    %86 = vector.broadcast %85 : vector<1x1x32xf32> to vector<16x16x32xf32>
    %87 = arith.mulf %84, %86 : vector<16x16x32xf32>
    %88 = arith.addf %82, %87 : vector<16x16x32xf32>
    %c13 = arith.constant 13 : index
    %c0_29 = arith.constant 0 : index
    %89 = vector.load %arg2[%c13, %c0_29] : memref<17x32xf32, #tpu.memory_space<vmem>>, vector<1x32xf32>
    %90 = vector.extract_strided_slice %5 {offsets = [4, 3, 0], sizes = [16, 16, 32], strides = [1, 1, 1]} : vector<22x22x32xf32> to vector<16x16x32xf32>
    %91 = vector.shape_cast %89 : vector<1x32xf32> to vector<1x1x32xf32>
    %92 = vector.broadcast %91 : vector<1x1x32xf32> to vector<16x16x32xf32>
    %93 = arith.mulf %90, %92 : vector<16x16x32xf32>
    %94 = arith.addf %88, %93 : vector<16x16x32xf32>
    %c14 = arith.constant 14 : index
    %c0_30 = arith.constant 0 : index
    %95 = vector.load %arg2[%c14, %c0_30] : memref<17x32xf32, #tpu.memory_space<vmem>>, vector<1x32xf32>
    %96 = vector.extract_strided_slice %5 {offsets = [4, 4, 0], sizes = [16, 16, 32], strides = [1, 1, 1]} : vector<22x22x32xf32> to vector<16x16x32xf32>
    %97 = vector.shape_cast %95 : vector<1x32xf32> to vector<1x1x32xf32>
    %98 = vector.broadcast %97 : vector<1x1x32xf32> to vector<16x16x32xf32>
    %99 = arith.mulf %96, %98 : vector<16x16x32xf32>
    %100 = arith.addf %94, %99 : vector<16x16x32xf32>
    %c15 = arith.constant 15 : index
    %c0_31 = arith.constant 0 : index
    %101 = vector.load %arg2[%c15, %c0_31] : memref<17x32xf32, #tpu.memory_space<vmem>>, vector<1x32xf32>
    %102 = vector.extract_strided_slice %5 {offsets = [5, 3, 0], sizes = [16, 16, 32], strides = [1, 1, 1]} : vector<22x22x32xf32> to vector<16x16x32xf32>
    %103 = vector.shape_cast %101 : vector<1x32xf32> to vector<1x1x32xf32>
    %104 = vector.broadcast %103 : vector<1x1x32xf32> to vector<16x16x32xf32>
    %105 = arith.mulf %102, %104 : vector<16x16x32xf32>
    %106 = arith.addf %100, %105 : vector<16x16x32xf32>
    %c16 = arith.constant 16 : index
    %c0_32 = arith.constant 0 : index
    %107 = vector.load %arg2[%c16, %c0_32] : memref<17x32xf32, #tpu.memory_space<vmem>>, vector<1x32xf32>
    %108 = vector.extract_strided_slice %5 {offsets = [6, 3, 0], sizes = [16, 16, 32], strides = [1, 1, 1]} : vector<22x22x32xf32> to vector<16x16x32xf32>
    %109 = vector.shape_cast %107 : vector<1x32xf32> to vector<1x1x32xf32>
    %110 = vector.broadcast %109 : vector<1x1x32xf32> to vector<16x16x32xf32>
    %111 = arith.mulf %108, %110 : vector<16x16x32xf32>
    %112 = arith.addf %106, %111 : vector<16x16x32xf32>
    %c0_33 = arith.constant 0 : index
    %c0_34 = arith.constant 0 : index
    %c0_35 = arith.constant 0 : index
    %c0_36 = arith.constant 0 : index
    %113 = vector.load %arg5[%c0_33, %c0_34, %c0_35, %c0_36] : memref<1x16x16x32xf32, #tpu.memory_space<vmem>>, vector<1x16x16x32xf32>
    %114 = vector.shape_cast %113 : vector<1x16x16x32xf32> to vector<16x16x32xf32>
    %115 = vector.shape_cast %112 : vector<16x16x32xf32> to vector<1x16x16x32xf32>
    tpu.vector_store %arg5[%c0_33, %c0_34, %c0_35, %c0_36], %115 {strides = array<i32>} : memref<1x16x16x32xf32, #tpu.memory_space<vmem>>, vector<1x16x16x32xf32>,
    return
  }
  func.func @transform_0(%arg0: i32, %arg1: i32) -> (i32, i32) {
    %c0_i32 = arith.constant 0 : i32
    %c0_i32_0 = arith.constant 0 : i32
    return %c0_i32, %arg1 : i32, i32
  }
  func.func @transform_1(%arg0: i32, %arg1: i32) -> (i32, i32) {
    %c0_i32 = arith.constant 0 : i32
    %c0_i32_0 = arith.constant 0 : i32
    return %c0_i32, %arg1 : i32, i32
  }
  func.func @transform_2(%arg0: i32, %arg1: i32) -> (i32, i32, i32, i32) {
    %c0_i32 = arith.constant 0 : i32
    %c0_i32_0 = arith.constant 0 : i32
    %c0_i32_1 = arith.constant 0 : i32
    return %arg0, %c0_i32, %c0_i32_0, %arg1 : i32, i32, i32, i32
  }
  func.func @transform_3(%arg0: i32, %arg1: i32) -> (i32, i32, i32, i32) {
    %c0_i32 = arith.constant 0 : i32
    %c0_i32_0 = arith.constant 0 : i32
    %c0_i32_1 = arith.constant 0 : i32
    return %arg0, %c0_i32, %c0_i32_0, %arg1 : i32, i32, i32, i32
  }
}

</mosaic_0001>

<bundles_post_ra>
// kernel: _lambda_.1
= control target key start
LH: loop header
LB: loop body
LE: loop exit
PB: predicated region body
PF: predicated region fallthrough
CT: control target
= control target key end

     0   :  { %s9375_s0 = inlined_call_operand.hbm [shape: f32[17,32], index: 0, kind: input, shape index: {}]   ;;  %s9376_s1 = inlined_call_operand.vmem [shape: f32[1,32], index: 1, kind: input, shape index: {}]   ;;  %s9377_s2 = inlined_call_operand.hbm [shape: f32[2,16,16,32], index: 2, kind: input, shape index: {}]   ;;  %s9378_s3 = inlined_call_operand.hbm [shape: f32[2,16,16,32], index: 3, kind: output, shape index: {}]  }
   0x1   :  { %9669 = sst [smem:[#allocation29_spill]] %s9375_s0 }
   0x2   :  { %8 = vsyncpa [#allocation4], 0 }
   0x3   :  { %9 = vsyncpa [#allocation7], 0 }
   0x4   :  { %11 = vsyncpa [#allocation7 + $0x1], 0 }
   0x5   :  { %12 = vsyncpa [#allocation5], 0 }
   0x6   :  { %14 = vsyncpa [#allocation5 + $0x1], 0  ;;  %s4402_s12 = smov 0   ;;  %s4404_s13 = smov 0  }
   0x7   :  { %s4406_s14 = smov 0   ;;  %s4408_s15 = smov 0  }
   0x8   :  { %s4410_s16 = smov 0   ;;  %s4412_s17 = smov 0  }
   0x9 LB: > { %s3996_s18 = sadd.s32 4294967295, %s4374_s17   ;;  %s3997_s19 = sadd.s32 4294967294, %s4374_s17   ;;  %s4374_s17 = sphi %s4412_s17, %s20_s17   ;;  %s4370_s16 = sphi %s4410_s16, %s10131_s16   ;;  %s4366_s15 = sphi %s4408_s15, %s10130_s15   ;;  %s4362_s14 = sphi %s4406_s14, %s10129_s14   ;;  %s4358_s13 = sphi %s4404_s13, %s10128_s13   ;;  %s4354_s12 = sphi %s4402_s12, %s10127_s12  }
   0xa   : > { %p106_p0 = scmp.ne.s32.totalorder %s4358_s13, %s4354_s12  ;;  %p4436_p1 = scmp.eq.s32.totalorder %s3996_s18, 0 }
   0xb   : > { %p4440_p2 = scmp.eq.s32.totalorder %s3996_s18, 1  ;;  %p138_p3 = scmp.eq.s32.totalorder %s3997_s19, 1 }
   0xc   : > { %p4446_p4 = por %p4436_p1, %p106_p0  ;;  %p3998_p5 = scmp.ge.s32.totalorder %s4374_s17, 1 }
   0xd   : > { %p4451_p6 = por %p138_p3, %p106_p0  ;;  %p145_p7 = scmp.lt.s32.totalorder %s4374_s17, 3 }
   0xe   : > { %s9674_s0 = sld [smem:[#allocation29_spill]]  ;;  %s4376_s28 = smov [#allocation3]  }
   0xf   : > { %p4459_p8 = pnand %p3998_p5, %p145_p7  ;;  %s160_s29 = sshll.u32 %s4376_s28, 4  ;;  %s161_s29 = int_to_ptr.vmem [resolvable:$true] %s160_s29 }
  0x10   : > { %p4001_p11 = scmp.ge.s32.totalorder %s4374_s17, 2  ;;  %s9379_s30 = smov 128  }
  0x11   : > { %p4024_p9 = pneg %p4459_p8  ;;  %s4378_s4 = smov 8  }
  0x12   : > { %s32_s5 = sadd.s32 1, %s4370_s16  ;;  %s93_s6 = sadd.s32 1, %s4362_s14 }
  0x13   : > { %p4025_p10 = pnand %p4024_p9, %p4436_p1  ;;  %p34_p12 = scmp.ge.s32.totalorder %s32_s5, 2 }
  0x14   : > { %s158_s26 = sshll.u32 %s9674_s0, 4  ;;  %p100_p13 = scmp.ne.s32.totalorder %s4362_s14, %s4358_s13  ;;  %s159_s26 = int_to_ptr.hbm [resolvable:$true] %s158_s26 }
  0x15   : > { %4027 = dma.hbm_to_vmem [thread:$0]  (!%p4025_p10), %s159_s26, 384, %s161_s29, [#allocation4], %s9379_s30, %s9379_s30, %s4378_s4  }
  0x16   : > { %p101_p0 = scmp.eq.s32.totalorder %s4374_s17, 0  ;;  %s10133_s5 = smov (%p34_p12, %s32_s5), 0 }
  0x17   : > { %p4484_p5 = por %p4440_p2, %p100_p13  ;;  %s88_s9 = ssub.s32 %s4370_s16, %s10133_s5 }
  0x18   : > { %p4478_p3 = por %p101_p0, %p100_p13  ;;  %p4037_p7 = scmp.lt.s32.totalorder %s4374_s17, 2 }
  0x19   : > { %p91_p9 = scmp.eq.s32.totalorder %s88_s9, 0  ;;  %s180_s10 = sand.u32 1, %s4362_s14  }
  0x1a   : > { %s4002_s11 = sshll.u32 %s180_s10, 8  ;;  %s4014_s19 = sshll.u32 %s4370_s16, 8 }
  0x1b   : > { %s4493_s18 = scalar_select %p91_p9, %s4362_s14, %s93_s6  }
  0x1c   : > { %s190_s26 = scalar_lea.hbm %s9377_s2, %s4014_s19  ;;  %s184_s28 = scalar_lea.vmem [#allocation6], %s4002_s11 }
  0x1d   : > { %s193_s29 = sshll.u32 %s184_s28, 4  ;;  %s191_s21 = sshll.u32 %s190_s26, 4  ;;  %s194_s29 = int_to_ptr.vmem [resolvable:$true] %s193_s29  ;;  %s192_s21 = int_to_ptr.hbm [resolvable:$true] %s191_s21 }
  0x1e   : > { %p4029_p2 = pnand %p4037_p7, %p4478_p3  ;;  %s181_s30 = scalar_lea.sflag [#allocation7], %s180_s10 }
  0x1f   : > { %s9678_s0 = smov 128   ;;  %205 = sbr.rel (%p4459_p8) target bundleno = 798 (0x31e), region = 32 }
  0x20   : > { %4031 = dma.hbm_to_vmem [thread:$0]  (!%p4029_p2), %s192_s21, 4096, %s194_s29, %s181_s30, %s9678_s0, %s9678_s0, %s4378_s4  }
  0x24   : > { %4341 = dma.done.wait (%p4436_p1), [#allocation4], 384  }
  0x25   : > { %4343 = vsyncadd (%p4436_p1), [#allocation4], 4294966912  ;;  %s4511_s6 = sand.u32 1, %s4358_s13  }
  0x26   : > { %s4007_s7 = sshll.u32 %s4511_s6, 8  ;;  %s213_s9 = scalar_lea.sflag [#allocation7], %s4511_s6 }
  0x27   : > { %s4517_s0 = scalar_lea.vmem [#allocation6], %s4007_s7 }
  0x28   : > { %4345 = dma.done.wait (%p4446_p4), %s213_s9, 4096  }
  0x29   : > { %4347 = vsyncadd (%p4446_p4), %s213_s9, 4294963200  ;;  %vm246_vm0 = vcmask 261120   ;;  %v4379_v0 = vmov 0.0   ;;  %vm249_vm1 = vcmask 259072   ;;  %v4631_v1 = vld [vmem:[#allocation3] ss:$0 sm:$0xff] }
  0x2a   : > { %247 = vst.msk [vmem:[#allocation2] sm:$0xff] %vm246_vm0, %v4379_v0  ;;  %v4644_v4 = vld [vmem:[%s9376_s1] ss:$0 sm:$0xff]  ;;  %v4649_v6 = vld [vmem:[#allocation3 + $0x1] ss:$0 sm:$0xff]  ;;  %v314_v20 = vld [vmem:[%s4517_s0] sm:$0xff] }
  0x2b   : > { %248 = vst.msk [vmem:[#allocation2 + $0x8] sm:$0xff] %vm246_vm0, %v4379_v0  ;;  %v4653_v8 = vld [vmem:[#allocation3 + $0x2] ss:$0 sm:$0xff]  ;;  %v316_v27 = vld [vmem:[%s4517_s0 + $0x10] sm:$0xff]  ;;  %v317_v33 = vld [vmem:[%s4517_s0 + $0x18] sm:$0xff]  ;;  %vm744_vm2 = vcmask 1040384  }
  0x2c   : > { %251 = vst.msk [vmem:[#allocation2 + $0x18] sm:$0xff] %vm246_vm0, %v4379_v0  ;;  %v315_v23 = vld [vmem:[%s4517_s0 + $0x8] sm:$0xff]  ;;  %v318_v37 = vld [vmem:[%s4517_s0 + $0x20] sm:$0xff]  ;;  %v320_v47 = vld [vmem:[%s4517_s0 + $0x30] sm:$0xff]  ;;  %vm1117_vm3 = vcmask 1046528   ;;  %vm2524_vm4 = vcmask 1045504  }
  0x2d   : > { %252 = vst.msk [vmem:[#allocation2 + $0x20] sm:$0xff] %vm246_vm0, %v4379_v0  ;;  %v4704_v39 = vld [vmem:[#allocation3 + $0x4] ss:$0 sm:$0xff]  ;;  %v4710_v44 = vld [vmem:[#allocation3 + $0x3] ss:$0 sm:$0xff]  ;;  %v321_v48 = vld [vmem:[%s4517_s0 + $0x38] sm:$0xff] }
  0x2e   : > { %254 = vst.msk [vmem:[#allocation2 + $0x30] sm:$0xff] %vm246_vm0, %v4379_v0  ;;  %v319_v43 = vld [vmem:[%s4517_s0 + $0x28] sm:$0xff]  ;;  %v322_v53 = vld [vmem:[%s4517_s0 + $0x40] sm:$0xff]  ;;  %v4743_v62 = vld [vmem:[#allocation3 + $0x9] ss:$0 sm:$0xff]  ;;  %vm2799_vm5 = vcmask 1044480  }
  0x2f   : > { %255 = vst.msk [vmem:[#allocation2 + $0x38] sm:$0xff] %vm246_vm0, %v4379_v0  ;;  %v4732_v56 = vld [vmem:[#allocation3 + $0x5] ss:$0 sm:$0xff]  ;;  %v4734_v57 = vld [vmem:[#allocation3 + $0x6] ss:$0 sm:$0xff]  ;;  %vm1360_vm6 = vcmask 1042432  }
  0x30   : > { %257 = vst.msk [vmem:[#allocation2 + $0x48] sm:$0xff] %vm246_vm0, %v4379_v0  ;;  %v323_v59 = vld [vmem:[%s4517_s0 + $0x48] sm:$0xff]  ;;  %vm1603_vm7 = vcmask 1041408   ;;  %vm3818_vm8 = vcmask 261123   ;;  %s5061_s27 = scalar_lea.vmem [#allocation8], %s4007_s7  ;;  %vm3821_vm9 = vcmask 256000  }
  0x31   : > { %258 = vst.msk [vmem:[#allocation2 + $0x50] sm:$0xff] %vm246_vm0, %v4379_v0  ;;  %v379_v2 = vld [vmem:[#allocation2] sm:$0xff]  ;;  %s4015_s28 = sshll.u32 %s4366_s15, 8  ;;  %s3882_s9 = sshll.u32 %s5061_s27, 4  ;;  %s3883_s9 = int_to_ptr.vmem [resolvable:$true] %s3882_s9 }
  0x32   : > { %260 = vst.msk [vmem:[#allocation2 + $0x60] sm:$0xff] %vm246_vm0, %v4379_v0  ;;  %v380_v3 = vld [vmem:[#allocation2 + $0x8] sm:$0xff]  ;;  %v452_v5 = vmul.f32 %v4631_v1, %v379_v2  ;;  %v4751_v2 = vld [vmem:[#allocation3 + $0x7] ss:$0 sm:$0xff]  ;;  %s3881_s7 = scalar_lea.hbm %s9378_s3, %s4015_s28  ;;  %s4308_s10 = scalar_lea.hbm %s9378_s3, 512 }
  0x33   : > { %261 = vst.msk [vmem:[#allocation2 + $0x68] sm:$0xff] %vm246_vm0, %v4379_v0  ;;  %v382_v7 = vld [vmem:[#allocation2 + $0x18] sm:$0xff]  ;;  %v453_v11 = vmul.f32 %v4631_v1, %v380_v3  ;;  %s3884_s15 = sshll.u32 %s3881_s7, 4  ;;  %s3885_s15 = int_to_ptr.hbm [resolvable:$true] %s3884_s15 }
  0x34   : > { %263 = vst.msk [vmem:[#allocation2 + $0x78] sm:$0xff] %vm246_vm0, %v4379_v0  ;;  %v383_v12 = vld [vmem:[#allocation2 + $0x20] sm:$0xff]  ;;  %v455_v13 = vmul.f32 %v4631_v1, %v382_v7  ;;  %v500_v14 = vadd.f32 %v4644_v4, %v452_v5  ;;  %v550_v17 = vmul.f32 %v4649_v6, %v382_v7  ;;  %v4753_v3 = vld [vmem:[#allocation3 + $0xa] ss:$0 sm:$0xff]  ;;  %s4302_s20 = sshra.s32 %s3885_s15, 4  ;;  %s4303_s20 = int_to_ptr.hbm [resolvable:$true] %s4302_s20 }
  0x35   : > { %264 = vst.msk [vmem:[#allocation2 + $0x80] sm:$0xff] %vm246_vm0, %v4379_v0  ;;  %v385_v9 = vld [vmem:[#allocation2 + $0x30] sm:$0xff]  ;;  %v456_v15 = vmul.f32 %v4631_v1, %v383_v12  ;;  %v501_v21 = vadd.f32 %v4644_v4, %v453_v11  ;;  %v551_v22 = vmul.f32 %v4649_v6, %v383_v12  ;;  %s4304_s22 = scalar_lea.hbm %s4303_s20, 256  ;;  %p4309_p10 = scmp.lt.s32.totalorder %s4303_s20, %s9378_s3 }
  0x36   : > { %266 = vst.msk [vmem:[#allocation2 + $0x90] sm:$0xff] %vm246_vm0, %v4379_v0  ;;  %v4655_v10 = vld [vmem:[#allocation2 + $0x38] sm:$0xff]  ;;  %v648_v18 = vmul.f32 %v4653_v8, %v385_v9  ;;  %v503_v24 = vadd.f32 %v4644_v4, %v455_v13  ;;  %v553_v30 = vmul.f32 %v4649_v6, %v385_v9  ;;  %v598_v32 = vadd.f32 %v550_v17, %v500_v14  ;;  %v325_v17 = vld [vmem:[%s4517_s0 + $0x58] sm:$0xff]  ;;  %p4305_p1 = scmp.ne.s32.totalorder %s4303_s20, %s4304_s22  ;;  %p4310_p12 = scmp.lt.s32.totalorder %s4308_s10, %s4304_s22 }
  0x37   : > { %267 = vst.msk [vmem:[#allocation2 + $0x98] sm:$0xff] %vm246_vm0, %v4379_v0  ;;  %v4673_v19 = vmul.f32 %v4653_v8, %v4655_v10  ;;  %v504_v28 = vadd.f32 %v4644_v4, %v456_v15  ;;  %v554_v31 = vmul.f32 %v4649_v6, %v4655_v10  ;;  %v4695_v34 = vmul.f32 %v4631_v1, %v385_v9  ;;  %v324_v13 = vld [vmem:[%s4517_s0 + $0x50] sm:$0xff] }
  0x38   : > { %269 = vst.msk [vmem:[#allocation2 + $0xa8] sm:$0xff] %vm246_vm0, %v4379_v0  ;;  %v4699_v35 = vmul.f32 %v4631_v1, %v4655_v10  ;;  %v745_v38 = vrot.slane %v648_v18, 7  ;;  %v599_v42 = vadd.f32 %v551_v22, %v501_v21  ;;  %v1021_v49 = vmul.f32 %v4704_v39, %v385_v9  ;;  %v4768_v15 = vld [vmem:[#allocation3 + $0xb] ss:$0 sm:$0xff]  ;;  %p4306_p4 = pnand %p4305_p1, %p4484_p5  ;;  %p4311_p13 = por %p4310_p12, %p4309_p10 }
  0x39   : > { %270 = vst.msk [vmem:[#allocation2 + $0xb0] sm:$0xff] %vm246_vm0, %v4379_v0  ;;  %v746_v36 = vrot.slane %v4673_v19, 7  ;;  %v4723_v50 = vmul.f32 %v4704_v39, %v4655_v10  ;;  %v4725_v51 = vadd.f32 %v553_v30, %v503_v24  ;;  %v4727_v52 = vadd.f32 %v554_v31, %v504_v28  ;;  %v327_v24 = vld [vmem:[%s4517_s0 + $0x68] sm:$0xff]  ;;  %v328_v30 = vld [vmem:[%s4517_s0 + $0x70] sm:$0xff]  ;;  %v330_v19 = vld [vmem:[%s4517_s0 + $0x80] sm:$0xff] }
  0x3a   : > { %272 = vst.msk [vmem:[#allocation2 + $0xc0] sm:$0xff] %vm246_vm0, %v4379_v0  ;;  %v873_v54 = vadd.f32 %v745_v38, %v598_v32  ;;  %v923_v55 = vmul.f32 %v4710_v44, %v385_v9  ;;  %v1118_v60 = vrot.slane %v1021_v49, 1  ;;  %v924_v28 = vmul.f32 %v4710_v44, %v4655_v10  ;;  %p4307_p8 = pneg %p4306_p4 }
  0x3b   : > { %273 = vst.msk [vmem:[#allocation2 + $0xc8] sm:$0xff] %vm246_vm0, %v4379_v0  ;;  %v1119_v61 = vrot.slane %v4723_v50, 1  ;;  %v747_v63 = vsel %vm744_vm2, %v745_v38, %v746_v36  ;;  %v333_v50 = vld [vmem:[%s4517_s0 + $0x98] sm:$0xff] }
  0x3c   : > { %275 = vst.msk [vmem:[#allocation2 + $0xd8] sm:$0xff] %vm246_vm0, %v4379_v0  ;;  %v874_v22 = vadd.f32 %v747_v63, %v599_v42  ;;  %v4818_v42 = vld [vmem:[#allocation3 + $0xe] ss:$0 sm:$0xff]  ;;  %p4312_p0 = pnand %p4311_p13, %p4307_p8 }
  0x3d   : > { %276 = vst.msk [vmem:[#allocation2 + $0xe0] sm:$0xff] %vm246_vm0, %v4379_v0  ;;  %v1120_v14 = vsel %vm1117_vm3, %v1118_v60, %v1119_v61  ;;  %v331_v60 = vld [vmem:[%s4517_s0 + $0x88] sm:$0xff] }
  0x3e   : > { %278 = vst.msk [vmem:[#allocation2 + $0xf0] sm:$0xff] %vm246_vm0, %v4379_v0 }
  0x3f   : > { %279 = vst.msk [vmem:[#allocation2 + $0xf8] sm:$0xff] %vm246_vm0, %v4379_v0 }
  0x40   : > { %281 = vst.msk [vmem:[#allocation2 + $0x108] sm:$0xff] %vm246_vm0, %v4379_v0 }
  0x41   : > { %282 = vst.msk [vmem:[#allocation2 + $0x110] sm:$0xff] %vm246_vm0, %v4379_v0 }
  0x42   : > { %284 = vst.msk [vmem:[#allocation2 + $0x120] sm:$0xff] %vm246_vm0, %v4379_v0 }
  0x43   : > { %285 = vst.msk [vmem:[#allocation2 + $0x128] sm:$0xff] %vm246_vm0, %v4379_v0 }
  0x44   : > { %287 = vst.msk [vmem:[#allocation2 + $0x138] sm:$0xff] %vm246_vm0, %v4379_v0 }
  0x45   : > { %288 = vst.msk [vmem:[#allocation2 + $0x140] sm:$0xff] %vm246_vm0, %v4379_v0 }
  0x46   : > { %290 = vst.msk [vmem:[#allocation2 + $0x150] sm:$0xff] %vm246_vm0, %v4379_v0 }
  0x47   : > { %291 = vst.msk [vmem:[#allocation2 + $0x158] sm:$0xff] %vm246_vm0, %v4379_v0 }
  0x48   : > { %293 = vst.msk [vmem:[#allocation2 + $0x168] sm:$0xff] %vm246_vm0, %v4379_v0 }
  0x49   : > { %294 = vst.msk [vmem:[#allocation2 + $0x170] sm:$0xff] %vm246_vm0, %v4379_v0 }
  0x4a   : > { %296 = vst.msk [vmem:[#allocation2 + $0x180] sm:$0xff] %vm246_vm0, %v4379_v0 }
  0x4b   : > { %297 = vst.msk [vmem:[#allocation2 + $0x188] sm:$0xff] %vm246_vm0, %v4379_v0 }
  0x4c   : > { %299 = vst.msk [vmem:[#allocation2 + $0x198] sm:$0xff] %vm246_vm0, %v4379_v0 }
  0x4d   : > { %300 = vst.msk [vmem:[#allocation2 + $0x1a0] sm:$0xff] %vm246_vm0, %v4379_v0 }
  0x4e   : > { %302 = vst.msk [vmem:[#allocation2 + $0x1b0] sm:$0xff] %vm246_vm0, %v4379_v0 }
  0x4f   : > { %303 = vst.msk [vmem:[#allocation2 + $0x1b8] sm:$0xff] %vm246_vm0, %v4379_v0 }
  0x50   : > { %305 = vst.msk [vmem:[#allocation2 + $0x1c8] sm:$0xff] %vm246_vm0, %v4379_v0 }
  0x51   : > { %306 = vst.msk [vmem:[#allocation2 + $0x1d0] sm:$0xff] %vm246_vm0, %v4379_v0 }
  0x52   : > { %308 = vst.msk [vmem:[#allocation2 + $0x1e0] sm:$0xff] %vm246_vm0, %v4379_v0 }
  0x53   : > { %309 = vst.msk [vmem:[#allocation2 + $0x1e8] sm:$0xff] %vm246_vm0, %v4379_v0 }
  0x54   : > { %311 = vst.msk [vmem:[#allocation2 + $0x1f8] sm:$0xff] %vm246_vm0, %v4379_v0 }
  0x55   : > { %312 = vst.msk [vmem:[#allocation2 + $0x200] sm:$0xff] %vm246_vm0, %v4379_v0 }
  0x56   : > { %250 = vst.msk [vmem:[#allocation2 + $0x10] sm:$0x3f] %vm249_vm1, %v4379_v0 }
  0x57   : > { %253 = vst.msk [vmem:[#allocation2 + $0x28] sm:$0x3f] %vm249_vm1, %v4379_v0 }
  0x58   : > { %256 = vst.msk [vmem:[#allocation2 + $0x40] sm:$0x3f] %vm249_vm1, %v4379_v0 }
  0x59   : > { %259 = vst.msk [vmem:[#allocation2 + $0x58] sm:$0x3f] %vm249_vm1, %v4379_v0 }
  0x5a   : > { %262 = vst.msk [vmem:[#allocation2 + $0x70] sm:$0x3f] %vm249_vm1, %v4379_v0 }
  0x5b   : > { %265 = vst.msk [vmem:[#allocation2 + $0x88] sm:$0x3f] %vm249_vm1, %v4379_v0 }
  0x5c   : > { %268 = vst.msk [vmem:[#allocation2 + $0xa0] sm:$0x3f] %vm249_vm1, %v4379_v0 }
  0x5d   : > { %271 = vst.msk [vmem:[#allocation2 + $0xb8] sm:$0x3f] %vm249_vm1, %v4379_v0  ;;  %v381_v16 = vld [vmem:[#allocation2 + $0x10] sm:$0x3f] }
  0x5e   : > { %274 = vst.msk [vmem:[#allocation2 + $0xd0] sm:$0x3f] %vm249_vm1, %v4379_v0  ;;  %v454_v25 = vmul.f32 %v4631_v1, %v381_v16  ;;  %v384_v26 = vld [vmem:[#allocation2 + $0x28] sm:$0x3f] }
  0x5f   : > { %277 = vst.msk [vmem:[#allocation2 + $0xe8] sm:$0x3f] %vm249_vm1, %v4379_v0  ;;  %v4687_v29 = vld [vmem:[#allocation2 + $0x40] sm:$0x3f]  ;;  %v457_v40 = vmul.f32 %v4631_v1, %v384_v26  ;;  %v552_v41 = vmul.f32 %v4649_v6, %v384_v26 }
  0x60   : > { %280 = vst.msk [vmem:[#allocation2 + $0x100] sm:$0x3f] %vm249_vm1, %v4379_v0  ;;  %v502_v45 = vadd.f32 %v4644_v4, %v454_v25  ;;  %v4715_v46 = vmul.f32 %v4653_v8, %v4687_v29  ;;  %v4738_v58 = vmul.f32 %v4631_v1, %v4687_v29  ;;  %v971_v1 = vadd.f32 %v923_v55, %v873_v54 }
  0x61   : > { %283 = vst.msk [vmem:[#allocation2 + $0x118] sm:$0x3f] %vm249_vm1, %v4379_v0  ;;  %v4757_v5 = vmul.f32 %v4704_v39, %v4687_v29  ;;  %v505_v7 = vadd.f32 %v4644_v4, %v457_v40 }
  0x62   : > { %286 = vst.msk [vmem:[#allocation2 + $0x130] sm:$0x3f] %vm249_vm1, %v4379_v0  ;;  %v600_v9 = vadd.f32 %v552_v41, %v502_v45  ;;  %v748_v11 = vrot.slane %v4715_v46, 7  ;;  %v1246_v18 = vadd.f32 %v1120_v14, %v971_v1  ;;  %v4816_v41 = vld [vmem:[#allocation3 + $0xc] ss:$0 sm:$0xff]  ;;  %v329_v46 = vld [vmem:[%s4517_s0 + $0x78] sm:$0xff]  ;;  %v972_v1 = vadd.f32 %v924_v28, %v874_v22 }
  0x63   : > { %289 = vst.msk [vmem:[#allocation2 + $0x148] sm:$0x3f] %vm249_vm1, %v4379_v0  ;;  %v9380_v38 = vrot.slane %v4757_v5, 1  ;;  %v336_v28 = vld [vmem:[%s4517_s0 + $0xb0] sm:$0xff] }
  0x64   : > { %292 = vst.msk [vmem:[#allocation2 + $0x160] sm:$0x3f] %vm249_vm1, %v4379_v0 }
  0x65   : > { %9679 = vst [vmem:[#allocation12_spill] sm:$0xff] %v4649_v6 }
  0x66   : > { %295 = vst.msk [vmem:[#allocation2 + $0x178] sm:$0x3f] %vm249_vm1, %v4379_v0 }
  0x67   : > { %298 = vst.msk [vmem:[#allocation2 + $0x190] sm:$0x3f] %vm249_vm1, %v4379_v0 }
  0x68   : > { %301 = vst.msk [vmem:[#allocation2 + $0x1a8] sm:$0x3f] %vm249_vm1, %v4379_v0 }
  0x69   : > { %304 = vst.msk [vmem:[#allocation2 + $0x1c0] sm:$0x3f] %vm249_vm1, %v4379_v0 }
  0x6a   : > { %307 = vst.msk [vmem:[#allocation2 + $0x1d8] sm:$0x3f] %vm249_vm1, %v4379_v0 }
  0x6b   : > { %310 = vst.msk [vmem:[#allocation2 + $0x1f0] sm:$0x3f] %vm249_vm1, %v4379_v0 }
  0x6c   : > { %313 = vst.msk [vmem:[#allocation2 + $0x208] sm:$0x3f] %vm249_vm1, %v4379_v0  ;;  %v555_v0 = vmul.f32 %v4649_v6, %v4687_v29 }
  0x6d   : > { %347 = vst.msk [vmem:[#allocation2 + $0x4b] sm:$0xff] %vm246_vm0, %v314_v20 }
  0x6e   : > { %9680 = vst [vmem:[#allocation13_spill] sm:$0xff] %v4699_v35  ;;  %v4809_v40 = vadd.f32 %v555_v0, %v505_v7  ;;  %v1122_v7 = vsel %vm1117_vm3, %v1119_v61, %v9380_v38  ;;  %v337_v38 = vld [vmem:[%s4517_s0 + $0xb8] sm:$0xff] }
  0x6f   : > { %348 = vst.msk [vmem:[#allocation2 + $0x53] sm:$0xff] %vm246_vm0, %v315_v23  ;;  %v326_v23 = vld [vmem:[%s4517_s0 + $0x60] sm:$0xff] }
  0x70   : > { %349 = vst.msk [vmem:[#allocation2 + $0x63] sm:$0xff] %vm246_vm0, %v316_v27 }
  0x71   : > { %350 = vst.msk [vmem:[#allocation2 + $0x6b] sm:$0xff] %vm246_vm0, %v317_v33  ;;  %v4802_v33 = vld [vmem:[#allocation3 + $0x8] ss:$0 sm:$0xff] }
  0x72   : > { %9681 = vst [vmem:[#allocation14_spill] sm:$0xff] %v4727_v52 }
  0x73   : > { %351 = vst.msk [vmem:[#allocation2 + $0x7b] sm:$0xff] %vm246_vm0, %v318_v37 }
  0x74   : > { %9682 = vst [vmem:[#allocation15_spill] sm:$0xff] %v4738_v58  ;;  %v4761_v12 = vld [vmem:[#allocation2 + $0x48] sm:$0xff] }
  0x75   : > { %352 = vst.msk [vmem:[#allocation2 + $0x83] sm:$0xff] %vm246_vm0, %v319_v43  ;;  %v4776_v20 = vmul.f32 %v4732_v56, %v4761_v12  ;;  %v4780_v21 = vmul.f32 %v4734_v57, %v4761_v12  ;;  %v2154_v25 = vmul.f32 %v4743_v62, %v4761_v12  ;;  %v2428_v27 = vmul.f32 %v4753_v3, %v4761_v12 }
  0x76   : > { %353 = vst.msk [vmem:[#allocation2 + $0x93] sm:$0xff] %vm246_vm0, %v320_v47  ;;  %v4770_v16 = vld [vmem:[#allocation2 + $0x50] sm:$0xff]  ;;  %v4800_v32 = vmul.f32 %v4751_v2, %v4761_v12  ;;  %v4814_v10 = vmul.f32 %v4768_v15, %v4761_v12  ;;  %v749_v43 = vsel %vm744_vm2, %v746_v36, %v748_v11  ;;  %v332_v11 = vld [vmem:[%s4517_s0 + $0x90] sm:$0xff] }
  0x77   : > { %9683 = vst [vmem:[#allocation16_spill] sm:$0xff] %v4761_v12  ;;  %v4789_v26 = vmul.f32 %v4743_v62, %v4770_v16  ;;  %v1361_v31 = vrot.slane %v4776_v20, 5  ;;  %v4806_v37 = vmul.f32 %v4753_v3, %v4770_v16  ;;  %v4823_v45 = vld [vmem:[#allocation2 + $0x60] sm:$0xff]  ;;  %v2250_v49 = vrot.slane %v2154_v25, 1  ;;  %v4859_v22 = vld [vmem:[#allocation2 + $0x58] sm:$0x3f] }
  0x78   : > { %354 = vst.msk [vmem:[#allocation2 + $0x9b] sm:$0xff] %vm246_vm0, %v321_v48  ;;  %v9385_v48 = vrot.slane %v4780_v21, 6  ;;  %v4831_v54 = vld [vmem:[#allocation2 + $0x68] sm:$0xff]  ;;  %v2525_v36 = vrot.slane %v2428_v27, 2  ;;  %v9383_v0 = vrot.slane %v4800_v32, 7  ;;  %v2800_v14 = vrot.slane %v4814_v10, 3 }
  0x79   : > { %355 = vst.msk [vmem:[#allocation2 + $0xab] sm:$0xff] %vm246_vm0, %v322_v53  ;;  %v1457_v47 = vadd.f32 %v1361_v31, %v1246_v18  ;;  %v9382_v53 = vrot.slane %v4789_v26, 1  ;;  %v9381_v55 = vrot.slane %v4806_v37, 2  ;;  %v4857_v18 = vadd.f32 %v749_v43, %v600_v9  ;;  %v334_v25 = vld [vmem:[%s4517_s0 + $0xa0] sm:$0xff]  ;;  %v335_v27 = vld [vmem:[%s4517_s0 + $0xa8] sm:$0xff] }
  0x7a   : > { %356 = vst.msk [vmem:[#allocation2 + $0xb3] sm:$0xff] %vm246_vm0, %v323_v59  ;;  %v4838_v59 = vmul.f32 %v4768_v15, %v4770_v16  ;;  %v4874_v9 = vmul.f32 %v4818_v42, %v4831_v54  ;;  %v4886_v43 = vmul.f32 %v4732_v56, %v4770_v16  ;;  %v9696_v52 = vrot.slane %v4806_v37, 2 }
  0x7b   : > { %357 = vst.msk [vmem:[#allocation2 + $0xc3] sm:$0xff] %vm246_vm0, %v324_v13  ;;  %v1732_v63 = vadd.f32 %v9385_v48, %v1457_v47  ;;  %v2056_v13 = vmul.f32 %v4802_v33, %v4761_v12  ;;  %v340_v48 = vld [vmem:[%s4517_s0 + $0xd0] sm:$0xff] }
  0x7c   : > { %9684 = vst [vmem:[#allocation17_spill] sm:$0xff] %v4809_v40  ;;  %v9386_v10 = vrot.slane %v4838_v59, 3 }
  0x7d   : > { %358 = vst.msk [vmem:[#allocation2 + $0xcb] sm:$0xff] %vm246_vm0, %v325_v17  ;;  %v3350_v17 = vmul.f32 %v4818_v42, %v4823_v45  ;;  %v2006_v61 = vadd.f32 %v9383_v0, %v1732_v63  ;;  %v4901_v63 = vld [vmem:[#allocation2 + $0x78] sm:$0xff]  ;;  %v338_v0 = vld [vmem:[%s4517_s0 + $0xc0] sm:$0xff] }
  0x7e   : > { %9685 = vst [vmem:[#allocation18_spill] sm:$0xff] %v4823_v45 }
  0x7f   : > { %359 = vst.msk [vmem:[#allocation2 + $0xdb] sm:$0xff] %vm246_vm0, %v326_v23  ;;  %v2252_v23 = vsel %vm1117_vm3, %v2250_v49, %v9382_v53  ;;  %v2104_v47 = vadd.f32 %v2056_v13, %v2006_v61  ;;  %v4893_v49 = vld [vmem:[#allocation3 + $0xd] ss:$0 sm:$0xff]  ;;  %v4913_v53 = vld [vmem:[#allocation3 + $0x10] ss:$0 sm:$0xff]  ;;  %v2802_v13 = vsel %vm2799_vm5, %v2800_v14, %v9386_v10  ;;  %v9690_v14 = vrot.slane %v4874_v9, 1 }
  0x80   : > { %360 = vst.msk [vmem:[#allocation2 + $0xe3] sm:$0xff] %vm246_vm0, %v327_v24  ;;  %v4870_v24 = vmul.f32 %v4816_v41, %v4823_v45 }
  0x81   : > { %361 = vst.msk [vmem:[#allocation2 + $0xf3] sm:$0xff] %vm246_vm0, %v328_v30  ;;  %v2527_v30 = vsel %vm2524_vm4, %v2525_v36, %v9381_v55  ;;  %v4899_v36 = vmul.f32 %v4751_v2, %v4770_v16  ;;  %v3446_v55 = vrot.slane %v3350_v17, 1  ;;  %v4935_v17 = vmul.f32 %v4816_v41, %v4831_v54 }
  0x82   : > { %362 = vst.msk [vmem:[#allocation2 + $0xfb] sm:$0xff] %vm246_vm0, %v329_v46  ;;  %v4890_v46 = vmul.f32 %v4734_v57, %v4770_v16  ;;  %v3074_v20 = vrot.slane %v4870_v24, 7 }
  0x83   : > { %363 = vst.msk [vmem:[#allocation2 + $0x10b] sm:$0xff] %vm246_vm0, %v330_v19  ;;  %v4895_v19 = vld [vmem:[#allocation3 + $0xf] ss:$0 sm:$0xff]  ;;  %v3448_v10 = vsel %vm1117_vm3, %v3446_v55, %v9690_v14  ;;  %v2057_v14 = vmul.f32 %v4802_v33, %v4770_v16  ;;  %v9694_v55 = vrot.slane %v4789_v26, 1  ;;  %v3253_v26 = vmul.f32 %v4893_v49, %v4831_v54 }
  0x84   : > { %364 = vst.msk [vmem:[#allocation2 + $0x113] sm:$0xff] %vm246_vm0, %v331_v60  ;;  %v1247_v60 = vadd.f32 %v1122_v7, %v972_v1  ;;  %v4909_v1 = vmul.f32 %v4743_v62, %v4859_v22  ;;  %v2378_v7 = vadd.f32 %v2252_v23, %v2104_v47  ;;  %v4927_v23 = vmul.f32 %v4753_v3, %v4859_v22 }
  0x85   : > { %365 = vst.msk [vmem:[#allocation2 + $0x123] sm:$0xff] %vm246_vm0, %v332_v11  ;;  %v9384_v11 = vrot.slane %v4886_v43, 5  ;;  %v4931_v47 = vmul.f32 %v4768_v15, %v4859_v22  ;;  %v3624_v58 = vmul.f32 %v4895_v19, %v4901_v63 }
  0x86   : > { %9686 = vst [vmem:[#allocation19_spill] sm:$0xff] %v4901_v63  ;;  %v2653_v61 = vadd.f32 %v2527_v30, %v2378_v7  ;;  %v9689_v30 = vrot.slane %v4780_v21, 6  ;;  %v342_v21 = vld [vmem:[%s4517_s0 + $0xe0] sm:$0xff]  ;;  %v4980_v7 = vld [vmem:[#allocation2 + $0x80] sm:$0xff] }
  0x87   : > { %366 = vst.msk [vmem:[#allocation2 + $0x12b] sm:$0xff] %vm246_vm0, %v333_v50  ;;  %v4916_v50 = vld [vmem:[#allocation2 + $0x90] sm:$0xff]  ;;  %v9697_v6 = vrot.slane %v4931_v47, 3  ;;  %v3625_v37 = vmul.f32 %v4895_v19, %v4980_v7 }
  0x88   : > { %367 = vst.msk [vmem:[#allocation2 + $0x13b] sm:$0xff] %vm246_vm0, %v334_v25  ;;  %v1363_v25 = vsel %vm1360_vm6, %v1361_v31, %v9384_v11  ;;  %v3252_v31 = vmul.f32 %v4893_v49, %v4823_v45  ;;  %v3722_v35 = vmul.f32 %v4913_v53, %v4916_v50 }
  0x89   : > { %9687 = vst [vmem:[#allocation20_spill] sm:$0xff] %v4916_v50  ;;  %v1458_v11 = vadd.f32 %v1363_v25, %v1247_v60  ;;  %v4955_v60 = vld [vmem:[#allocation2 + $0x70] sm:$0x3f]  ;;  %v2928_v25 = vadd.f32 %v2802_v13, %v2653_v61 }
  0x8a   : > { %368 = vst.msk [vmem:[#allocation2 + $0x143] sm:$0xff] %vm246_vm0, %v335_v27  ;;  %v339_v27 = vld [vmem:[%s4517_s0 + $0xc8] sm:$0xff] }
  0x8b   : > { %369 = vst.msk [vmem:[#allocation2 + $0x153] sm:$0xff] %vm246_vm0, %v336_v28  ;;  %v9688_v28 = vrot.slane %v4890_v46, 6 }
  0x8c   : > { %370 = vst.msk [vmem:[#allocation2 + $0x15b] sm:$0xff] %vm246_vm0, %v337_v38  ;;  %v341_v38 = vld [vmem:[%s4517_s0 + $0xd8] sm:$0xff] }
  0x8d   : > { %v1606_v24 = vsel %vm1603_vm7, %v9689_v30, %v9688_v28  ;;  %371 = vst.msk [vmem:[#allocation2 + $0x16b] sm:$0xff] %vm246_vm0, %v338_v0  ;;  %v9691_v28 = vrot.slane %v4899_v36, 7  ;;  %v9692_v30 = vrot.slane %v4800_v32, 7  ;;  %v925_v32 = vmul.f32 %v4710_v44, %v4687_v29 }
  0x8e   : > { %v1733_v40 = vadd.f32 %v1606_v24, %v1458_v11  ;;  %372 = vst.msk [vmem:[#allocation2 + $0x173] sm:$0xff] %vm246_vm0, %v339_v27  ;;  %v343_v11 = vld [vmem:[%s4517_s0 + $0xe8] sm:$0xff]  ;;  %v3202_v24 = vadd.f32 %v3074_v20, %v2928_v25  ;;  %v1509_v25 = vmul.f32 %v4734_v57, %v4859_v22  ;;  %v1784_v29 = vmul.f32 %v4751_v2, %v4859_v22 }
  0x8f   : > { %v1880_v0 = vsel %vm744_vm2, %v9692_v30, %v9691_v28  ;;  %373 = vst.msk [vmem:[#allocation2 + $0x183] sm:$0xff] %vm246_vm0, %v340_v48  ;;  %v344_v28 = vld [vmem:[%s4517_s0 + $0xf0] sm:$0xff]  ;;  %v9693_v30 = vrot.slane %v4909_v1, 1 }
  0x90   : > { %v2007_v27 = vadd.f32 %v1880_v0, %v1733_v40  ;;  %374 = vst.msk [vmem:[#allocation2 + $0x18b] sm:$0xff] %vm246_vm0, %v341_v38  ;;  %v4991_v40 = vmul.f32 %v4818_v42, %v4955_v60  ;;  %v4997_v0 = vld [vmem:[#allocation2 + $0x98] sm:$0xff]  ;;  %v345_v38 = vld [vmem:[%s4517_s0 + $0xf8] sm:$0xff]  ;;  %v3300_v61 = vadd.f32 %v3252_v31, %v3202_v24  ;;  %v9699_v24 = vrot.slane %v4935_v17, 7  ;;  %s3869_s0 = scalar_lea.sflag [#allocation5], %s4511_s6 }
  0x91   : > { %v2254_v48 = vsel %vm1117_vm3, %v9694_v55, %v9693_v30  ;;  %375 = vst.msk [vmem:[#allocation2 + $0x19b] sm:$0xff] %vm246_vm0, %v342_v21  ;;  %v973_v55 = vadd.f32 %v925_v32, %v4857_v18  ;;  %v9695_v30 = vrot.slane %v4927_v23, 2  ;;  %v9698_v21 = vrot.slane %v4838_v59, 3 }
  0x92   : > { %v2105_v13 = vadd.f32 %v2057_v14, %v2007_v27  ;;  %376 = vst.msk [vmem:[#allocation2 + $0x1a3] sm:$0xff] %vm246_vm0, %v343_v11  ;;  %v3076_v27 = vsel %vm744_vm2, %v3074_v20, %v9699_v24  ;;  %v1607_v14 = vrot.slane %v1509_v25, 6  ;;  %v3574_v18 = vadd.f32 %v3448_v10, %v3300_v61 }
  0x93   : > { %v2529_v50 = vsel %vm2524_vm4, %v9696_v52, %v9695_v30  ;;  %v2804_v31 = vsel %vm2799_vm5, %v9698_v21, %v9697_v6  ;;  %377 = vst.msk [vmem:[#allocation2 + $0x1b3] sm:$0xff] %vm246_vm0, %v344_v28  ;;  %v9700_v52 = vrot.slane %v4757_v5, 1  ;;  %v3449_v59 = vrot.slane %v4991_v40, 1 }
  0x94   : > { %v2379_v11 = vadd.f32 %v2254_v48, %v2105_v13  ;;  %378 = vst.msk [vmem:[#allocation2 + $0x1bb] sm:$0xff] %vm246_vm0, %v345_v38  ;;  %v3723_v6 = vmul.f32 %v4913_v53, %v4997_v0  ;;  %v1881_v30 = vrot.slane %v1784_v29, 7  ;;  %v2980_v20 = vmul.f32 %v4816_v41, %v4955_v60 }
  0x95   : > { %v1248_v32 = vadd.f32 %v9700_v52, %v973_v55  ;;  %v3672_v28 = vadd.f32 %v3624_v58, %v3574_v18  ;;  %v9701_v13 = vrot.slane %v4886_v43, 5  ;;  %v2058_v5 = vmul.f32 %v4802_v33, %v4859_v22 }
  0x96   : > { %v2654_v10 = vadd.f32 %v2529_v50, %v2379_v11  ;;  %v9702_v48 = vrot.slane %v4890_v46, 6  ;;  %v5038_v38 = vmul.f32 %v4653_v8, %v4761_v12  ;;  %v1024_v29 = vmul.f32 %v4704_v39, %v4761_v12 }
  0x97   : > { %v1459_v61 = vadd.f32 %v9701_v13, %v1248_v32  ;;  %v5044_v58 = vmul.f32 %v4704_v39, %v4770_v16  ;;  %v3770_v43 = vadd.f32 %v3722_v35, %v3672_v28  ;;  %v5048_v21 = vmul.f32 %v4732_v56, %v4823_v45 }
  0x98   : > { %v1608_v25 = vsel %vm1603_vm7, %v9702_v48, %v1607_v14  ;;  %v2929_v50 = vadd.f32 %v2804_v31, %v2654_v10  ;;  %v9703_v46 = vrot.slane %v4874_v9, 1  ;;  %v9704_v14 = vrot.slane %v4899_v36, 7 }
  0x99   : > { %v1734_v55 = vadd.f32 %v1608_v25, %v1459_v61  ;;  %v3077_v11 = vrot.slane %v2980_v20, 7  ;;  %v9397_v52 = vrot.slane %v5038_v38, 7  ;;  %3819 = vst.msk [vmem:[%s5061_s27 - $0x3] sm:$0xf8] %vm3818_vm8, %v3770_v43  ;;  %v1123_v32 = vrot.slane %v1024_v29, 1 }
  0x9a   : > { %v3450_v24 = vsel %vm1117_vm3, %v9703_v46, %v3449_v59  ;;  %v1882_v18 = vsel %vm744_vm2, %v9704_v14, %v1881_v30  ;;  %v3203_v35 = vadd.f32 %v3076_v27, %v2929_v50  ;;  %v9396_v9 = vrot.slane %v5044_v58, 1  ;;  %v5090_v43 = vld [vmem:[#allocation2 + $0x88] sm:$0x3f]  ;;  %v5101_v14 = vld [vmem:[#allocation2 + $0xa0] sm:$0x3f] }
  0x9b   : > { %v2008_v31 = vadd.f32 %v1882_v18, %v1734_v55  ;;  %v3254_v28 = vmul.f32 %v4893_v49, %v4955_v60  ;;  %v876_v36 = vadd.f32 %v9397_v52, %v4725_v51  ;;  %v926_v30 = vmul.f32 %v4710_v44, %v4761_v12 }
  0x9c   : > { %v5075_v20 = vmul.f32 %v4734_v57, %v4823_v45  ;;  %v3301_v10 = vadd.f32 %v3253_v26, %v3203_v35  ;;  %v9391_v13 = vrot.slane %v5048_v21, 5  ;;  %v2157_v61 = vmul.f32 %v4743_v62, %v4823_v45 }
  0x9d   : > { %v2106_v27 = vadd.f32 %v2058_v5, %v2008_v31  ;;  %v974_v48 = vadd.f32 %v926_v30, %v876_v36  ;;  %v5082_v25 = vmul.f32 %v4743_v62, %v4831_v54  ;;  %v2431_v51 = vmul.f32 %v4753_v3, %v4823_v45 }
  0x9e   : > { %v5088_v29 = vmul.f32 %v4753_v3, %v4831_v54  ;;  %v3575_v26 = vadd.f32 %v3450_v24, %v3301_v10  ;;  %v9705_v5 = vrot.slane %v4909_v1, 1  ;;  %v1125_v55 = vsel %vm1117_vm3, %v1123_v32, %v9396_v9 }
  0x9f   : > { %v5099_v46 = vmul.f32 %v4751_v2, %v4823_v45  ;;  %v1249_v18 = vadd.f32 %v1125_v55, %v974_v48  ;;  %v2255_v35 = vrot.slane %v2157_v61, 1  ;;  %v9393_v31 = vrot.slane %v5082_v25, 1 }
  0xa0   : > { %v2380_v50 = vadd.f32 %v9705_v5, %v2106_v27  ;;  %v2706_v24 = vmul.f32 %v4768_v15, %v4823_v45  ;;  %v3673_v36 = vadd.f32 %v3625_v37, %v3575_v26  ;;  %v9706_v1 = vrot.slane %v4927_v23, 2 }
  0xa1   : > { %v2530_v10 = vrot.slane %v2431_v51, 2  ;;  %v9392_v32 = vrot.slane %v5088_v29, 2  ;;  %v3626_v27 = vmul.f32 %v4895_v19, %v5090_v43  ;;  %v1460_v48 = vadd.f32 %v9391_v13, %v1249_v18 }
  0xa2   : > { %v2655_v30 = vadd.f32 %v9706_v1, %v2380_v50  ;;  %v9395_v61 = vrot.slane %v5075_v20, 6  ;;  %v5116_v5 = vmul.f32 %v4768_v15, %v4831_v54  ;;  %v3771_v37 = vadd.f32 %v3723_v6, %v3673_v36 }
  0xa3   : > { %v9707_v23 = vrot.slane %v4931_v47, 3  ;;  %v9708_v51 = vrot.slane %v4935_v17, 7  ;;  %v3724_v55 = vmul.f32 %v4913_v53, %v5101_v14  ;;  %v9394_v1 = vrot.slane %v5099_v46, 7 }
  0xa4   : > { %v1735_v18 = vadd.f32 %v9395_v61, %v1460_v48  ;;  %v2059_v13 = vmul.f32 %v4802_v33, %v4823_v45  ;;  %v2805_v6 = vrot.slane %v2706_v24, 3  ;;  %3820 = vst.msk [vmem:[%s5061_s27 + $0x5] sm:$0xff] %vm246_vm0, %v3771_v37  ;;  %v2257_v17 = vsel %vm1117_vm3, %v2255_v35, %v9393_v31 }
  0xa5   : > { %v2930_v26 = vadd.f32 %v9707_v23, %v2655_v30  ;;  %v3078_v50 = vsel %vm744_vm2, %v9708_v51, %v3077_v11  ;;  %v2532_v11 = vsel %vm2524_vm4, %v2530_v10, %v9392_v32  ;;  %v5140_v36 = vmul.f32 %v4816_v41, %v4901_v63  ;;  %v9709_v10 = vld [vmem:[#allocation12_spill] sm:$0xff] }
  0xa6   : > { %v2009_v30 = vadd.f32 %v9394_v1, %v1735_v18  ;;  %v9401_v24 = vrot.slane %v5116_v5, 3  ;;  %v3255_v48 = vmul.f32 %v4893_v49, %v4901_v63  ;;  %v506_v37 = vadd.f32 %v4644_v4, %v4695_v34 }
  0xa7   : > { %v3204_v47 = vadd.f32 %v3078_v50, %v2930_v26  ;;  %v3353_v23 = vmul.f32 %v4818_v42, %v4901_v63  ;;  %v556_v26 = vmul.f32 %v9709_v10, %v4761_v12  ;;  %v5155_v51 = vmul.f32 %v4653_v8, %v4823_v45 }
  0xa8   : > { %v2107_v50 = vadd.f32 %v2059_v13, %v2009_v30  ;;  %v5159_v18 = vmul.f32 %v4818_v42, %v4980_v7  ;;  %v1027_v32 = vmul.f32 %v4704_v39, %v4823_v45  ;;  %v5165_v34 = vmul.f32 %v4704_v39, %v4831_v54 }
  0xa9   : > { %v3302_v35 = vadd.f32 %v3254_v28, %v3204_v47  ;;  %v9402_v47 = vrot.slane %v5140_v36, 7  ;;  %v604_v31 = vadd.f32 %v556_v26, %v506_v37  ;;  %v9400_v1 = vrot.slane %v5155_v51, 7 }
  0xaa   : > { %v2381_v13 = vadd.f32 %v2257_v17, %v2107_v50  ;;  %v2807_v30 = vsel %vm2799_vm5, %v2805_v6, %v9401_v24  ;;  %v1128_v61 = vrot.slane %v1027_v32, 1  ;;  %v9399_v9 = vrot.slane %v5165_v34, 1 }
  0xab   : > { %v3576_v28 = vadd.f32 %v3449_v59, %v3302_v35  ;;  %v879_v12 = vadd.f32 %v9400_v1, %v604_v31  ;;  %v929_v40 = vmul.f32 %v4710_v44, %v4823_v45  ;;  %v5181_v59 = vmul.f32 %v4732_v56, %v4901_v63 }
  0xac   : > { %v2656_v17 = vadd.f32 %v2532_v11, %v2381_v13  ;;  %v3451_v37 = vrot.slane %v3353_v23, 1  ;;  %v9405_v35 = vrot.slane %v5159_v18, 1  ;;  %v5186_v32 = vmul.f32 %v4734_v57, %v4901_v63 }
  0xad   : > { %v3674_v52 = vadd.f32 %v3626_v27, %v3576_v28  ;;  %9710 = vst [vmem:[#allocation12_spill] sm:$0xff] %v5181_v59  ;;  %v977_v6 = vadd.f32 %v929_v40, %v879_v12  ;;  %v1130_v31 = vsel %vm1117_vm3, %v1128_v61, %v9399_v9  ;;  %v2160_v26 = vmul.f32 %v4743_v62, %v4901_v63  ;;  %v5203_v12 = vld [vmem:[#allocation2 + $0xa8] sm:$0xff] }
  0xae   : > { %9711 = vst [vmem:[#allocation21_spill] sm:$0xff] %v5186_v32  ;;  %v2931_v50 = vadd.f32 %v2807_v30, %v2656_v17  ;;  %v5195_v11 = vmul.f32 %v4743_v62, %v4980_v7  ;;  %v2434_v23 = vmul.f32 %v4753_v3, %v4901_v63  ;;  %v5201_v28 = vmul.f32 %v4753_v3, %v4980_v7 }
  0xaf   : > { %v3772_v27 = vadd.f32 %v3724_v55, %v3674_v52  ;;  %9714 = vst [vmem:[#allocation24_spill] sm:$0xff] %v5203_v12  ;;  %v1252_v52 = vadd.f32 %v1130_v31, %v977_v6  ;;  %v9404_v61 = vrot.slane %v5181_v59, 5  ;;  %v5210_v55 = vmul.f32 %v4751_v2, %v4901_v63 }
  0xb0   : > { %9712 = vst [vmem:[#allocation22_spill] sm:$0xff] %v5195_v11  ;;  %v2709_v13 = vmul.f32 %v4768_v15, %v4901_v63  ;;  %v3205_v30 = vadd.f32 %v9402_v47, %v2931_v50  ;;  %v2260_v40 = vrot.slane %v2160_v26, 1  ;;  %v5219_v9 = vmul.f32 %v4768_v15, %v4980_v7  ;;  %v9717_v26 = vld [vmem:[#allocation20_spill] sm:$0xff] }
  0xb1   : > { %9713 = vst [vmem:[#allocation23_spill] sm:$0xff] %v5201_v28  ;;  %v9406_v6 = vrot.slane %v5186_v32, 6  ;;  %v2535_v31 = vrot.slane %v2434_v23, 2  ;;  %v3453_v50 = vsel %vm1117_vm3, %v3451_v37, %v9405_v35  ;;  %v3627_v47 = vmul.f32 %v4895_v19, %v9717_v26 }
  0xb2   : > { %3822 = vst.msk [vmem:[%s5061_s27 + $0xd] sm:$0x7] %vm3821_vm9, %v3772_v27  ;;  %v1463_v27 = vadd.f32 %v9404_v61, %v1252_v52  ;;  %v3303_v24 = vadd.f32 %v3255_v48, %v3205_v30  ;;  %v3725_v17 = vmul.f32 %v4913_v53, %v5203_v12  ;;  %v9408_v52 = vrot.slane %v5210_v55, 7 }
  0xb3   : > { %9715 = vst [vmem:[#allocation25_spill] sm:$0xff] %v5210_v55  ;;  %v2062_v23 = vmul.f32 %v4802_v33, %v4901_v63  ;;  %v2810_v61 = vrot.slane %v2709_v13, 3  ;;  %v9718_v30 = vrot.slane %v5195_v11, 1  ;;  %v9415_v35 = vrot.slane %v5219_v9, 3 }
  0xb4   : > { %9716 = vst [vmem:[#allocation26_spill] sm:$0xff] %v5219_v9  ;;  %v1738_v45 = vadd.f32 %v9406_v6, %v1463_v27  ;;  %v3577_v48 = vadd.f32 %v3453_v50, %v3303_v24  ;;  %v5243_v1 = vmul.f32 %v4816_v41, %v9717_v26  ;;  %v9720_v6 = vrot.slane %v5201_v28, 2 }
  0xb5   : > { %v2262_v37 = vsel %vm1117_vm3, %v2260_v40, %v9718_v30  ;;  %v3258_v24 = vmul.f32 %v4893_v49, %v9717_v26  ;;  %v5254_v13 = vmul.f32 %v4653_v8, %v4770_v16  ;;  %v3356_v50 = vmul.f32 %v4818_v42, %v9717_v26 }
  0xb6   : > { %9719 = vst [vmem:[#allocation27_spill] sm:$0xff] %v5243_v1  ;;  %v2012_v27 = vadd.f32 %v9408_v52, %v1738_v45  ;;  %v2537_v32 = vsel %vm2524_vm4, %v2535_v31, %v9720_v6  ;;  %v3675_v40 = vadd.f32 %v3627_v47, %v3577_v48  ;;  %v5260_v30 = vmul.f32 %v4818_v42, %v4997_v0 }
  0xb7   : > { %v5264_v45 = vmul.f32 %v4704_v39, %v4859_v22  ;;  %v751_v31 = vrot.slane %v5254_v13, 7  ;;  %v5269_v52 = vmul.f32 %v4732_v56, %v4831_v54  ;;  %v5273_v47 = vmul.f32 %v4734_v57, %v4831_v54 }
  0xb8   : > { %9721 = vst [vmem:[#allocation28_spill] sm:$0xff] %v5260_v30  ;;  %v2110_v6 = vadd.f32 %v2062_v23, %v2012_v27  ;;  %v3773_v48 = vadd.f32 %v3725_v17, %v3675_v40  ;;  %v2812_v26 = vsel %vm2799_vm5, %v2810_v61, %v9415_v35  ;;  %v3630_v23 = vmul.f32 %v4895_v19, %v5203_v12  ;;  %v9723_v40 = vld [vmem:[#allocation14_spill] sm:$0xff] }
  0xb9   : > { %v9722_v13 = vrot.slane %v5038_v38, 7  ;;  %v5287_v55 = vmul.f32 %v4751_v2, %v4831_v54  ;;  %v3456_v17 = vrot.slane %v3356_v50, 1  ;;  %v9421_v61 = vrot.slane %v5260_v30, 1 }
  0xba   : > { %v2384_v27 = vadd.f32 %v2262_v37, %v2110_v6  ;;  %3823 = vst.msk [vmem:[%s5061_s27 + $0xd] sm:$0xf8] %vm3818_vm8, %v3773_v48  ;;  %v927_v37 = vmul.f32 %v4710_v44, %v4770_v16  ;;  %v5295_v6 = vld [vmem:[#allocation2 + $0xc0] sm:$0xff]  ;;  %v5301_v11 = vmul.f32 %v4743_v62, %v4955_v60  ;;  %v5305_v50 = vmul.f32 %v4753_v3, %v4955_v60 }
  0xbb   : > { %v752_v28 = vsel %vm744_vm2, %v9722_v13, %v751_v31  ;;  %9724 = vst [vmem:[#allocation14_spill] sm:$0xff] %v5295_v6  ;;  %v9726_v63 = vrot.slane %v5044_v58, 1  ;;  %v3458_v12 = vsel %vm1117_vm3, %v3456_v17, %v9421_v61  ;;  %v3728_v9 = vmul.f32 %v4913_v53, %v5295_v6 }
  0xbc   : > { %v877_v35 = vadd.f32 %v752_v28, %v9723_v40  ;;  %v2659_v38 = vadd.f32 %v2537_v32, %v2384_v27  ;;  %v5309_v28 = vmul.f32 %v4768_v15, %v4955_v60  ;;  %v5313_v32 = vmul.f32 %v4816_v41, %v4980_v7 }
  0xbd   : > { %v9725_v40 = vrot.slane %v5264_v45, 1  ;;  %v9727_v58 = vrot.slane %v5243_v1, 7  ;;  %v2060_v30 = vmul.f32 %v4802_v33, %v4831_v54  ;;  %v9739_v1 = vrot.slane %v5140_v36, 7  ;;  %v9742_v36 = vld [vmem:[#allocation17_spill] sm:$0xff] }
  0xbe   : > { %v975_v48 = vadd.f32 %v927_v37, %v877_v35  ;;  %v2934_v27 = vadd.f32 %v2812_v26, %v2659_v38  ;;  %v5323_v37 = vmul.f32 %v4818_v42, %v5090_v43  ;;  %v9425_v6 = vrot.slane %v5309_v28, 3 }
  0xbf   : > { %v1127_v13 = vsel %vm1117_vm3, %v9726_v63, %v9725_v40  ;;  %v9728_v63 = vrot.slane %v5269_v52, 5  ;;  %v9729_v40 = vrot.slane %v5048_v21, 5 }
  0xc0   : > { %v1250_v26 = vadd.f32 %v1127_v13, %v975_v48  ;;  %v3208_v59 = vadd.f32 %v9727_v58, %v2934_v27  ;;  %v3080_v13 = vrot.slane %v5313_v32, 7  ;;  %v9730_v27 = vrot.slane %v5273_v47, 6 }
  0xc1   : > { %v1366_v35 = vsel %vm1360_vm6, %v9729_v40, %v9728_v63  ;;  %v9731_v58 = vrot.slane %v5075_v20, 6  ;;  %v9732_v63 = vrot.slane %v5287_v55, 7  ;;  %v9733_v40 = vrot.slane %v5099_v46, 7  ;;  %v5367_v46 = vld [vmem:[#allocation2 + $0xb0] sm:$0xff] }
  0xc2   : > { %v1461_v61 = vadd.f32 %v1366_v35, %v1250_v26  ;;  %v3306_v38 = vadd.f32 %v3258_v24, %v3208_v59  ;;  %v653_v35 = vmul.f32 %v4653_v8, %v4859_v22  ;;  %v9734_v32 = vrot.slane %v5301_v11, 1 }
  0xc3   : > { %v1611_v21 = vsel %vm1603_vm7, %v9731_v58, %v9730_v27  ;;  %v1885_v17 = vsel %vm744_vm2, %v9733_v40, %v9732_v63  ;;  %v9735_v59 = vrot.slane %v5082_v25, 1  ;;  %v3256_v20 = vmul.f32 %v4893_v49, %v4980_v7 }
  0xc4   : > { %v1736_v26 = vadd.f32 %v1611_v21, %v1461_v61  ;;  %v5365_v27 = vmul.f32 %v4895_v19, %v4997_v0  ;;  %v3580_v58 = vadd.f32 %v3458_v12, %v3306_v38  ;;  %v9736_v63 = vrot.slane %v5305_v50, 2 }
  0xc5   : > { %v2259_v24 = vsel %vm1117_vm3, %v9735_v59, %v9734_v32  ;;  %v9737_v61 = vrot.slane %v5088_v29, 2  ;;  %v753_v40 = vrot.slane %v653_v35, 7  ;;  %v1512_v25 = vmul.f32 %v4734_v57, %v4955_v60 }
  0xc6   : > { %v2010_v32 = vadd.f32 %v1885_v17, %v1736_v26  ;;  %v9738_v59 = vrot.slane %v5116_v5, 3  ;;  %v3081_v12 = vsel %vm744_vm2, %v9739_v1, %v3080_v13  ;;  %v9740_v38 = vrot.slane %v5323_v37, 1 }
  0xc7   : > { %v2534_v21 = vsel %vm2524_vm4, %v9737_v61, %v9736_v63  ;;  %v9741_v29 = vrot.slane %v5159_v18, 1  ;;  %v3678_v63 = vadd.f32 %v3630_v23, %v3580_v58  ;;  %v754_v17 = vsel %vm744_vm2, %v751_v31, %v753_v40  ;;  %v9743_v40 = vld [vmem:[#allocation13_spill] sm:$0xff] }
  0xc8   : > { %v2809_v48 = vsel %vm2799_vm5, %v9738_v59, %v9425_v6  ;;  %v1787_v26 = vmul.f32 %v4751_v2, %v4955_v60  ;;  %v2983_v5 = vmul.f32 %v4816_v41, %v5090_v43  ;;  %v2108_v61 = vadd.f32 %v2060_v30, %v2010_v32 }
  0xc9   : > { %v3455_v35 = vsel %vm1117_vm3, %v9741_v29, %v9740_v38  ;;  %v5396_v1 = vmul.f32 %v4913_v53, %v5367_v46  ;;  %v878_v59 = vadd.f32 %v754_v17, %v9742_v36  ;;  %v928_v18 = vmul.f32 %v4710_v44, %v4859_v22 }
  0xca   : > { %v3776_v23 = vadd.f32 %v3728_v9, %v3678_v63  ;;  %v1612_v58 = vrot.slane %v1512_v25, 6  ;;  %v2061_v31 = vmul.f32 %v4802_v33, %v4955_v60  ;;  %v507_v38 = vadd.f32 %v4644_v4, %v9743_v40 }
  0xcb   : > { %v2382_v29 = vadd.f32 %v2259_v24, %v2108_v61  ;;  %v976_v6 = vadd.f32 %v928_v18, %v878_v59  ;;  %v557_v30 = vmul.f32 %v9709_v10, %v4770_v16  ;;  %v5409_v32 = vmul.f32 %v4653_v8, %v4831_v54 }
  0xcc   : > { %3826 = vst.msk [vmem:[%s5061_s27 + $0x1d] sm:$0xf8] %vm3818_vm8, %v3776_v23  ;;  %v1886_v17 = vrot.slane %v1787_v26, 7  ;;  %v3082_v9 = vrot.slane %v2983_v5, 7  ;;  %v5415_v25 = vmul.f32 %v4704_v39, %v4955_v60  ;;  %v5419_v63 = vmul.f32 %v4732_v56, %v4980_v7 }
  0xcd   : > { %v2657_v24 = vadd.f32 %v2534_v21, %v2382_v29  ;;  %v9744_v61 = vrot.slane %v5264_v45, 1  ;;  %v605_v36 = vadd.f32 %v557_v30, %v507_v38  ;;  %v9427_v59 = vrot.slane %v5409_v32, 7 }
  0xce   : > { %v9745_v18 = vrot.slane %v5273_v47, 6  ;;  %v5429_v5 = vmul.f32 %v4893_v49, %v5090_v43  ;;  %v5433_v23 = vmul.f32 %v4895_v19, %v5101_v14  ;;  %v5437_v21 = vmul.f32 %v4734_v57, %v4980_v7 }
  0xcf   : > { %v1251_v16 = vadd.f32 %v9744_v61, %v976_v6  ;;  %v2932_v45 = vadd.f32 %v2809_v48, %v2657_v24  ;;  %v9746_v6 = vrot.slane %v5269_v52, 5  ;;  %v9747_v47 = vrot.slane %v5155_v51, 7  ;;  %v5453_v52 = vld [vmem:[#allocation2 + $0xb8] sm:$0x3f] }
  0xd0   : > { %v1613_v26 = vsel %vm1603_vm7, %v9745_v18, %v1612_v58  ;;  %v9426_v38 = vrot.slane %v5415_v25, 1  ;;  %v9748_v29 = vrot.slane %v5287_v55, 7  ;;  %v3083_v61 = vsel %vm744_vm2, %v3080_v13, %v3082_v9 }
  0xd1   : > { %v1462_v40 = vadd.f32 %v9746_v6, %v1251_v16  ;;  %v757_v58 = vsel %vm744_vm2, %v9747_v47, %v9427_v59  ;;  %v930_v48 = vmul.f32 %v4710_v44, %v4831_v54  ;;  %v3206_v24 = vadd.f32 %v3081_v12, %v2932_v45 }
  0xd2   : > { %v1887_v30 = vsel %vm744_vm2, %v9748_v29, %v1886_v17  ;;  %v880_v18 = vadd.f32 %v757_v58, %v605_v36  ;;  %v9428_v51 = vrot.slane %v5419_v63, 5  ;;  %v5458_v6 = vmul.f32 %v4751_v2, %v4980_v7 }
  0xd3   : > { %v1737_v16 = vadd.f32 %v1613_v26, %v1462_v40  ;;  %v9429_v55 = vrot.slane %v5437_v21, 6  ;;  %v5463_v13 = vmul.f32 %v4743_v62, %v5090_v43  ;;  %v5467_v17 = vmul.f32 %v4753_v3, %v5090_v43 }
  0xd4   : > { %v978_v47 = vadd.f32 %v930_v48, %v880_v18  ;;  %v3304_v9 = vadd.f32 %v3256_v20, %v3206_v24  ;;  %v9749_v36 = vrot.slane %v5165_v34, 1  ;;  %v5476_v45 = vmul.f32 %v4768_v15, %v5090_v43  ;;  %v9750_v18 = vld [vmem:[#allocation12_spill] sm:$0xff] }
  0xd5   : > { %v2011_v12 = vadd.f32 %v1887_v30, %v1737_v16  ;;  %v5480_v40 = vmul.f32 %v4913_v53, %v5453_v52  ;;  %v2063_v29 = vmul.f32 %v4802_v33, %v4980_v7  ;;  %v5486_v20 = vmul.f32 %v4816_v41, %v4997_v0 }
  0xd6   : > { %v1132_v26 = vsel %vm1117_vm3, %v9749_v36, %v9426_v38  ;;  %v3578_v30 = vadd.f32 %v3455_v35, %v3304_v9  ;;  %v9751_v48 = vrot.slane %v9750_v18, 5  ;;  %v9435_v16 = vrot.slane %v5458_v6, 7 }
  0xd7   : > { %v1253_v58 = vadd.f32 %v1132_v26, %v978_v47  ;;  %v2109_v34 = vadd.f32 %v2061_v31, %v2011_v12  ;;  %v9752_v47 = vld [vmem:[#allocation21_spill] sm:$0xff]  ;;  %v9434_v59 = vrot.slane %v5463_v13, 1  ;;  %v9433_v35 = vrot.slane %v5467_v17, 2 }
  0xd8   : > { %v1369_v24 = vsel %vm1360_vm6, %v9751_v48, %v9428_v51  ;;  %v9753_v26 = vrot.slane %v9752_v47, 6  ;;  %v3676_v31 = vadd.f32 %v5365_v27, %v3578_v30  ;;  %v9754_v9 = vrot.slane %v5301_v11, 1  ;;  %v9755_v47 = vld [vmem:[#allocation15_spill] sm:$0xff] }
  0xd9   : > { %v1464_v36 = vadd.f32 %v1369_v24, %v1253_v58  ;;  %v9430_v18 = vrot.slane %v5476_v45, 3  ;;  %v5507_v58 = vmul.f32 %v4818_v42, %v5101_v14  ;;  %v9432_v24 = vrot.slane %v5486_v20, 7 }
  0xda   : > { %v1616_v38 = vsel %vm1603_vm7, %v9753_v26, %v9429_v55  ;;  %v2383_v12 = vadd.f32 %v9754_v9, %v2109_v34  ;;  %v508_v26 = vadd.f32 %v4644_v4, %v9755_v47  ;;  %v558_v51 = vmul.f32 %v9709_v10, %v4859_v22  ;;  %v9757_v34 = vld [vmem:[#allocation25_spill] sm:$0xff]  ;;  %v9759_v4 = vld [vmem:[#allocation22_spill] sm:$0xff] }
  0xdb   : > { %v1739_v48 = vadd.f32 %v1616_v38, %v1464_v36  ;;  %v3774_v27 = vadd.f32 %v5396_v1, %v3676_v31  ;;  %v9756_v11 = vrot.slane %v5305_v50, 2  ;;  %v9758_v9 = vrot.slane %v9757_v34, 7  ;;  %v5531_v1 = vld [vmem:[#allocation2 + $0xc8] sm:$0xff]  ;;  %v9762_v34 = vld [vmem:[#allocation23_spill] sm:$0xff] }
  0xdc   : > { %v656_v38 = vmul.f32 %v4653_v8, %v4955_v60  ;;  %v9760_v47 = vrot.slane %v9759_v4, 1  ;;  %v3259_v10 = vmul.f32 %v4893_v49, %v4997_v0  ;;  %v606_v50 = vadd.f32 %v558_v51, %v508_v26  ;;  %v9764_v26 = vld [vmem:[#allocation26_spill] sm:$0xff] }
  0xdd   : > { %v2658_v30 = vadd.f32 %v9756_v11, %v2383_v12  ;;  %v1890_v55 = vsel %vm744_vm2, %v9758_v9, %v9435_v16  ;;  %3824 = vst.msk [vmem:[%s5061_s27 + $0x15] sm:$0xff] %vm246_vm0, %v3774_v27  ;;  %v9761_v31 = vrot.slane %v5309_v28, 3  ;;  %v9431_v8 = vrot.slane %v5507_v58, 1 }
  0xde   : > { %v2013_v36 = vadd.f32 %v1890_v55, %v1739_v48  ;;  %v2264_v22 = vsel %vm1117_vm3, %v9760_v47, %v9434_v59  ;;  %v758_v55 = vrot.slane %v656_v38, 7  ;;  %v1515_v48 = vmul.f32 %v4734_v57, %v5090_v43 }
  0xdf   : > { %v2933_v12 = vadd.f32 %v9761_v31, %v2658_v30  ;;  %v9763_v9 = vrot.slane %v9762_v34, 2  ;;  %v9765_v27 = vrot.slane %v9764_v26, 3  ;;  %v9766_v30 = vld [vmem:[#allocation27_spill] sm:$0xff]  ;;  %v1790_v34 = vmul.f32 %v4751_v2, %v5090_v43 }
  0xe0   : > { %v2111_v11 = vadd.f32 %v2063_v29, %v2013_v36  ;;  %v9767_v38 = vrot.slane %v9766_v30, 7  ;;  %v3631_v29 = vmul.f32 %v4895_v19, %v5367_v46  ;;  %v9768_v36 = vrot.slane %v5409_v32, 7 }
  0xe1   : > { %v2539_v51 = vsel %vm2524_vm4, %v9763_v9, %v9433_v35  ;;  %v2814_v28 = vsel %vm2799_vm5, %v9765_v27, %v9430_v18  ;;  %v3207_v47 = vadd.f32 %v3083_v61, %v2933_v12  ;;  %v3729_v26 = vmul.f32 %v4913_v53, %v5531_v1  ;;  %v9769_v12 = vld [vmem:[#allocation28_spill] sm:$0xff] }
  0xe2   : > { %v3086_v4 = vsel %vm744_vm2, %v9767_v38, %v9432_v24  ;;  %v759_v31 = vsel %vm744_vm2, %v9768_v36, %v758_v55  ;;  %v2385_v9 = vadd.f32 %v2264_v22, %v2111_v11  ;;  %v931_v30 = vmul.f32 %v4710_v44, %v4955_v60  ;;  %v9771_v44 = vld [vmem:[#allocation16_spill] sm:$0xff] }
  0xe3   : > { %v881_v27 = vadd.f32 %v759_v31, %v606_v50  ;;  %v3305_v61 = vadd.f32 %v5429_v5, %v3207_v47  ;;  %v9770_v38 = vrot.slane %v9769_v12, 1  ;;  %v1617_v55 = vrot.slane %v1515_v48, 6  ;;  %v5578_v31 = vld [vmem:[#allocation3] ss:$0 sm:$0xff]  ;;  %v9773_v48 = vld [vmem:[#allocation18_spill] sm:$0xff] }
  0xe4   : > { %v2064_v36 = vmul.f32 %v4802_v33, %v5090_v43  ;;  %v2660_v22 = vadd.f32 %v2539_v51, %v2385_v9  ;;  %v5576_v50 = vmul.f32 %v4816_v41, %v5101_v14  ;;  %v461_v5 = vmul.f32 %v5578_v31, %v9771_v44  ;;  %v5588_v51 = vld [vmem:[#allocation3 + $0x2] ss:$0 sm:$0xff]  ;;  %v9774_v9 = vld [vmem:[#allocation19_spill] sm:$0xff] }
  0xe5   : > { %v3460_v32 = vsel %vm1117_vm3, %v9770_v38, %v9431_v8  ;;  %v979_v11 = vadd.f32 %v931_v30, %v881_v27  ;;  %v9772_v47 = vrot.slane %v5323_v37, 1  ;;  %v1891_v18 = vrot.slane %v1790_v34, 7  ;;  %v5584_v38 = vld [vmem:[#allocation3 + $0x1] ss:$0 sm:$0xff]  ;;  %v5599_v37 = vld [vmem:[%s9376_s1] ss:$0 sm:$0xff] }
  0xe6   : > { %v559_v8 = vmul.f32 %v5584_v38, %v9773_v48  ;;  %v5592_v27 = vmul.f32 %v5588_v51, %v9774_v9  ;;  %v2935_v30 = vadd.f32 %v2814_v28, %v2660_v22  ;;  %v9775_v24 = vrot.slane %v5415_v25, 1 }
  0xe7   : > { %v3579_v12 = vadd.f32 %v9772_v47, %v3305_v61  ;;  %v509_v34 = vadd.f32 %v5599_v37, %v461_v5  ;;  %v1030_v61 = vmul.f32 %v4704_v39, %v9774_v9  ;;  %v9776_v47 = vrot.slane %v5437_v21, 6 }
  0xe8   : > { %v1254_v35 = vadd.f32 %v9775_v24, %v979_v11  ;;  %v5610_v25 = vmul.f32 %v4704_v39, %v4980_v7  ;;  %v9777_v24 = vld [vmem:[#allocation20_spill] sm:$0xff]  ;;  %v3209_v22 = vadd.f32 %v3086_v4, %v2935_v30  ;;  %v9778_v11 = vrot.slane %v5419_v63, 5 }
  0xe9   : > { %v3677_v44 = vadd.f32 %v5433_v23, %v3579_v12  ;;  %v1618_v48 = vsel %vm1603_vm7, %v9776_v47, %v1617_v55  ;;  %v5614_v28 = vmul.f32 %v4732_v56, %v9777_v24  ;;  %v607_v59 = vadd.f32 %v559_v8, %v509_v34  ;;  %v5620_v12 = vld [vmem:[#allocation3 + $0x3] ss:$0 sm:$0xff] }
  0xea   : > { %v1465_v5 = vadd.f32 %v9778_v11, %v1254_v35  ;;  %v760_v23 = vrot.slane %v5592_v27, 7  ;;  %v932_v55 = vmul.f32 %v5620_v12, %v9774_v9  ;;  %v1133_v39 = vrot.slane %v1030_v61, 1 }
  0xeb   : > { %v3775_v21 = vadd.f32 %v5480_v40, %v3677_v44  ;;  %v1134_v47 = vrot.slane %v5610_v25, 1  ;;  %v3307_v16 = vadd.f32 %v3259_v10, %v3209_v22  ;;  %v5629_v63 = vmul.f32 %v4734_v57, %v9777_v24 }
  0xec   : > { %v1740_v56 = vadd.f32 %v1618_v48, %v1465_v5  ;;  %v882_v4 = vadd.f32 %v760_v23, %v607_v59  ;;  %v9779_v40 = vrot.slane %v5458_v6, 7  ;;  %v3087_v8 = vrot.slane %v5576_v50, 7  ;;  %v5661_v5 = vld [vmem:[#allocation2 + $0xd0] sm:$0x3f] }
  0xed   : > { %3825 = vst.msk [vmem:[%s5061_s27 + $0x1d] sm:$0x7] %vm3821_vm9, %v3775_v21  ;;  %v1370_v9 = vrot.slane %v5614_v28, 5  ;;  %v2163_v10 = vmul.f32 %v4743_v62, %v9777_v24  ;;  %v3581_v30 = vadd.f32 %v3460_v32, %v3307_v16  ;;  %v5642_v57 = vmul.f32 %v4751_v2, %v9777_v24 }
  0xee   : > { %v1892_v35 = vsel %vm744_vm2, %v9779_v40, %v1891_v18  ;;  %v980_v59 = vadd.f32 %v932_v55, %v882_v4  ;;  %v1135_v6 = vsel %vm1117_vm3, %v1133_v39, %v1134_v47  ;;  %v5649_v18 = vmul.f32 %v4743_v62, %v4997_v0 }
  0xef   : > { %v2014_v34 = vadd.f32 %v1892_v35, %v1740_v56  ;;  %v2437_v50 = vmul.f32 %v4753_v3, %v9777_v24  ;;  %v5655_v16 = vmul.f32 %v4753_v3, %v4997_v0  ;;  %v3679_v32 = vadd.f32 %v3631_v29, %v3581_v30 }
  0xf0   : > { %v1255_v2 = vadd.f32 %v1135_v6, %v980_v59  ;;  %v1619_v44 = vrot.slane %v5629_v63, 6  ;;  %v2265_v48 = vrot.slane %v2163_v10, 1  ;;  %v2266_v22 = vrot.slane %v5649_v18, 1 }
  0xf1   : > { %v2112_v61 = vadd.f32 %v2064_v36, %v2014_v34  ;;  %v2540_v11 = vrot.slane %v2437_v50, 2  ;;  %v2712_v62 = vmul.f32 %v4768_v15, %v9777_v24  ;;  %v3777_v21 = vadd.f32 %v3729_v26, %v3679_v32 }
  0xf2   : > { %v9780_v55 = vrot.slane %v5463_v13, 1  ;;  %v1466_v29 = vadd.f32 %v1370_v9, %v1255_v2  ;;  %v9437_v36 = vrot.slane %v5655_v16, 2  ;;  %v3260_v39 = vmul.f32 %v4893_v49, %v5101_v14 }
  0xf3   : > { %v5672_v56 = vmul.f32 %v4768_v15, %v4997_v0  ;;  %3827 = vst.msk [vmem:[%s5061_s27 + $0x25] sm:$0xff] %vm246_vm0, %v3777_v21  ;;  %v9781_v4 = vrot.slane %v5467_v17, 2  ;;  %v3632_v13 = vmul.f32 %v4895_v19, %v5453_v52  ;;  %v1893_v35 = vrot.slane %v5642_v57, 7 }
  0xf4   : > { %v2386_v3 = vadd.f32 %v9780_v55, %v2112_v61  ;;  %v1741_v40 = vadd.f32 %v1619_v44, %v1466_v29  ;;  %v9782_v10 = vrot.slane %v5486_v20, 7  ;;  %v3730_v15 = vmul.f32 %v4913_v53, %v5661_v5  ;;  %v9784_v61 = vld [vmem:[#allocation24_spill] sm:$0xff]  ;;  %v5712_v55 = vld [vmem:[#allocation3 + $0x4] ss:$0 sm:$0xff] }
  0xf5   : > { %v2065_v34 = vmul.f32 %v4802_v33, %v9777_v24  ;;  %v2815_v17 = vrot.slane %v2712_v62, 3  ;;  %v9783_v59 = vrot.slane %v5476_v45, 3  ;;  %v2267_v32 = vsel %vm1117_vm3, %v2265_v48, %v2266_v22  ;;  %v4117_v24 = vld [vmem:[#allocation2 + $0x50] sm:$0xff]  ;;  %9785 = vst [vmem:[#allocation17_spill] sm:$0xff] %v5712_v55 }
  0xf6   : > { %v2661_v26 = vadd.f32 %v9781_v4, %v2386_v3  ;;  %v3088_v30 = vsel %vm744_vm2, %v9782_v10, %v3087_v8  ;;  %v2015_v50 = vadd.f32 %v1893_v35, %v1741_v40  ;;  %v2542_v20 = vsel %vm2524_vm4, %v2540_v11, %v9437_v36 }
  0xf7   : > { %v2816_v8 = vrot.slane %v5672_v56, 3  ;;  %v5703_v33 = vmul.f32 %v4816_v41, %v9784_v61  ;;  %v462_v45 = vmul.f32 %v4117_v24, %v5578_v31  ;;  %v5708_v2 = vmul.f32 %v5588_v51, %v4980_v7 }
  0xf8   : > { %v2936_v6 = vadd.f32 %v9783_v59, %v2661_v26  ;;  %v2113_v21 = vadd.f32 %v2065_v34, %v2015_v50  ;;  %v3359_v48 = vmul.f32 %v4818_v42, %v9784_v61  ;;  %v5716_v11 = vmul.f32 %v5712_v55, %v5090_v43 }
  0xf9   : > { %v5720_v41 = vmul.f32 %v4818_v42, %v5367_v46  ;;  %v510_v3 = vadd.f32 %v5599_v37, %v462_v45  ;;  %v560_v29 = vmul.f32 %v5584_v38, %v4831_v54  ;;  %v9436_v4 = vrot.slane %v5708_v2, 7  ;;  %v5738_v54 = vld [vmem:[#allocation3 + $0x6] ss:$0 sm:$0xff] }
  0xfa   : > { %v3210_v62 = vadd.f32 %v3088_v30, %v2936_v6  ;;  %v2387_v40 = vadd.f32 %v2267_v32, %v2113_v21  ;;  %v9441_v10 = vrot.slane %v5716_v11, 1  ;;  %v5727_v30 = vld [vmem:[#allocation3 + $0x5] ss:$0 sm:$0xff]  ;;  %v5744_v6 = vld [vmem:[#allocation3 + $0x7] ss:$0 sm:$0xff]  ;;  %v9787_v32 = vrot.slane %v5507_v58, 1 }
  0xfb   : > { %9786 = vst [vmem:[#allocation13_spill] sm:$0xff] %v5727_v30  ;;  %v5731_v34 = vmul.f32 %v5727_v30, %v4997_v0  ;;  %v608_v59 = vadd.f32 %v560_v29, %v510_v3  ;;  %v762_v42 = vsel %vm744_vm2, %v760_v23, %v9436_v4  ;;  %v5748_v50 = vmul.f32 %v5744_v6, %v4997_v0  ;;  %v5760_v4 = vld [vmem:[#allocation2 + $0xd8] sm:$0xff] }
  0xfc   : > { %v3308_v26 = vadd.f32 %v3260_v39, %v3210_v62  ;;  %v5742_v39 = vmul.f32 %v5738_v54, %v4997_v0  ;;  %v2662_v45 = vadd.f32 %v2542_v20, %v2387_v40  ;;  %v2817_v27 = vsel %vm2799_vm5, %v2815_v17, %v2816_v8  ;;  %9788 = vst [vmem:[#allocation12_spill] sm:$0xff] %v5760_v4 }
  0xfd   : > { %v3261_v23 = vmul.f32 %v4893_v49, %v9784_v61  ;;  %v9443_v62 = vrot.slane %v5703_v33, 7  ;;  %v3461_v21 = vrot.slane %v3359_v48, 1  ;;  %v883_v3 = vadd.f32 %v762_v42, %v608_v59  ;;  %v5773_v59 = vld [vmem:[#allocation3 + $0x9] ss:$0 sm:$0xff] }
  0xfe   : > { %v3582_v24 = vadd.f32 %v9787_v32, %v3308_v26  ;;  %v933_v29 = vmul.f32 %v5620_v12, %v4980_v7  ;;  %v2937_v58 = vadd.f32 %v2817_v27, %v2662_v45  ;;  %v9442_v20 = vrot.slane %v5720_v41, 1  ;;  %v5779_v32 = vld [vmem:[#allocation3 + $0xa] ss:$0 sm:$0xff]  ;;  %v5789_v45 = vld [vmem:[#allocation3 + $0xb] ss:$0 sm:$0xff] }
  0xff   : > { %v9439_v26 = vrot.slane %v5731_v34, 5  ;;  %v1137_v49 = vsel %vm1117_vm3, %v1134_v47, %v9441_v10  ;;  %v9440_v48 = vrot.slane %v5742_v39, 6  ;;  %v9438_v7 = vrot.slane %v5748_v50, 7  ;;  %v9789_v47 = vld [vmem:[#allocation14_spill] sm:$0xff] }
 0x100   : > { %v3680_v36 = vadd.f32 %v3632_v13, %v3582_v24  ;;  %v981_v17 = vadd.f32 %v933_v29, %v883_v3  ;;  %v3211_v13 = vadd.f32 %v9443_v62, %v2937_v58  ;;  %v5777_v42 = vmul.f32 %v5773_v59, %v5101_v14 }
 0x101   : > { %v5783_v25 = vmul.f32 %v5779_v32, %v5101_v14  ;;  %v3633_v24 = vmul.f32 %v4895_v19, %v9789_v47  ;;  %v5793_v27 = vmul.f32 %v5789_v45, %v5101_v14  ;;  %v3463_v29 = vsel %vm1117_vm3, %v3461_v21, %v9442_v20  ;;  %v5805_v19 = vld [vmem:[#allocation3 + $0xc] ss:$0 sm:$0xff] }
 0x102   : > { %v3778_v40 = vadd.f32 %v3730_v15, %v3680_v36  ;;  %v3731_v36 = vmul.f32 %v4913_v53, %v5760_v4  ;;  %v1256_v15 = vadd.f32 %v1137_v49, %v981_v17  ;;  %v3309_v3 = vadd.f32 %v3261_v23, %v3211_v13 }
 0x103   : > { %v1372_v53 = vsel %vm1360_vm6, %v1370_v9, %v9439_v26  ;;  %v5809_v58 = vmul.f32 %v5805_v19, %v5367_v46  ;;  %v1621_v23 = vsel %vm1603_vm7, %v1619_v44, %v9440_v48  ;;  %v1895_v28 = vsel %vm744_vm2, %v1893_v35, %v9438_v7  ;;  %v5821_v9 = vld [vmem:[#allocation3 + $0x8] ss:$0 sm:$0xff]  ;;  %v5838_v26 = vld [vmem:[#allocation3 + $0xd] ss:$0 sm:$0xff] }
 0x104   : > { %3828 = vst.msk [vmem:[%s5061_s27 + $0x2d] sm:$0x7] %vm3821_vm9, %v3778_v40  ;;  %v1467_v17 = vadd.f32 %v1372_v53, %v1256_v15  ;;  %v2066_v21 = vmul.f32 %v5821_v9, %v4997_v0  ;;  %v3583_v49 = vadd.f32 %v3463_v29, %v3309_v3  ;;  %v9448_v40 = vrot.slane %v5777_v42, 1  ;;  %v5827_v15 = vld [vmem:[#allocation3 + $0xe] ss:$0 sm:$0xff] }
 0x105   : > { %v9446_v13 = vrot.slane %v5783_v25, 2  ;;  %v5831_v63 = vmul.f32 %v5827_v15, %v5453_v52  ;;  %v9445_v57 = vrot.slane %v5793_v27, 3  ;;  %v4128_v35 = vld [vmem:[#allocation2 + $0x58] sm:$0x3f]  ;;  %v659_v7 = vmul.f32 %v5588_v51, %v5090_v43 }
 0x106   : > { %v1742_v44 = vadd.f32 %v1621_v23, %v1467_v17  ;;  %v463_v53 = vmul.f32 %v4128_v35, %v5578_v31  ;;  %v3681_v3 = vadd.f32 %v3633_v24, %v3583_v49  ;;  %v9447_v29 = vrot.slane %v5809_v58, 7 }
 0x107   : > { %v3262_v48 = vmul.f32 %v5838_v26, %v5367_v46  ;;  %v561_v17 = vmul.f32 %v5584_v38, %v4955_v60  ;;  %v763_v20 = vrot.slane %v659_v7, 7  ;;  %v1518_v35 = vmul.f32 %v5738_v54, %v5101_v14 }
 0x108   : > { %v2016_v23 = vadd.f32 %v1895_v28, %v1742_v44  ;;  %v511_v10 = vadd.f32 %v5599_v37, %v463_v53  ;;  %v3779_v62 = vadd.f32 %v3731_v36, %v3681_v3  ;;  %v2269_v24 = vsel %vm1117_vm3, %v2266_v22, %v9448_v40  ;;  %v5858_v44 = vld [vmem:[#allocation2 + $0xe0] sm:$0xff] }
 0x109   : > { %v9790_v49 = vrot.slane %v5655_v16, 2  ;;  %v9444_v28 = vrot.slane %v5831_v63, 1  ;;  %v2819_v36 = vsel %vm2799_vm5, %v2816_v8, %v9445_v57  ;;  %v9791_v22 = vrot.slane %v5708_v2, 7  ;;  %v5906_v57 = vld [vmem:[#allocation2 + $0x78] sm:$0xff] }
 0x10a   : > { %v2114_v7 = vadd.f32 %v2066_v21, %v2016_v23  ;;  %v609_v18 = vadd.f32 %v561_v17, %v511_v10  ;;  %3829 = vst.msk [vmem:[%s5061_s27 + $0x2d] sm:$0xf8] %vm3818_vm8, %v3779_v62  ;;  %v9792_v16 = vrot.slane %v5703_v33, 7  ;;  %v5875_v21 = vld [vmem:[#allocation3 + $0xf] ss:$0 sm:$0xff]  ;;  %v934_v8 = vmul.f32 %v5620_v12, %v5090_v43 }
 0x10b   : > { %v2544_v60 = vsel %vm2524_vm4, %v9790_v49, %v9446_v13  ;;  %v764_v53 = vsel %vm744_vm2, %v9791_v22, %v763_v20  ;;  %v3634_v56 = vmul.f32 %v5875_v21, %v5531_v1  ;;  %v1793_v2 = vmul.f32 %v5744_v6, %v5101_v14  ;;  %v5890_v49 = vld [vmem:[#allocation3 + $0x10] ss:$0 sm:$0xff]  ;;  %9795 = vst [vmem:[#allocation15_spill] sm:$0xff] %v5906_v57 }
 0x10c   : > { %v3091_v3 = vsel %vm744_vm2, %v9792_v16, %v9447_v29  ;;  %v2388_v10 = vadd.f32 %v2269_v24, %v2114_v7  ;;  %v884_v20 = vadd.f32 %v764_v53, %v609_v18  ;;  %v1622_v62 = vrot.slane %v1518_v35, 6  ;;  %v4132_v22 = vld [vmem:[#allocation2 + $0x60] sm:$0xff]  ;;  %v5895_v24 = vld [vmem:[#allocation2 + $0x90] sm:$0xff] }
 0x10d   : > { %v2989_v17 = vmul.f32 %v5805_v19, %v5453_v52  ;;  %v9793_v33 = vrot.slane %v5720_v41, 1  ;;  %v3732_v43 = vmul.f32 %v5890_v49, %v5858_v44  ;;  %v464_v16 = vmul.f32 %v4132_v22, %v5578_v31  ;;  %9794 = vst [vmem:[#allocation21_spill] sm:$0xff] %v5895_v24 }
 0x10e   : > { %v5899_v35 = vmul.f32 %v5895_v24, %v5588_v51  ;;  %v2663_v7 = vadd.f32 %v2544_v60, %v2388_v10  ;;  %v982_v18 = vadd.f32 %v934_v8, %v884_v20  ;;  %v2067_v41 = vmul.f32 %v5821_v9, %v5101_v14 }
 0x10f   : > { %v3465_v23 = vsel %vm1117_vm3, %v9793_v33, %v9444_v28  ;;  %v1033_v53 = vmul.f32 %v5895_v24, %v5712_v55  ;;  %v1896_v33 = vrot.slane %v1793_v2, 7  ;;  %v512_v28 = vadd.f32 %v5599_v37, %v464_v16 }
 0x110   : > { %v562_v22 = vmul.f32 %v5906_v57, %v5584_v38  ;;  %v5912_v13 = vmul.f32 %v5712_v55, %v4997_v0  ;;  %v2938_v60 = vadd.f32 %v2819_v36, %v2663_v7  ;;  %v9796_v8 = vrot.slane %v5716_v11, 1 }
 0x111   : > { %v9797_v20 = vrot.slane %v5742_v39, 6  ;;  %v3092_v2 = vrot.slane %v2989_v17, 7  ;;  %v5921_v16 = vmul.f32 %v5838_v26, %v5453_v52  ;;  %v9450_v57 = vrot.slane %v5899_v35, 7 }
 0x112   : > { %v1257_v10 = vadd.f32 %v9796_v8, %v982_v18  ;;  %v610_v40 = vadd.f32 %v562_v22, %v512_v28  ;;  %v5926_v0 = vmul.f32 %v5727_v30, %v9784_v61  ;;  %v3212_v36 = vadd.f32 %v3091_v3, %v2938_v60 }
 0x113   : > { %v1623_v29 = vsel %vm1603_vm7, %v9797_v20, %v1622_v62  ;;  %v9798_v11 = vrot.slane %v5731_v34, 5  ;;  %v1138_v18 = vrot.slane %v1033_v53, 1  ;;  %v9451_v39 = vrot.slane %v5912_v13, 1 }
 0x114   : > { %v5933_v62 = vmul.f32 %v5875_v21, %v5661_v5  ;;  %v885_v28 = vadd.f32 %v9450_v57, %v610_v40  ;;  %v935_v17 = vmul.f32 %v5895_v24, %v5620_v12  ;;  %v5941_v22 = vmul.f32 %v5738_v54, %v9784_v61  ;;  %v5962_v57 = vld [vmem:[#allocation2 + $0xe8] sm:$0x3f] }
 0x115   : > { %v1468_v7 = vadd.f32 %v9798_v11, %v1257_v10  ;;  %v3310_v3 = vadd.f32 %v3262_v48, %v3212_v36  ;;  %v2166_v53 = vmul.f32 %v5773_v59, %v9784_v61  ;;  %v5947_v60 = vmul.f32 %v5773_v59, %v5367_v46 }
 0x116   : > { %v9799_v8 = vrot.slane %v5748_v50, 7  ;;  %v983_v10 = vadd.f32 %v935_v17, %v885_v28  ;;  %v2440_v20 = vmul.f32 %v5779_v32, %v9784_v61  ;;  %v5956_v11 = vmul.f32 %v5779_v32, %v5367_v46 }
 0x117   : > { %v1743_v34 = vadd.f32 %v1623_v29, %v1468_v7  ;;  %v3584_v48 = vadd.f32 %v3465_v23, %v3310_v3  ;;  %v1140_v36 = vsel %vm1117_vm3, %v1138_v18, %v9451_v39  ;;  %v9454_v7 = vrot.slane %v5926_v0, 5 }
 0x118   : > { %v1897_v40 = vsel %vm744_vm2, %v9799_v8, %v1896_v33  ;;  %v1258_v50 = vadd.f32 %v1140_v36, %v983_v10  ;;  %v5967_v28 = vmul.f32 %v5744_v6, %v9784_v61  ;;  %v2715_v17 = vmul.f32 %v5789_v45, %v9784_v61 }
 0x119   : > { %v2017_v29 = vadd.f32 %v1897_v40, %v1743_v34  ;;  %v3682_v23 = vadd.f32 %v3634_v56, %v3584_v48  ;;  %v2270_v34 = vrot.slane %v2166_v53, 1  ;;  %v9456_v18 = vrot.slane %v5947_v60, 1 }
 0x11a   : > { %v1469_v8 = vadd.f32 %v9454_v7, %v1258_v50  ;;  %v2545_v40 = vrot.slane %v2440_v20, 2  ;;  %v9455_v10 = vrot.slane %v5956_v11, 2  ;;  %v5977_v36 = vmul.f32 %v5789_v45, %v5367_v46 }
 0x11b   : > { %v2115_v3 = vadd.f32 %v2067_v41, %v2017_v29  ;;  %v3780_v39 = vadd.f32 %v3732_v43, %v3682_v23  ;;  %v9800_v33 = vrot.slane %v5777_v42, 1  ;;  %v9801_v56 = vrot.slane %v5809_v58, 7 }
 0x11c   : > { %v3733_v53 = vmul.f32 %v5890_v49, %v5962_v57  ;;  %v9802_v48 = vrot.slane %v5941_v22, 6  ;;  %v9457_v29 = vrot.slane %v5967_v28, 7  ;;  %v2068_v50 = vmul.f32 %v5821_v9, %v9784_v61 }
 0x11d   : > { %v2389_v24 = vadd.f32 %v9800_v33, %v2115_v3  ;;  %v3093_v41 = vsel %vm744_vm2, %v9801_v56, %v3092_v2  ;;  %v2820_v7 = vrot.slane %v2715_v17, 3  ;;  %3830 = vst.msk [vmem:[%s5061_s27 + $0x35] sm:$0xff] %vm246_vm0, %v3780_v39  ;;  %v9803_v42 = vrot.slane %v5783_v25, 2  ;;  %v4135_v33 = vld [vmem:[#allocation2 + $0x68] sm:$0xff] }
 0x11e   : > { %v1744_v20 = vadd.f32 %v9802_v48, %v1469_v8  ;;  %v2272_v58 = vsel %vm1117_vm3, %v2270_v34, %v9456_v18  ;;  %v6000_v2 = vmul.f32 %v5805_v19, %v9789_v47  ;;  %v465_v23 = vmul.f32 %v4135_v33, %v5578_v31  ;;  %v6018_v48 = vld [vmem:[#allocation2 + $0x80] sm:$0xff] }
 0x11f   : > { %v2664_v43 = vadd.f32 %v9803_v42, %v2389_v24  ;;  %v2547_v39 = vsel %vm2524_vm4, %v2545_v40, %v9455_v10  ;;  %v6009_v24 = vld [vmem:[#allocation2 + $0x98] sm:$0xff]  ;;  %v9805_v34 = vrot.slane %v5793_v27, 3  ;;  %9806 = vst [vmem:[#allocation22_spill] sm:$0xff] %v6018_v48  ;;  %v6024_v40 = vmul.f32 %v5712_v55, %v5101_v14 }
 0x120   : > { %v2018_v3 = vadd.f32 %v9457_v29, %v1744_v20  ;;  %9804 = vst [vmem:[#allocation25_spill] sm:$0xff] %v6009_v24  ;;  %v6013_v17 = vmul.f32 %v6009_v24, %v5588_v51  ;;  %v513_v56 = vadd.f32 %v5599_v37, %v465_v23  ;;  %v563_v20 = vmul.f32 %v6018_v48, %v5584_v38  ;;  %v6065_v29 = vld [vmem:[#allocation2 + $0xf0] sm:$0xff] }
 0x121   : > { %v2939_v8 = vadd.f32 %v9805_v34, %v2664_v43  ;;  %v3264_v33 = vmul.f32 %v5838_v26, %v9789_v47  ;;  %v6031_v27 = vmul.f32 %v5727_v30, %v5367_v46  ;;  %v3362_v23 = vmul.f32 %v5827_v15, %v9789_v47  ;;  %9810 = vst [vmem:[#allocation23_spill] sm:$0xff] %v6065_v29 }
 0x122   : > { %v2116_v42 = vadd.f32 %v2068_v50, %v2018_v3  ;;  %v9459_v10 = vrot.slane %v6013_v17, 7  ;;  %v6037_v34 = vmul.f32 %v5827_v15, %v5531_v1  ;;  %v611_v14 = vadd.f32 %v563_v20, %v513_v56 }
 0x123   : > { %v3213_v43 = vadd.f32 %v3093_v41, %v2939_v8  ;;  %v9807_v50 = vrot.slane %v5899_v35, 7  ;;  %v6047_v41 = vmul.f32 %v5738_v54, %v5367_v46  ;;  %v936_v48 = vmul.f32 %v6009_v24, %v5620_v12 }
 0x124   : > { %v2390_v18 = vadd.f32 %v2272_v58, %v2116_v42  ;;  %v6054_v58 = vmul.f32 %v5744_v6, %v5367_v46  ;;  %v9808_v35 = vrot.slane %v5977_v36, 3  ;;  %v3094_v42 = vrot.slane %v6000_v2, 7 }
 0x125   : > { %v767_v3 = vsel %vm744_vm2, %v9807_v50, %v9459_v10  ;;  %v3311_v8 = vadd.f32 %v5921_v16, %v3213_v43  ;;  %v9463_v50 = vrot.slane %v6031_v27, 5  ;;  %v9809_v10 = vrot.slane %v5831_v63, 1 }
 0x126   : > { %v886_v25 = vadd.f32 %v767_v3, %v611_v14  ;;  %v2665_v56 = vadd.f32 %v2547_v39, %v2390_v18  ;;  %v2822_v20 = vsel %vm2799_vm5, %v2820_v7, %v9808_v35  ;;  %v3466_v43 = vrot.slane %v3362_v23, 1 }
 0x127   : > { %v3585_v16 = vadd.f32 %v9809_v10, %v3311_v8  ;;  %v3636_v14 = vmul.f32 %v5875_v21, %v5760_v4  ;;  %v3467_v18 = vrot.slane %v6037_v34, 1  ;;  %v9811_v39 = vrot.slane %v6024_v40, 1 }
 0x128   : > { %v984_v3 = vadd.f32 %v936_v48, %v886_v25  ;;  %v2940_v24 = vadd.f32 %v2822_v20, %v2665_v56  ;;  %v9812_v7 = vrot.slane %v5912_v13, 1  ;;  %v9464_v35 = vrot.slane %v6047_v41, 6 }
 0x129   : > { %v3683_v63 = vadd.f32 %v5933_v62, %v3585_v16  ;;  %v9462_v23 = vrot.slane %v6054_v58, 7  ;;  %v6078_v25 = vmul.f32 %v5773_v59, %v5453_v52  ;;  %v9813_v34 = vrot.slane %v5926_v0, 5 }
 0x12a   : > { %v1142_v2 = vsel %vm1117_vm3, %v9812_v7, %v9811_v39  ;;  %v3214_v48 = vadd.f32 %v3094_v42, %v2940_v24  ;;  %v6087_v8 = vmul.f32 %v5779_v32, %v5453_v52  ;;  %v6091_v62 = vmul.f32 %v5789_v45, %v5453_v52 }
 0x12b   : > { %v1259_v10 = vadd.f32 %v1142_v2, %v984_v3  ;;  %v1375_v13 = vsel %vm1360_vm6, %v9813_v34, %v9463_v50  ;;  %v3781_v56 = vadd.f32 %v3733_v53, %v3683_v63  ;;  %v3734_v20 = vmul.f32 %v5890_v49, %v6065_v29 }
 0x12c   : > { %v6097_v24 = vmul.f32 %v5805_v19, %v5531_v1  ;;  %v3312_v0 = vadd.f32 %v3264_v33, %v3214_v48  ;;  %v3468_v3 = vsel %vm1117_vm3, %v3466_v43, %v3467_v18  ;;  %v9814_v39 = vrot.slane %v5941_v22, 6 }
 0x12d   : > { %v1470_v16 = vadd.f32 %v1375_v13, %v1259_v10  ;;  %v2069_v53 = vmul.f32 %v5821_v9, %v5367_v46  ;;  %3831 = vst.msk [vmem:[%s5061_s27 + $0x3d] sm:$0x7] %vm3821_vm9, %v3781_v56  ;;  %v9815_v63 = vrot.slane %v5967_v28, 7  ;;  %v9468_v43 = vrot.slane %v6078_v25, 1  ;;  %v4138_v13 = vld [vmem:[#allocation2 + $0x70] sm:$0x3f] }
 0x12e   : > { %v1626_v7 = vsel %vm1603_vm7, %v9814_v39, %v9464_v35  ;;  %v6117_v10 = vmul.f32 %v5827_v15, %v5661_v5  ;;  %v3586_v22 = vadd.f32 %v3468_v3, %v3312_v0  ;;  %v9472_v48 = vrot.slane %v6087_v8, 2  ;;  %v6130_v3 = vld [vmem:[#allocation2 + $0x88] sm:$0x3f] }
 0x12f   : > { %v1745_v2 = vadd.f32 %v1626_v7, %v1470_v16  ;;  %v1900_v33 = vsel %vm744_vm2, %v9815_v63, %v9462_v23  ;;  %v466_v56 = vmul.f32 %v4138_v13, %v5578_v31  ;;  %v3265_v28 = vmul.f32 %v5838_v26, %v5531_v1  ;;  %v6125_v7 = vld [vmem:[#allocation2 + $0xa0] sm:$0x3f]  ;;  %9816 = vst [vmem:[#allocation26_spill] sm:$0xff] %v6130_v3 }
 0x130   : > { %v662_v63 = vmul.f32 %v6125_v7, %v5588_v51  ;;  %v3684_v23 = vadd.f32 %v3636_v14, %v3586_v22  ;;  %v564_v13 = vmul.f32 %v6130_v3, %v5584_v38  ;;  %v9817_v50 = vrot.slane %v5947_v60, 1 }
 0x131   : > { %v2019_v16 = vadd.f32 %v1900_v33, %v1745_v2  ;;  %v514_v0 = vadd.f32 %v5599_v37, %v466_v56  ;;  %v1521_v2 = vmul.f32 %v5738_v54, %v5453_v52  ;;  %v9469_v14 = vrot.slane %v6117_v10, 1  ;;  %v6142_v56 = vld [vmem:[#allocation2 + $0xf8] sm:$0xff] }
 0x132   : > { %v2274_v35 = vsel %vm1117_vm3, %v9817_v50, %v9468_v43  ;;  %v768_v22 = vrot.slane %v662_v63, 7  ;;  %v3782_v39 = vadd.f32 %v3734_v20, %v3684_v23  ;;  %v9818_v34 = vrot.slane %v5956_v11, 2 }
 0x133   : > { %v2117_v33 = vadd.f32 %v2069_v53, %v2019_v16  ;;  %v612_v29 = vadd.f32 %v564_v13, %v514_v0  ;;  %v1796_v53 = vmul.f32 %v5744_v6, %v5453_v52  ;;  %v9819_v60 = vrot.slane %v6091_v62, 3 }
 0x134   : > { %v2549_v3 = vsel %vm2524_vm4, %v9818_v34, %v9472_v48  ;;  %v9820_v50 = vrot.slane %v5977_v36, 3  ;;  %v9821_v43 = vrot.slane %v6097_v24, 7  ;;  %v9822_v20 = vrot.slane %v6013_v17, 7  ;;  %3832 = vst.msk [vmem:[%s5061_s27 + $0x3d] sm:$0xf8] %vm3818_vm8, %v3782_v39 }
 0x135   : > { %v2391_v16 = vadd.f32 %v2274_v35, %v2117_v33  ;;  %v3637_v34 = vmul.f32 %v5875_v21, %v5858_v44  ;;  %v937_v0 = vmul.f32 %v6125_v7, %v5620_v12  ;;  %v1627_v36 = vrot.slane %v1521_v2, 6 }
 0x136   : > { %v2824_v63 = vsel %vm2799_vm5, %v9820_v50, %v9819_v60  ;;  %v3096_v23 = vsel %vm744_vm2, %v3094_v42, %v9821_v43  ;;  %v769_v11 = vsel %vm744_vm2, %v9822_v20, %v768_v22  ;;  %v3470_v33 = vsel %vm1117_vm3, %v3467_v18, %v9469_v14  ;;  %v9823_v42 = vld [vmem:[#allocation15_spill] sm:$0xff]  ;;  %v9824_v60 = vld [vmem:[#allocation21_spill] sm:$0xff] }
 0x137   : > { %v887_v35 = vadd.f32 %v769_v11, %v612_v29  ;;  %v2666_v13 = vadd.f32 %v2549_v3, %v2391_v16  ;;  %v3735_v17 = vmul.f32 %v5890_v49, %v6142_v56  ;;  %v467_v43 = vmul.f32 %v9823_v42, %v5578_v31  ;;  %v6182_v16 = vld [vmem:[#allocation2 + $0xa8] sm:$0xff] }
 0x138   : > { %v1901_v22 = vrot.slane %v1796_v53, 7  ;;  %v565_v29 = vmul.f32 %v9824_v60, %v5584_v38  ;;  %v6179_v50 = vmul.f32 %v5588_v51, %v9784_v61  ;;  %9825 = vst [vmem:[#allocation27_spill] sm:$0xff] %v6182_v16  ;;  %v1036_v18 = vmul.f32 %v6182_v16, %v5712_v55 }
 0x139   : > { %v985_v39 = vadd.f32 %v937_v0, %v887_v35  ;;  %v2941_v3 = vadd.f32 %v2824_v63, %v2666_v13  ;;  %v515_v2 = vadd.f32 %v5599_v37, %v467_v43  ;;  %v6188_v20 = vmul.f32 %v5712_v55, %v5367_v46 }
 0x13a   : > { %v9826_v53 = vrot.slane %v6024_v40, 1  ;;  %v9827_v35 = vrot.slane %v6047_v41, 6  ;;  %v2070_v63 = vmul.f32 %v5821_v9, %v5453_v52  ;;  %v2992_v0 = vmul.f32 %v5805_v19, %v5661_v5 }
 0x13b   : > { %v3215_v13 = vadd.f32 %v3096_v23, %v2941_v3  ;;  %v613_v42 = vadd.f32 %v565_v29, %v515_v2  ;;  %v9470_v43 = vrot.slane %v6179_v50, 7  ;;  %v6202_v14 = vmul.f32 %v5727_v30, %v9789_v47 }
 0x13c   : > { %v1260_v11 = vadd.f32 %v9826_v53, %v985_v39  ;;  %v1628_v61 = vsel %vm1603_vm7, %v9827_v35, %v1627_v36  ;;  %v9828_v40 = vrot.slane %v6031_v27, 5  ;;  %v1143_v41 = vrot.slane %v1036_v18, 1 }
 0x13d   : > { %v9471_v36 = vrot.slane %v6188_v20, 1  ;;  %v6209_v53 = vmul.f32 %v5738_v54, %v9789_v47  ;;  %v3313_v35 = vadd.f32 %v3265_v28, %v3215_v13  ;;  %v9829_v23 = vrot.slane %v6054_v58, 7 }
 0x13e   : > { %v1471_v39 = vadd.f32 %v9828_v40, %v1260_v11  ;;  %v888_v3 = vadd.f32 %v9470_v43, %v613_v42  ;;  %v938_v2 = vmul.f32 %v6182_v16, %v5620_v12  ;;  %v3097_v11 = vrot.slane %v2992_v0, 7 }
 0x13f   : > { %v1902_v29 = vsel %vm744_vm2, %v9829_v23, %v1901_v22  ;;  %v2169_v18 = vmul.f32 %v5773_v59, %v9789_v47  ;;  %v6222_v40 = vmul.f32 %v5773_v59, %v5531_v1  ;;  %v3587_v28 = vadd.f32 %v3470_v33, %v3313_v35  ;;  %v6235_v23 = vld [vmem:[#allocation2 + $0x100] sm:$0x3f] }
 0x140   : > { %v1746_v27 = vadd.f32 %v1628_v61, %v1471_v39  ;;  %v986_v13 = vadd.f32 %v938_v2, %v888_v3  ;;  %v2443_v58 = vmul.f32 %v5779_v32, %v9789_v47  ;;  %v6228_v22 = vmul.f32 %v5779_v32, %v5531_v1  ;;  %9830 = vst [vmem:[#allocation28_spill] sm:$0xff] %v6235_v23 }
 0x141   : > { %v1145_v61 = vsel %vm1117_vm3, %v1143_v41, %v9471_v36  ;;  %v9477_v0 = vrot.slane %v6202_v14, 5  ;;  %v9473_v39 = vrot.slane %v6209_v53, 6  ;;  %v3685_v33 = vadd.f32 %v3637_v34, %v3587_v28 }
 0x142   : > { %v2020_v42 = vadd.f32 %v1902_v29, %v1746_v27  ;;  %v1261_v35 = vadd.f32 %v1145_v61, %v986_v13  ;;  %v6239_v3 = vmul.f32 %v5744_v6, %v9789_v47  ;;  %v2275_v2 = vrot.slane %v2169_v18, 1 }
 0x143   : > { %v9474_v29 = vrot.slane %v6222_v40, 1  ;;  %v2550_v27 = vrot.slane %v2443_v58, 2  ;;  %v2718_v41 = vmul.f32 %v5789_v45, %v9789_v47  ;;  %v3783_v36 = vadd.f32 %v3735_v17, %v3685_v33 }
 0x144   : > { %v2118_v43 = vadd.f32 %v2070_v63, %v2020_v42  ;;  %v1472_v48 = vadd.f32 %v9477_v0, %v1261_v35  ;;  %v9475_v34 = vrot.slane %v6228_v22, 2  ;;  %v6249_v28 = vmul.f32 %v5789_v45, %v5531_v1 }
 0x145   : > { %v9831_v13 = vrot.slane %v6078_v25, 1  ;;  %v3266_v63 = vmul.f32 %v5838_v26, %v5661_v5  ;;  %v3638_v58 = vmul.f32 %v5875_v21, %v5962_v57  ;;  %v3736_v47 = vmul.f32 %v5890_v49, %v6235_v23  ;;  %3833 = vst.msk [vmem:[%s5061_s27 + $0x45] sm:$0xff] %vm246_vm0, %v3783_v36  ;;  %v9838_v23 = vld [vmem:[#allocation23_spill] sm:$0xff] }
 0x146   : > { %v9832_v17 = vrot.slane %v6097_v24, 7  ;;  %v1747_v61 = vadd.f32 %v9473_v39, %v1472_v48  ;;  %v9476_v25 = vrot.slane %v6239_v3, 7  ;;  %v9833_v35 = vrot.slane %v6087_v8, 2  ;;  %v9834_v8 = vld [vmem:[#allocation22_spill] sm:$0xff] }
 0x147   : > { %v2392_v18 = vadd.f32 %v9831_v13, %v2118_v43  ;;  %v6267_v43 = vld [vmem:[#allocation2 + $0xc0] sm:$0xff]  ;;  %v2277_v36 = vsel %vm1117_vm3, %v2275_v2, %v9474_v29  ;;  %v2825_v24 = vrot.slane %v2718_v41, 3  ;;  %v3267_v41 = vmul.f32 %v5838_v26, %v5760_v4 }
 0x148   : > { %v3098_v42 = vsel %vm744_vm2, %v9832_v17, %v3097_v11  ;;  %v2071_v33 = vmul.f32 %v6267_v43, %v5821_v9  ;;  %v6278_v11 = vmul.f32 %v5805_v19, %v5760_v4  ;;  %v2021_v48 = vadd.f32 %v9476_v25, %v1747_v61 }
 0x149   : > { %v2667_v13 = vadd.f32 %v9833_v35, %v2392_v18  ;;  %v2552_v17 = vsel %vm2524_vm4, %v2550_v27, %v9475_v34  ;;  %v468_v18 = vmul.f32 %v9834_v8, %v5578_v31  ;;  %v9835_v35 = vrot.slane %v6091_v62, 3  ;;  %v9836_v62 = vld [vmem:[#allocation25_spill] sm:$0xff] }
 0x14a   : > { %v6294_v29 = vmul.f32 %v5588_v51, %v5367_v46  ;;  %v6298_v61 = vmul.f32 %v5712_v55, %v5453_v52  ;;  %v2119_v27 = vadd.f32 %v2071_v33, %v2021_v48  ;;  %v3365_v34 = vmul.f32 %v5827_v15, %v5760_v4 }
 0x14b   : > { %v2942_v2 = vadd.f32 %v9835_v35, %v2667_v13  ;;  %v516_v8 = vadd.f32 %v5599_v37, %v468_v18  ;;  %v566_v13 = vmul.f32 %v9836_v62, %v5584_v38  ;;  %v6309_v46 = vmul.f32 %v5727_v30, %v5531_v1  ;;  %v6331_v30 = vld [vmem:[#allocation2 + $0xb0] sm:$0xff] }
 0x14c   : > { %v9482_v0 = vrot.slane %v6294_v29, 7  ;;  %v2393_v39 = vadd.f32 %v2277_v36, %v2119_v27  ;;  %v6313_v33 = vmul.f32 %v5827_v15, %v5858_v44  ;;  %v6317_v18 = vmul.f32 %v5738_v54, %v5531_v1  ;;  %9839 = vst [vmem:[#allocation16_spill] sm:$0xff] %v6331_v30 }
 0x14d   : > { %v3216_v35 = vadd.f32 %v3098_v42, %v2942_v2  ;;  %v614_v48 = vadd.f32 %v566_v13, %v516_v8  ;;  %v9837_v42 = vrot.slane %v6179_v50, 7  ;;  %v6327_v36 = vmul.f32 %v5744_v6, %v5531_v1 }
 0x14e   : > { %v2668_v27 = vadd.f32 %v2552_v17, %v2393_v39  ;;  %v3639_v8 = vmul.f32 %v5875_v21, %v9838_v23  ;;  %v9841_v50 = vrot.slane %v6117_v10, 1  ;;  %v3471_v4 = vrot.slane %v3365_v34, 1 }
 0x14f   : > { %v3314_v62 = vadd.f32 %v3266_v63, %v3216_v35  ;;  %v772_v2 = vsel %vm744_vm2, %v9837_v42, %v9482_v0  ;;  %v939_v63 = vmul.f32 %v6331_v30, %v5620_v12  ;;  %v6335_v35 = vld [vmem:[#allocation2 + $0x108] sm:$0xff]  ;;  %v9842_v0 = vrot.slane %v6249_v28, 3 }
 0x150   : > { %v889_v13 = vadd.f32 %v772_v2, %v614_v48  ;;  %9840 = vst [vmem:[#allocation18_spill] sm:$0xff] %v6335_v35  ;;  %v9492_v39 = vrot.slane %v6309_v46, 5  ;;  %v3472_v48 = vrot.slane %v6313_v33, 1  ;;  %v1630_v23 = vrot.slane %v6317_v18, 6  ;;  %v9859_v18 = vld [vmem:[#allocation12_spill] sm:$0xff] }
 0x151   : > { %v3588_v42 = vadd.f32 %v9841_v50, %v3314_v62  ;;  %v2827_v25 = vsel %vm2799_vm5, %v2825_v24, %v9842_v0  ;;  %v9843_v30 = vrot.slane %v6298_v61, 1  ;;  %v9844_v16 = vrot.slane %v6188_v20, 1 }
 0x152   : > { %v2943_v17 = vadd.f32 %v2827_v25, %v2668_v27  ;;  %v987_v2 = vadd.f32 %v939_v63, %v889_v13  ;;  %v9491_v62 = vrot.slane %v6327_v36, 7  ;;  %v6353_v0 = vmul.f32 %v5773_v59, %v5661_v5 }
 0x153   : > { %v3686_v55 = vadd.f32 %v3638_v58, %v3588_v42  ;;  %v1147_v10 = vsel %vm1117_vm3, %v9844_v16, %v9843_v30  ;;  %v9845_v34 = vrot.slane %v6278_v11, 7  ;;  %v3737_v24 = vmul.f32 %v5890_v49, %v6335_v35 }
 0x154   : > { %v1262_v58 = vadd.f32 %v1147_v10, %v987_v2  ;;  %v6361_v33 = vmul.f32 %v5779_v32, %v5661_v5  ;;  %v9846_v30 = vrot.slane %v6202_v14, 5  ;;  %v6370_v27 = vmul.f32 %v5789_v45, %v5661_v5 }
 0x155   : > { %v3217_v25 = vadd.f32 %v9845_v34, %v2943_v17  ;;  %v3784_v20 = vadd.f32 %v3736_v47, %v3686_v55  ;;  %v6374_v13 = vmul.f32 %v5805_v19, %v5858_v44  ;;  %v3473_v50 = vsel %vm1117_vm3, %v3471_v4, %v3472_v48 }
 0x156   : > { %v1378_v16 = vsel %vm1360_vm6, %v9846_v30, %v9492_v39  ;;  %v9847_v55 = vrot.slane %v6209_v53, 6  ;;  %v9848_v47 = vrot.slane %v6239_v3, 7  ;;  %v2278_v4 = vrot.slane %v6353_v0, 1 }
 0x157   : > { %v3315_v63 = vadd.f32 %v3267_v41, %v3217_v25  ;;  %v1473_v42 = vadd.f32 %v1378_v16, %v1262_v58  ;;  %3834 = vst.msk [vmem:[%s5061_s27 + $0x4d] sm:$0x7] %vm3821_vm9, %v3784_v20  ;;  %v2072_v41 = vmul.f32 %v5821_v9, %v5531_v1  ;;  %v6394_v2 = vmul.f32 %v5827_v15, %v5962_v57  ;;  %v9849_v25 = vld [vmem:[#allocation26_spill] sm:$0xff] }
 0x158   : > { %v1631_v14 = vsel %vm1603_vm7, %v9847_v55, %v1630_v23  ;;  %v1905_v17 = vsel %vm744_vm2, %v9848_v47, %v9491_v62  ;;  %v2553_v34 = vrot.slane %v6361_v33, 2  ;;  %v469_v58 = vmul.f32 %v9849_v25, %v5578_v31 }
 0x159   : > { %v3589_v53 = vadd.f32 %v3473_v50, %v3315_v63  ;;  %v1748_v10 = vadd.f32 %v1631_v14, %v1473_v42  ;;  %v2828_v3 = vrot.slane %v6370_v27, 3  ;;  %v3100_v20 = vrot.slane %v6374_v13, 7  ;;  %v9863_v13 = vld [vmem:[#allocation23_spill] sm:$0xff] }
 0x15a   : > { %v3268_v30 = vmul.f32 %v5838_v26, %v5858_v44  ;;  %v665_v16 = vmul.f32 %v5588_v51, %v5453_v52  ;;  %v517_v63 = vadd.f32 %v5599_v37, %v469_v58  ;;  %v567_v50 = vmul.f32 %v6125_v7, %v5584_v38 }
 0x15b   : > { %v3687_v55 = vadd.f32 %v3639_v8, %v3589_v53  ;;  %v2022_v47 = vadd.f32 %v1905_v17, %v1748_v10  ;;  %v9850_v42 = vrot.slane %v6222_v40, 1  ;;  %v9493_v25 = vrot.slane %v6394_v2, 1  ;;  %v6416_v8 = vld [vmem:[#allocation2 + $0x110] sm:$0xff] }
 0x15c   : > { %v773_v62 = vrot.slane %v665_v16, 7  ;;  %v1524_v52 = vmul.f32 %v5738_v54, %v5661_v5  ;;  %v9851_v10 = vrot.slane %v6228_v22, 2  ;;  %v615_v39 = vadd.f32 %v567_v50, %v517_v63 }
 0x15d   : > { %v2279_v14 = vsel %vm1117_vm3, %v9850_v42, %v2278_v4  ;;  %v3785_v17 = vadd.f32 %v3737_v24, %v3687_v55  ;;  %v2120_v53 = vadd.f32 %v2072_v41, %v2022_v47  ;;  %v9852_v40 = vrot.slane %v6249_v28, 3  ;;  %v6440_v28 = vld [vmem:[#allocation2 + $0xb8] sm:$0x3f] }
 0x15e   : > { %v2554_v58 = vsel %vm2524_vm4, %v9851_v10, %v2553_v34  ;;  %v9853_v42 = vrot.slane %v6278_v11, 7  ;;  %v3640_v41 = vmul.f32 %v5875_v21, %v6142_v56  ;;  %v9854_v22 = vrot.slane %v6294_v29, 7 }
 0x15f   : > { %v2829_v16 = vsel %vm2799_vm5, %v9852_v40, %v2828_v3  ;;  %3835 = vst.msk [vmem:[%s5061_s27 + $0x4d] sm:$0xf8] %vm3818_vm8, %v3785_v17  ;;  %v2394_v47 = vadd.f32 %v2279_v14, %v2120_v53  ;;  %v940_v50 = vmul.f32 %v6440_v28, %v5620_v12  ;;  %v1799_v11 = vmul.f32 %v5744_v6, %v5661_v5 }
 0x160   : > { %v3101_v24 = vsel %vm744_vm2, %v9853_v42, %v3100_v20  ;;  %v774_v55 = vsel %vm744_vm2, %v9854_v22, %v773_v62  ;;  %v3475_v10 = vsel %vm1117_vm3, %v3472_v48, %v9493_v25  ;;  %v3738_v29 = vmul.f32 %v5890_v49, %v6416_v8  ;;  %v9855_v48 = vld [vmem:[#allocation27_spill] sm:$0xff] }
 0x161   : > { %v890_v63 = vadd.f32 %v774_v55, %v615_v39  ;;  %v1632_v62 = vrot.slane %v1524_v52, 6  ;;  %v470_v14 = vmul.f32 %v9824_v60, %v5578_v31  ;;  %v2669_v39 = vadd.f32 %v2554_v58, %v2394_v47  ;;  %v9856_v55 = vld [vmem:[#allocation17_spill] sm:$0xff] }
 0x162   : > { %v2073_v53 = vmul.f32 %v5821_v9, %v5661_v5  ;;  %v6457_v40 = vmul.f32 %v6267_v43, %v5588_v51  ;;  %v568_v22 = vmul.f32 %v9855_v48, %v5584_v38  ;;  %v1039_v52 = vmul.f32 %v6267_v43, %v9856_v55 }
 0x163   : > { %v988_v17 = vadd.f32 %v940_v50, %v890_v63  ;;  %v518_v42 = vadd.f32 %v5599_v37, %v470_v14  ;;  %v6466_v31 = vmul.f32 %v9856_v55, %v5531_v1  ;;  %v2944_v60 = vadd.f32 %v2829_v16, %v2669_v39 }
 0x164   : > { %v9857_v58 = vrot.slane %v6298_v61, 1  ;;  %v1906_v63 = vrot.slane %v1799_v11, 7  ;;  %v2995_v51 = vmul.f32 %v5805_v19, %v5962_v57  ;;  %v1633_v37 = vsel %vm1603_vm7, %v1630_v23, %v1632_v62  ;;  %v9860_v62 = vld [vmem:[#allocation13_spill] sm:$0xff] }
 0x165   : > { %v6477_v38 = vmul.f32 %v5838_v26, %v5962_v57  ;;  %v616_v50 = vadd.f32 %v568_v22, %v518_v42  ;;  %v9495_v1 = vrot.slane %v6457_v40, 7  ;;  %v3218_v14 = vadd.f32 %v3101_v24, %v2944_v60 }
 0x166   : > { %v1263_v47 = vadd.f32 %v9857_v58, %v988_v17  ;;  %v9858_v16 = vrot.slane %v6309_v46, 5  ;;  %v1148_v39 = vrot.slane %v1039_v52, 1  ;;  %v9494_v11 = vrot.slane %v6466_v31, 1 }
 0x167   : > { %v891_v17 = vadd.f32 %v9495_v1, %v616_v50  ;;  %v941_v23 = vmul.f32 %v6267_v43, %v5620_v12  ;;  %v6489_v58 = vmul.f32 %v9860_v62, %v9859_v18  ;;  %v6493_v42 = vmul.f32 %v5738_v54, %v9859_v18  ;;  %v9862_v1 = vld [vmem:[#allocation28_spill] sm:$0xff] }
 0x168   : > { %v1474_v61 = vadd.f32 %v9858_v16, %v1263_v47  ;;  %v3316_v24 = vadd.f32 %v3268_v30, %v3218_v14  ;;  %v9861_v22 = vrot.slane %v6327_v36, 7  ;;  %v2172_v60 = vmul.f32 %v5773_v59, %v9859_v18 }
 0x169   : > { %v989_v47 = vadd.f32 %v941_v23, %v891_v17  ;;  %v6502_v12 = vmul.f32 %v5773_v59, %v5858_v44  ;;  %v2446_v50 = vmul.f32 %v5779_v32, %v9859_v18  ;;  %v6508_v16 = vmul.f32 %v5779_v32, %v5858_v44 }
 0x16a   : > { %v1749_v46 = vadd.f32 %v1633_v37, %v1474_v61  ;;  %v1907_v52 = vsel %vm744_vm2, %v9861_v22, %v1906_v63  ;;  %v3590_v30 = vadd.f32 %v3475_v10, %v3316_v24  ;;  %v3102_v36 = vrot.slane %v2995_v51, 7  ;;  %v6519_v22 = vld [vmem:[#allocation2 + $0x118] sm:$0x3f] }
 0x16b   : > { %v1150_v63 = vsel %vm1117_vm3, %v1148_v39, %v9494_v11  ;;  %v9500_v61 = vrot.slane %v6489_v58, 5  ;;  %v9499_v17 = vrot.slane %v6493_v42, 6  ;;  %v6517_v23 = vmul.f32 %v5744_v6, %v9859_v18 }
 0x16c   : > { %v2023_v37 = vadd.f32 %v1907_v52, %v1749_v46  ;;  %v1264_v14 = vadd.f32 %v1150_v63, %v989_v47  ;;  %v3688_v25 = vadd.f32 %v3640_v41, %v3590_v30  ;;  %v2280_v24 = vrot.slane %v2172_v60, 1 }
 0x16d   : > { %v2721_v51 = vmul.f32 %v5789_v45, %v9859_v18  ;;  %v9497_v46 = vrot.slane %v6502_v12, 1  ;;  %v2555_v52 = vrot.slane %v2446_v50, 2  ;;  %v9496_v47 = vrot.slane %v6508_v16, 2 }
 0x16e   : > { %v2121_v10 = vadd.f32 %v2073_v53, %v2023_v37  ;;  %v1475_v39 = vadd.f32 %v9500_v61, %v1264_v14  ;;  %v3786_v63 = vadd.f32 %v3738_v29, %v3688_v25  ;;  %v3641_v41 = vmul.f32 %v5875_v21, %v9862_v1 }
 0x16f   : > { %v6533_v53 = vmul.f32 %v5789_v45, %v5858_v44  ;;  %v3103_v60 = vsel %vm744_vm2, %v3100_v20, %v3102_v36  ;;  %v3739_v50 = vmul.f32 %v5890_v49, %v6519_v22  ;;  %v9498_v0 = vrot.slane %v6517_v23, 7 }
 0x170   : > { %v2395_v11 = vadd.f32 %v2278_v4, %v2121_v10  ;;  %v1750_v25 = vadd.f32 %v9499_v17, %v1475_v39  ;;  %3836 = vst.msk [vmem:[%s5061_s27 + $0x55] sm:$0xff] %vm246_vm0, %v3786_v63  ;;  %v2074_v29 = vmul.f32 %v5821_v9, %v9859_v18  ;;  %v2830_v30 = vrot.slane %v2721_v51, 3  ;;  %v6570_v39 = vld [vmem:[#allocation3 + $0x2] ss:$0 sm:$0xff] }
 0x171   : > { %v6551_v20 = vmul.f32 %v5805_v19, %v9863_v13  ;;  %v2282_v36 = vsel %vm1117_vm3, %v2280_v24, %v9497_v46  ;;  %v2557_v33 = vsel %vm2524_vm4, %v2555_v52, %v9496_v47  ;;  %v3270_v51 = vmul.f32 %v5838_v26, %v9863_v13  ;;  %v6572_v24 = vld [vmem:[#allocation2 + $0xc8] sm:$0xff] }
 0x172   : > { %v2670_v4 = vadd.f32 %v2553_v34, %v2395_v11  ;;  %v2024_v37 = vadd.f32 %v9498_v0, %v1750_v25  ;;  %v6561_v34 = vld [vmem:[#allocation3] ss:$0 sm:$0xff]  ;;  %9865 = vst [vmem:[#allocation19_spill] sm:$0xff] %v6572_v24  ;;  %v6576_v52 = vmul.f32 %v6572_v24, %v6570_v39  ;;  %v6581_v25 = vld [vmem:[%s9376_s1] ss:$0 sm:$0xff]  ;;  %v6590_v47 = vmul.f32 %v9856_v55, %v5661_v5 }
 0x173   : > { %v9864_v11 = vld [vmem:[#allocation25_spill] sm:$0xff]  ;;  %v6602_v61 = vmul.f32 %v5827_v15, %v6142_v56  ;;  %v9867_v55 = vrot.slane %v6457_v40, 7  ;;  %v9868_v40 = vrot.slane %v6394_v2, 1 }
 0x174   : > { %v471_v18 = vmul.f32 %v6561_v34, %v9864_v11  ;;  %v2945_v14 = vadd.f32 %v2828_v3, %v2670_v4  ;;  %v2122_v63 = vadd.f32 %v2074_v29, %v2024_v37  ;;  %v6584_v3 = vld [vmem:[#allocation3 + $0x1] ss:$0 sm:$0xff]  ;;  %v9866_v4 = vld [vmem:[#allocation16_spill] sm:$0xff]  ;;  %v9501_v29 = vrot.slane %v6576_v52, 7  ;;  %v6615_v0 = vld [vmem:[#allocation3 + $0x3] ss:$0 sm:$0xff] }
 0x175   : > { %v569_v11 = vmul.f32 %v6584_v3, %v9866_v4  ;;  %v6596_v37 = vmul.f32 %v9860_v62, %v5858_v44  ;;  %v1151_v62 = vrot.slane %v6590_v47, 1 }
 0x176   : > { %v519_v27 = vadd.f32 %v6581_v25, %v471_v18  ;;  %v3219_v46 = vadd.f32 %v3103_v60, %v2945_v14  ;;  %v2396_v17 = vadd.f32 %v2282_v36, %v2122_v63  ;;  %v3368_v18 = vmul.f32 %v5827_v15, %v9863_v13 }
 0x177   : > { %v777_v60 = vsel %vm744_vm2, %v9867_v55, %v9501_v29  ;;  %v6613_v36 = vmul.f32 %v5738_v54, %v5858_v44  ;;  %v3642_v54 = vmul.f32 %v5875_v21, %v6335_v35  ;;  %v6633_v29 = vmul.f32 %v5773_v59, %v5962_v57 }
 0x178   : > { %v617_v10 = vadd.f32 %v569_v11, %v519_v27  ;;  %v3317_v5 = vadd.f32 %v6477_v38, %v3219_v46  ;;  %v2671_v14 = vadd.f32 %v2557_v33, %v2396_v17  ;;  %v942_v27 = vmul.f32 %v6615_v0, %v6572_v24 }
 0x179   : > { %v6621_v38 = vmul.f32 %v5744_v6, %v5858_v44  ;;  %v9869_v11 = vrot.slane %v6533_v53, 3  ;;  %v1380_v17 = vrot.slane %v6596_v37, 5  ;;  %v6635_v6 = vld [vmem:[#allocation2 + $0x120] sm:$0xff]  ;;  %v6798_v37 = vld [vmem:[#allocation3 + $0x9] ss:$0 sm:$0xff] }
 0x17a   : > { %v892_v63 = vadd.f32 %v777_v60, %v617_v10  ;;  %v3591_v46 = vadd.f32 %v9868_v40, %v3317_v5  ;;  %v3476_v10 = vrot.slane %v3368_v18, 1  ;;  %v3477_v5 = vrot.slane %v6602_v61, 1 }
 0x17b   : > { %v2832_v55 = vsel %vm2799_vm5, %v2830_v30, %v9869_v11  ;;  %v9870_v30 = vrot.slane %v6466_v31, 1  ;;  %v9871_v18 = vrot.slane %v6551_v20, 7  ;;  %v9503_v59 = vrot.slane %v6621_v38, 7 }
 0x17c   : > { %v2946_v33 = vadd.f32 %v2832_v55, %v2671_v14  ;;  %v990_v60 = vadd.f32 %v942_v27, %v892_v63  ;;  %v3689_v2 = vadd.f32 %v3641_v41, %v3591_v46  ;;  %v1635_v14 = vrot.slane %v6613_v36, 6 }
 0x17d   : > { %v1152_v40 = vsel %vm1117_vm3, %v9870_v30, %v1151_v62  ;;  %v6649_v41 = vmul.f32 %v5779_v32, %v5962_v57  ;;  %v9872_v61 = vrot.slane %v6489_v58, 5  ;;  %v6658_v11 = vmul.f32 %v5789_v45, %v5962_v57 }
 0x17e   : > { %v3220_v63 = vadd.f32 %v9871_v18, %v2946_v33  ;;  %v1265_v27 = vadd.f32 %v1152_v40, %v990_v60  ;;  %v3787_v46 = vadd.f32 %v3739_v50, %v3689_v2  ;;  %v6662_v55 = vmul.f32 %v5805_v19, %v6142_v56 }
 0x17f   : > { %v1381_v31 = vsel %vm1360_vm6, %v9872_v61, %v1380_v17  ;;  %v3740_v32 = vmul.f32 %v5890_v49, %v6635_v6  ;;  %v9502_v50 = vrot.slane %v6633_v29, 1  ;;  %v3478_v58 = vsel %vm1117_vm3, %v3476_v10, %v3477_v5  ;;  %v6691_v61 = vld [vmem:[#allocation2 + $0xd0] sm:$0x3f] }
 0x180   : > { %v3318_v33 = vadd.f32 %v3270_v51, %v3220_v63  ;;  %v1476_v60 = vadd.f32 %v1381_v31, %v1265_v27  ;;  %3837 = vst.msk [vmem:[%s5061_s27 + $0x5d] sm:$0x7] %vm3821_vm9, %v3787_v46  ;;  %v9873_v45 = vrot.slane %v6493_v42, 6  ;;  %v2075_v19 = vmul.f32 %v5821_v9, %v5858_v44 }
 0x181   : > { %v6679_v51 = vmul.f32 %v5827_v15, %v9862_v1  ;;  %v9874_v18 = vrot.slane %v6517_v23, 7  ;;  %v9508_v63 = vrot.slane %v6649_v41, 2  ;;  %v9505_v42 = vrot.slane %v6658_v11, 3 }
 0x182   : > { %v1636_v2 = vsel %vm1603_vm7, %v9873_v45, %v1635_v14  ;;  %v3592_v30 = vadd.f32 %v3478_v58, %v3318_v33  ;;  %v3105_v27 = vrot.slane %v6662_v55, 7  ;;  %v472_v46 = vmul.f32 %v6561_v34, %v6125_v7  ;;  %v6702_v45 = vld [vmem:[#allocation2 + $0x128] sm:$0xff] }
 0x183   : > { %v1751_v40 = vadd.f32 %v1636_v2, %v1476_v60  ;;  %v1910_v10 = vsel %vm744_vm2, %v9874_v18, %v9503_v59  ;;  %v668_v15 = vmul.f32 %v6691_v61, %v6570_v39  ;;  %v9875_v23 = vrot.slane %v6502_v12, 1 }
 0x184   : > { %v3690_v31 = vadd.f32 %v3642_v54, %v3592_v30  ;;  %v3271_v58 = vmul.f32 %v5838_v26, %v6142_v56  ;;  %v9504_v7 = vrot.slane %v6679_v51, 1  ;;  %v520_v2 = vadd.f32 %v6581_v25, %v472_v46 }
 0x185   : > { %v2025_v33 = vadd.f32 %v1910_v10, %v1751_v40  ;;  %v2284_v60 = vsel %vm1117_vm3, %v9875_v23, %v9502_v50  ;;  %v570_v54 = vmul.f32 %v6584_v3, %v6440_v28  ;;  %v778_v30 = vrot.slane %v668_v15, 7  ;;  %v6713_v23 = vld [vmem:[#allocation3 + $0x6] ss:$0 sm:$0xff] }
 0x186   : > { %v3788_v40 = vadd.f32 %v3740_v32, %v3690_v31  ;;  %v9876_v12 = vrot.slane %v6508_v16, 2  ;;  %v1527_v50 = vmul.f32 %v6713_v23, %v5962_v57  ;;  %v9877_v46 = vrot.slane %v6533_v53, 3 }
 0x187   : > { %v2123_v18 = vadd.f32 %v2075_v19, %v2025_v33  ;;  %v9878_v32 = vrot.slane %v6551_v20, 7  ;;  %v618_v16 = vadd.f32 %v570_v54, %v520_v2  ;;  %v9879_v15 = vrot.slane %v6576_v52, 7 }
 0x188   : > { %v2559_v10 = vsel %vm2524_vm4, %v9876_v12, %v9508_v63  ;;  %v2834_v59 = vsel %vm2799_vm5, %v9877_v46, %v9505_v42  ;;  %3838 = vst.msk [vmem:[%s5061_s27 + $0x5d] sm:$0xf8] %vm3818_vm8, %v3788_v40  ;;  %v3643_v12 = vmul.f32 %v5875_v21, %v6416_v8  ;;  %v6736_v53 = vmul.f32 %v5890_v49, %v6702_v45  ;;  %v6738_v46 = vld [vmem:[#allocation3 + $0x7] ss:$0 sm:$0xff]  ;;  %v6751_v40 = vld [vmem:[#allocation2 + $0xd8] sm:$0xff] }
 0x189   : > { %v3106_v19 = vsel %vm744_vm2, %v9878_v32, %v3105_v27  ;;  %v779_v31 = vsel %vm744_vm2, %v9879_v15, %v778_v30  ;;  %v2397_v33 = vadd.f32 %v2284_v60, %v2123_v18  ;;  %v1802_v20 = vmul.f32 %v6738_v46, %v5962_v57  ;;  %9880 = vst [vmem:[#allocation20_spill] sm:$0xff] %v6751_v40  ;;  %v6760_v15 = vld [vmem:[#allocation3 + $0x4] ss:$0 sm:$0xff]  ;;  %v6848_v63 = vld [vmem:[#allocation3 + $0x10] ss:$0 sm:$0xff] }
 0x18a   : > { %v3480_v52 = vsel %vm1117_vm3, %v3477_v5, %v9504_v7  ;;  %v893_v2 = vadd.f32 %v779_v31, %v618_v16  ;;  %v943_v60 = vmul.f32 %v6691_v61, %v6615_v0  ;;  %v473_v21 = vmul.f32 %v6561_v34, %v9855_v48  ;;  %9881 = vst [vmem:[#allocation24_spill] sm:$0xff] %v6760_v15 }
 0x18b   : > { %v2672_v54 = vadd.f32 %v2559_v10, %v2397_v33  ;;  %v1637_v30 = vrot.slane %v1527_v50, 6  ;;  %v2076_v49 = vmul.f32 %v5821_v9, %v5962_v57  ;;  %v6755_v18 = vmul.f32 %v6751_v40, %v6570_v39  ;;  %v6764_v9 = vld [vmem:[#allocation3 + $0xc] ss:$0 sm:$0xff] }
 0x18c   : > { %v991_v32 = vadd.f32 %v943_v60, %v893_v2  ;;  %v521_v5 = vadd.f32 %v6581_v25, %v473_v21  ;;  %v571_v16 = vmul.f32 %v6584_v3, %v6267_v43  ;;  %v1042_v48 = vmul.f32 %v6760_v15, %v6751_v40 }
 0x18d   : > { %v2947_v50 = vadd.f32 %v2834_v59, %v2672_v54  ;;  %v1911_v10 = vrot.slane %v1802_v20, 7  ;;  %v2998_v31 = vmul.f32 %v6764_v9, %v9862_v1  ;;  %v6770_v33 = vmul.f32 %v6760_v15, %v5858_v44 }
 0x18e   : > { %v1266_v2 = vadd.f32 %v1151_v62, %v991_v32  ;;  %v6776_v60 = vmul.f32 %v5838_v26, %v9862_v1  ;;  %v619_v21 = vadd.f32 %v571_v16, %v521_v5  ;;  %v9507_v59 = vrot.slane %v6755_v18, 7  ;;  %v6789_v62 = vld [vmem:[#allocation3 + $0x5] ss:$0 sm:$0xff] }
 0x18f   : > { %v3221_v20 = vadd.f32 %v3106_v19, %v2947_v50  ;;  %v1638_v54 = vsel %vm1603_vm7, %v1635_v14, %v1637_v30  ;;  %v1153_v7 = vrot.slane %v1042_v48, 1  ;;  %v9506_v42 = vrot.slane %v6770_v33, 1  ;;  %9882 = vst [vmem:[#allocation14_spill] sm:$0xff] %v6789_v62 }
 0x190   : > { %v1477_v44 = vadd.f32 %v1380_v17, %v1266_v2  ;;  %v894_v47 = vadd.f32 %v9507_v59, %v619_v21  ;;  %v944_v26 = vmul.f32 %v6751_v40, %v6615_v0  ;;  %v6793_v19 = vmul.f32 %v6789_v62, %v9863_v13 }
 0x191   : > { %v3319_v36 = vadd.f32 %v3271_v58, %v3221_v20  ;;  %v9883_v14 = vrot.slane %v6621_v38, 7  ;;  %v3107_v32 = vrot.slane %v2998_v31, 7  ;;  %v2175_v17 = vmul.f32 %v6798_v37, %v9863_v13 }
 0x192   : > { %v1752_v5 = vadd.f32 %v1638_v54, %v1477_v44  ;;  %v992_v16 = vadd.f32 %v944_v26, %v894_v47  ;;  %v6804_v48 = vmul.f32 %v6713_v23, %v9863_v13  ;;  %v6808_v50 = vmul.f32 %v6798_v37, %v6142_v56  ;;  %v6826_v44 = vld [vmem:[#allocation2 + $0x130] sm:$0x3f] }
 0x193   : > { %v1912_v30 = vsel %vm744_vm2, %v9883_v14, %v1911_v10  ;;  %v3593_v58 = vadd.f32 %v3480_v52, %v3319_v36  ;;  %v1155_v38 = vsel %vm1117_vm3, %v1153_v7, %v9506_v42  ;;  %v6813_v10 = vld [vmem:[#allocation3 + $0xa] ss:$0 sm:$0xff]  ;;  %v9509_v54 = vrot.slane %v6793_v19, 5  ;;  %9884 = vst [vmem:[#allocation15_spill] sm:$0xff] %v6826_v44  ;;  %v6829_v36 = vld [vmem:[#allocation3 + $0xb] ss:$0 sm:$0xff] }
 0x194   : > { %v2449_v31 = vmul.f32 %v6813_v10, %v9863_v13  ;;  %v6819_v2 = vmul.f32 %v6813_v10, %v6142_v56  ;;  %v2026_v21 = vadd.f32 %v1912_v30, %v1752_v5  ;;  %v1267_v20 = vadd.f32 %v1155_v38, %v992_v16  ;;  %v6833_v5 = vld [vmem:[#allocation3 + $0xf] ss:$0 sm:$0xff] }
 0x195   : > { %v6824_v52 = vmul.f32 %v6738_v46, %v9863_v13  ;;  %v3691_v7 = vadd.f32 %v3643_v12, %v3593_v58  ;;  %v2285_v47 = vrot.slane %v2175_v17, 1  ;;  %v2724_v14 = vmul.f32 %v6829_v36, %v9863_v13 }
 0x196   : > { %v2124_v30 = vadd.f32 %v2076_v49, %v2026_v21  ;;  %v3644_v16 = vmul.f32 %v6833_v5, %v6519_v22  ;;  %v1478_v38 = vadd.f32 %v9509_v54, %v1267_v20  ;;  %v9510_v12 = vrot.slane %v6804_v48, 6 }
 0x197   : > { %v3789_v17 = vadd.f32 %v6736_v53, %v3691_v7  ;;  %v2560_v58 = vrot.slane %v2449_v31, 2  ;;  %v9511_v42 = vrot.slane %v6819_v2, 2  ;;  %v6844_v59 = vmul.f32 %v6829_v36, %v6142_v56  ;;  %v6860_v7 = vld [vmem:[#allocation3 + $0x8] ss:$0 sm:$0xff] }
 0x198   : > { %v9885_v49 = vrot.slane %v6633_v29, 1  ;;  %v3742_v26 = vmul.f32 %v6848_v63, %v6826_v44  ;;  %v1753_v20 = vadd.f32 %v9510_v12, %v1478_v38  ;;  %v9512_v53 = vrot.slane %v6824_v52, 7 }
 0x199   : > { %3839 = vst.msk [vmem:[%s5061_s27 + $0x65] sm:$0xff] %vm246_vm0, %v3789_v17  ;;  %v3108_v31 = vsel %vm744_vm2, %v3105_v27, %v3107_v32  ;;  %v2077_v29 = vmul.f32 %v6860_v7, %v9863_v13  ;;  %v2835_v54 = vrot.slane %v2724_v14, 3  ;;  %v9887_v38 = vrot.slane %v6649_v41, 2 }
 0x19a   : > { %v2398_v21 = vadd.f32 %v9885_v49, %v2124_v30  ;;  %v9886_v30 = vrot.slane %v6808_v50, 1  ;;  %v2027_v17 = vadd.f32 %v9512_v53, %v1753_v20  ;;  %v6873_v55 = vmul.f32 %v6764_v9, %v6335_v35  ;;  %v6900_v53 = vld [vmem:[#allocation3 + $0xe] ss:$0 sm:$0xff] }
 0x19b   : > { %v474_v27 = vmul.f32 %v6561_v34, %v9866_v4  ;;  %v2562_v13 = vsel %vm2524_vm4, %v2560_v58, %v9511_v42  ;;  %v572_v41 = vmul.f32 %v6584_v3, %v6572_v24  ;;  %v6894_v58 = vmul.f32 %v6760_v15, %v5962_v57  ;;  %9889 = vst [vmem:[#allocation21_spill] sm:$0xff] %v6900_v53 }
 0x19c   : > { %v2287_v49 = vsel %vm1117_vm3, %v2285_v47, %v9886_v30  ;;  %v2673_v12 = vadd.f32 %v9887_v38, %v2398_v21  ;;  %v6883_v47 = vld [vmem:[#allocation2 + $0xe0] sm:$0xff]  ;;  %v9888_v21 = vrot.slane %v6658_v11, 3  ;;  %v2125_v30 = vadd.f32 %v2077_v29, %v2027_v17  ;;  %v6896_v38 = vld [vmem:[#allocation3 + $0xd] ss:$0 sm:$0xff] }
 0x19d   : > { %v6887_v14 = vmul.f32 %v6883_v47, %v6570_v39  ;;  %v522_v4 = vadd.f32 %v6581_v25, %v474_v27  ;;  %v3273_v42 = vmul.f32 %v6896_v38, %v6335_v35  ;;  %v3371_v32 = vmul.f32 %v6900_v53, %v6335_v35 }
 0x19e   : > { %v2948_v20 = vadd.f32 %v9888_v21, %v2673_v12  ;;  %v6907_v12 = vmul.f32 %v6789_v62, %v6142_v56  ;;  %v2399_v17 = vadd.f32 %v2287_v49, %v2125_v30  ;;  %v6911_v57 = vmul.f32 %v6900_v53, %v6416_v8  ;;  %v6935_v62 = vld [vmem:[#allocation2 + $0x138] sm:$0xff] }
 0x19f   : > { %v9518_v11 = vrot.slane %v6887_v14, 7  ;;  %v620_v27 = vadd.f32 %v572_v41, %v522_v4  ;;  %v9890_v21 = vrot.slane %v6755_v18, 7  ;;  %v6921_v35 = vmul.f32 %v6713_v23, %v6142_v56 }
 0x1a0   : > { %v3222_v29 = vadd.f32 %v3108_v31, %v2948_v20  ;;  %v6925_v31 = vmul.f32 %v6738_v46, %v6142_v56  ;;  %v2674_v20 = vadd.f32 %v2562_v13, %v2399_v17  ;;  %v945_v30 = vmul.f32 %v6883_v47, %v6615_v0 }
 0x1a1   : > { %v782_v24 = vsel %vm744_vm2, %v9890_v21, %v9518_v11  ;;  %v9891_v18 = vrot.slane %v6844_v59, 3  ;;  %v3109_v21 = vrot.slane %v6873_v55, 7  ;;  %v3481_v11 = vrot.slane %v3371_v32, 1 }
 0x1a2   : > { %v3320_v49 = vadd.f32 %v6776_v60, %v3222_v29  ;;  %v895_v41 = vadd.f32 %v782_v24, %v620_v27  ;;  %v9525_v44 = vrot.slane %v6907_v12, 5  ;;  %v9892_v40 = vrot.slane %v6679_v51, 1 }
 0x1a3   : > { %v2837_v4 = vsel %vm2799_vm5, %v2835_v54, %v9891_v18  ;;  %v9528_v24 = vrot.slane %v6911_v57, 1  ;;  %v9893_v29 = vrot.slane %v6894_v58, 1  ;;  %v9894_v17 = vrot.slane %v6770_v33, 1 }
 0x1a4   : > { %v3594_v15 = vadd.f32 %v9892_v40, %v3320_v49  ;;  %v2949_v60 = vadd.f32 %v2837_v4, %v2674_v20  ;;  %v993_v13 = vadd.f32 %v945_v30, %v895_v41  ;;  %v9527_v55 = vrot.slane %v6921_v35, 6 }
 0x1a5   : > { %v1157_v54 = vsel %vm1117_vm3, %v9894_v17, %v9893_v29  ;;  %v9526_v32 = vrot.slane %v6925_v31, 7  ;;  %v6949_v27 = vmul.f32 %v6798_v37, %v9862_v1  ;;  %v6953_v20 = vmul.f32 %v6813_v10, %v9862_v1 }
 0x1a6   : > { %v3692_v51 = vadd.f32 %v3644_v16, %v3594_v15  ;;  %v3223_v40 = vadd.f32 %v3109_v21, %v2949_v60  ;;  %v1268_v49 = vadd.f32 %v1157_v54, %v993_v13  ;;  %v3645_v33 = vmul.f32 %v6833_v5, %v6635_v6 }
 0x1a7   : > { %v3743_v41 = vmul.f32 %v6848_v63, %v6935_v62  ;;  %v9895_v30 = vrot.slane %v6793_v19, 5  ;;  %v6966_v15 = vmul.f32 %v6829_v36, %v9862_v1  ;;  %v6970_v13 = vmul.f32 %v6764_v9, %v6416_v8 }
 0x1a8   : > { %v3790_v16 = vadd.f32 %v3742_v26, %v3692_v51  ;;  %v3321_v4 = vadd.f32 %v3273_v42, %v3223_v40  ;;  %v3483_v29 = vsel %vm1117_vm3, %v3481_v11, %v9528_v24  ;;  %v9896_v19 = vrot.slane %v6804_v48, 6 }
 0x1a9   : > { %v1384_v18 = vsel %vm1360_vm6, %v9895_v30, %v9525_v44  ;;  %v9897_v26 = vrot.slane %v6824_v52, 7  ;;  %v2078_v54 = vmul.f32 %v6860_v7, %v6142_v56  ;;  %v9532_v11 = vrot.slane %v6949_v27, 1 }
 0x1aa   : > { %v1479_v60 = vadd.f32 %v1384_v18, %v1268_v49  ;;  %v1641_v17 = vsel %vm1603_vm7, %v9896_v19, %v9527_v55  ;;  %3840 = vst.msk [vmem:[%s5061_s27 + $0x6d] sm:$0x7] %vm3821_vm9, %v3790_v16  ;;  %v3595_v51 = vadd.f32 %v3483_v29, %v3321_v4  ;;  %v9531_v49 = vrot.slane %v6953_v20, 2  ;;  %v6998_v18 = vld [vmem:[#allocation2 + $0xe8] sm:$0x3f] }
 0x1ab   : > { %v1915_v42 = vsel %vm744_vm2, %v9897_v26, %v9526_v32  ;;  %v9529_v48 = vrot.slane %v6966_v15, 3  ;;  %v6994_v30 = vmul.f32 %v6900_v53, %v6519_v22  ;;  %v475_v52 = vmul.f32 %v6561_v34, %v6440_v28  ;;  %9898 = vst [vmem:[#allocation22_spill] sm:$0xff] %v6998_v18  ;;  %v7010_v32 = vld [vmem:[#allocation2 + $0x140] sm:$0xff] }
 0x1ac   : > { %v1754_v40 = vadd.f32 %v1641_v17, %v1479_v60  ;;  %v671_v16 = vmul.f32 %v6998_v18, %v6570_v39  ;;  %v3693_v4 = vadd.f32 %v3645_v33, %v3595_v51  ;;  %v3274_v19 = vmul.f32 %v6896_v38, %v6416_v8  ;;  %9899 = vst [vmem:[#allocation26_spill] sm:$0xff] %v7010_v32 }
 0x1ad   : > { %v523_v17 = vadd.f32 %v6581_v25, %v475_v52  ;;  %v573_v26 = vmul.f32 %v6691_v61, %v6584_v3  ;;  %v1530_v28 = vmul.f32 %v6713_v23, %v9862_v1  ;;  %v9901_v52 = vrot.slane %v6819_v2, 2 }
 0x1ae   : > { %v2028_v60 = vadd.f32 %v1915_v42, %v1754_v40  ;;  %v783_v44 = vrot.slane %v671_v16, 7  ;;  %v3791_v55 = vadd.f32 %v3743_v41, %v3693_v4  ;;  %v9900_v42 = vrot.slane %v6808_v50, 1 }
 0x1af   : > { %v1805_v40 = vmul.f32 %v6738_v46, %v9862_v1  ;;  %v2564_v16 = vsel %vm2524_vm4, %v9901_v52, %v9531_v49  ;;  %v9530_v24 = vrot.slane %v6994_v30, 1  ;;  %v621_v29 = vadd.f32 %v573_v26, %v523_v17  ;;  %v7046_v52 = vld [vmem:[#allocation2 + $0xf0] sm:$0xff] }
 0x1b0   : > { %v2126_v33 = vadd.f32 %v2078_v54, %v2028_v60  ;;  %v2289_v51 = vsel %vm1117_vm3, %v9900_v42, %v9532_v11  ;;  %v9902_v41 = vrot.slane %v6887_v14, 7  ;;  %3841 = vst.msk [vmem:[%s5061_s27 + $0x6d] sm:$0xf8] %vm3818_vm8, %v3791_v55  ;;  %v9903_v4 = vrot.slane %v6844_v59, 3  ;;  %v9914_v11 = vld [vmem:[#allocation14_spill] sm:$0xff] }
 0x1b1   : > { %v9904_v2 = vrot.slane %v6970_v13, 7  ;;  %v3646_v17 = vmul.f32 %v6833_v5, %v6702_v45  ;;  %v3744_v14 = vmul.f32 %v6848_v63, %v7010_v32  ;;  %v946_v55 = vmul.f32 %v6998_v18, %v6615_v0  ;;  %9905 = vst [vmem:[#allocation27_spill] sm:$0xff] %v7046_v52 }
 0x1b2   : > { %v784_v54 = vsel %vm744_vm2, %v9902_v41, %v783_v44  ;;  %v2400_v50 = vadd.f32 %v2289_v51, %v2126_v33  ;;  %v2839_v60 = vsel %vm2799_vm5, %v9903_v4, %v9529_v48  ;;  %v1642_v26 = vrot.slane %v1530_v28, 6  ;;  %v9908_v4 = vld [vmem:[#allocation20_spill] sm:$0xff] }
 0x1b3   : > { %v3111_v42 = vsel %vm744_vm2, %v3109_v21, %v9904_v2  ;;  %v896_v44 = vadd.f32 %v784_v54, %v621_v29  ;;  %v1916_v51 = vrot.slane %v1805_v40, 7  ;;  %v476_v59 = vmul.f32 %v6561_v34, %v6267_v43  ;;  %v9907_v40 = vld [vmem:[#allocation24_spill] sm:$0xff] }
 0x1b4   : > { %v2675_v33 = vadd.f32 %v2564_v16, %v2400_v50  ;;  %v7050_v21 = vmul.f32 %v7046_v52, %v6570_v39  ;;  %v9906_v41 = vrot.slane %v6911_v57, 1  ;;  %v2079_v28 = vmul.f32 %v6860_v7, %v9862_v1 }
 0x1b5   : > { %v994_v54 = vadd.f32 %v946_v55, %v896_v44  ;;  %v1045_v16 = vmul.f32 %v7046_v52, %v9907_v40  ;;  %v524_v50 = vadd.f32 %v6581_v25, %v476_v59  ;;  %v574_v2 = vmul.f32 %v9908_v4, %v6584_v3 }
 0x1b6   : > { %v3485_v29 = vsel %vm1117_vm3, %v9906_v41, %v9530_v24  ;;  %v2950_v43 = vadd.f32 %v2839_v60, %v2675_v33  ;;  %v7066_v48 = vmul.f32 %v9907_v40, %v6142_v56  ;;  %v9909_v57 = vrot.slane %v6894_v58, 1 }
 0x1b7   : > { %v9910_v44 = vrot.slane %v6921_v35, 6  ;;  %v3001_v24 = vmul.f32 %v6764_v9, %v6519_v22  ;;  %v7077_v60 = vmul.f32 %v6896_v38, %v6519_v22  ;;  %v9911_v59 = vrot.slane %v6925_v31, 7 }
 0x1b8   : > { %v1269_v41 = vadd.f32 %v9909_v57, %v994_v54  ;;  %v3224_v33 = vadd.f32 %v3111_v42, %v2950_v43  ;;  %v622_v49 = vadd.f32 %v574_v2, %v524_v50  ;;  %v9536_v58 = vrot.slane %v7050_v21, 7 }
 0x1b9   : > { %v1643_v55 = vsel %vm1603_vm7, %v9910_v44, %v1642_v26  ;;  %v1917_v56 = vsel %vm744_vm2, %v9911_v59, %v1916_v51  ;;  %v9912_v54 = vrot.slane %v6907_v12, 5  ;;  %v1158_v57 = vrot.slane %v1045_v16, 1  ;;  %v9913_v44 = vld [vmem:[#allocation18_spill] sm:$0xff] }
 0x1ba   : > { %v9535_v26 = vrot.slane %v7066_v48, 1  ;;  %v7088_v4 = vmul.f32 %v9914_v11, %v9913_v44  ;;  %v3322_v32 = vadd.f32 %v3274_v19, %v3224_v33  ;;  %v897_v42 = vadd.f32 %v9536_v58, %v622_v49 }
 0x1bb   : > { %v1480_v35 = vadd.f32 %v9912_v54, %v1269_v41  ;;  %v947_v31 = vmul.f32 %v7046_v52, %v6615_v0  ;;  %v7096_v51 = vmul.f32 %v6713_v23, %v9913_v44  ;;  %v2178_v16 = vmul.f32 %v6798_v37, %v9913_v44 }
 0x1bc   : > { %v7102_v43 = vmul.f32 %v6798_v37, %v6416_v8  ;;  %v2452_v19 = vmul.f32 %v6813_v10, %v9913_v44  ;;  %v3596_v50 = vadd.f32 %v3485_v29, %v3322_v32  ;;  %v3112_v49 = vrot.slane %v3001_v24, 7 }
 0x1bd   : > { %v1755_v12 = vadd.f32 %v1643_v55, %v1480_v35  ;;  %v995_v2 = vadd.f32 %v947_v31, %v897_v42  ;;  %v7108_v41 = vmul.f32 %v6813_v10, %v6416_v8  ;;  %v1160_v55 = vsel %vm1117_vm3, %v1158_v57, %v9535_v26  ;;  %v7118_v35 = vld [vmem:[#allocation2 + $0x148] sm:$0x3f] }
 0x1be   : > { %v9540_v59 = vrot.slane %v7088_v4, 5  ;;  %v7116_v54 = vmul.f32 %v6738_v46, %v9913_v44  ;;  %v3694_v32 = vadd.f32 %v3646_v17, %v3596_v50  ;;  %v9539_v29 = vrot.slane %v7096_v51, 6 }
 0x1bf   : > { %v2029_v33 = vadd.f32 %v1917_v56, %v1755_v12  ;;  %v1270_v24 = vadd.f32 %v1160_v55, %v995_v2  ;;  %v2727_v56 = vmul.f32 %v6829_v36, %v9913_v44  ;;  %v2290_v31 = vrot.slane %v2178_v16, 1  ;;  %v9917_v16 = vld [vmem:[#allocation15_spill] sm:$0xff] }
 0x1c0   : > { %v9542_v57 = vrot.slane %v7102_v43, 1  ;;  %v2565_v12 = vrot.slane %v2452_v19, 2  ;;  %v3792_v26 = vadd.f32 %v3744_v14, %v3694_v32  ;;  %v9541_v52 = vrot.slane %v7108_v41, 2 }
 0x1c1   : > { %v2127_v42 = vadd.f32 %v2079_v28, %v2029_v33  ;;  %v1481_v58 = vadd.f32 %v9540_v59, %v1270_v24  ;;  %v7129_v17 = vmul.f32 %v6829_v36, %v6416_v8  ;;  %v9915_v50 = vrot.slane %v6949_v27, 1  ;;  %v7164_v59 = vld [vmem:[#allocation2 + $0xf8] sm:$0xff] }
 0x1c2   : > { %v9916_v55 = vrot.slane %v6970_v13, 7  ;;  %v3647_v19 = vmul.f32 %v6833_v5, %v9917_v16  ;;  %v3745_v14 = vmul.f32 %v6848_v63, %v7118_v35  ;;  %3842 = vst.msk [vmem:[%s5061_s27 + $0x75] sm:$0xff] %vm246_vm0, %v3792_v26  ;;  %v9543_v32 = vrot.slane %v7116_v54, 7 }
 0x1c3   : > { %v2401_v2 = vadd.f32 %v9915_v50, %v2127_v42  ;;  %v1756_v33 = vadd.f32 %v9539_v29, %v1481_v58  ;;  %v2080_v27 = vmul.f32 %v6860_v7, %v9913_v44  ;;  %v7149_v13 = vmul.f32 %v6764_v9, %v6635_v6  ;;  %v9919_v50 = vld [vmem:[#allocation19_spill] sm:$0xff]  ;;  %9920 = vst [vmem:[#allocation17_spill] sm:$0xff] %v7164_v59 }
 0x1c4   : > { %v3113_v28 = vsel %vm744_vm2, %v9916_v55, %v3112_v49  ;;  %v9918_v49 = vrot.slane %v6953_v20, 2  ;;  %v2292_v42 = vsel %vm1117_vm3, %v2290_v31, %v9542_v57  ;;  %v2840_v26 = vrot.slane %v2727_v56, 3 }
 0x1c5   : > { %v477_v58 = vmul.f32 %v9919_v50, %v6561_v34  ;;  %v2030_v55 = vadd.f32 %v9543_v32, %v1756_v33  ;;  %v2567_v44 = vsel %vm2524_vm4, %v2565_v12, %v9541_v52  ;;  %v7168_v20 = vmul.f32 %v7164_v59, %v6570_v39  ;;  %v7218_v32 = vld [vmem:[#allocation2 + $0x150] sm:$0xff] }
 0x1c6   : > { %v2676_v24 = vadd.f32 %v9918_v49, %v2401_v2  ;;  %v9921_v56 = vrot.slane %v6966_v15, 3  ;;  %v575_v33 = vmul.f32 %v6883_v47, %v6584_v3  ;;  %v7177_v49 = vmul.f32 %v9907_v40, %v9862_v1 }
 0x1c7   : > { %v525_v2 = vadd.f32 %v6581_v25, %v477_v58  ;;  %v2128_v12 = vadd.f32 %v2080_v27, %v2030_v55  ;;  %v9544_v52 = vrot.slane %v7168_v20, 7  ;;  %v7183_v57 = vmul.f32 %v9914_v11, %v6416_v8 }
 0x1c8   : > { %v2951_v31 = vadd.f32 %v9921_v56, %v2676_v24  ;;  %v3374_v24 = vmul.f32 %v6900_v53, %v6635_v6  ;;  %v7189_v58 = vmul.f32 %v6900_v53, %v6702_v45  ;;  %v9922_v27 = vrot.slane %v7050_v21, 7 }
 0x1c9   : > { %v623_v56 = vadd.f32 %v575_v33, %v525_v2  ;;  %v2402_v1 = vadd.f32 %v2292_v42, %v2128_v12  ;;  %v948_v29 = vmul.f32 %v7164_v59, %v6615_v0  ;;  %v7206_v42 = vmul.f32 %v6738_v46, %v6416_v8 }
 0x1ca   : > { %v3225_v15 = vadd.f32 %v3113_v28, %v2951_v31  ;;  %v787_v55 = vsel %vm744_vm2, %v9922_v27, %v9544_v52  ;;  %v7199_v28 = vmul.f32 %v6713_v23, %v6416_v8  ;;  %v9923_v21 = vrot.slane %v7129_v17, 3 }
 0x1cb   : > { %v898_v50 = vadd.f32 %v787_v55, %v623_v56  ;;  %v2677_v2 = vadd.f32 %v2567_v44, %v2402_v1  ;;  %v3276_v12 = vmul.f32 %v6896_v38, %v6635_v6  ;;  %v3486_v56 = vrot.slane %v3374_v24, 1 }
 0x1cc   : > { %v3323_v31 = vadd.f32 %v7077_v60, %v3225_v15  ;;  %v2842_v33 = vsel %vm2799_vm5, %v2840_v26, %v9923_v21  ;;  %v9924_v60 = vrot.slane %v6994_v30, 1  ;;  %v3648_v55 = vmul.f32 %v6833_v5, %v6935_v62 }
 0x1cd   : > { %v996_v52 = vadd.f32 %v948_v29, %v898_v50  ;;  %v2952_v44 = vadd.f32 %v2842_v33, %v2677_v2  ;;  %v3487_v1 = vrot.slane %v7189_v58, 1  ;;  %v9925_v26 = vrot.slane %v7177_v49, 1 }
 0x1ce   : > { %v3597_v15 = vadd.f32 %v9924_v60, %v3323_v31  ;;  %v9926_v21 = vrot.slane %v7066_v48, 1  ;;  %v9548_v27 = vrot.slane %v7199_v28, 6  ;;  %v9547_v31 = vrot.slane %v7206_v42, 7 }
 0x1cf   : > { %v7230_v29 = vmul.f32 %v6798_v37, %v6519_v22  ;;  %v9927_v50 = vrot.slane %v7149_v13, 7  ;;  %v9928_v2 = vrot.slane %v7183_v57, 5  ;;  %v9929_v48 = vrot.slane %v7088_v4, 5 }
 0x1d0   : > { %v1162_v59 = vsel %vm1117_vm3, %v9926_v21, %v9925_v26  ;;  %v3695_v30 = vadd.f32 %v3647_v19, %v3597_v15  ;;  %v7241_v19 = vmul.f32 %v6813_v10, %v6519_v22  ;;  %v3746_v60 = vmul.f32 %v6848_v63, %v7218_v32 }
 0x1d1   : > { %v1271_v24 = vadd.f32 %v1162_v59, %v996_v52  ;;  %v3226_v58 = vadd.f32 %v9927_v50, %v2952_v44  ;;  %v1387_v33 = vsel %vm1360_vm6, %v9929_v48, %v9928_v2  ;;  %v7245_v52 = vmul.f32 %v6829_v36, %v6519_v22 }
 0x1d2   : > { %v3793_v59 = vadd.f32 %v3745_v14, %v3695_v30  ;;  %v7251_v44 = vmul.f32 %v6764_v9, %v6702_v45  ;;  %v3488_v26 = vsel %vm1117_vm3, %v3486_v56, %v3487_v1  ;;  %v9930_v21 = vrot.slane %v7096_v51, 6 }
 0x1d3   : > { %v1482_v15 = vadd.f32 %v1387_v33, %v1271_v24  ;;  %v3324_v4 = vadd.f32 %v3276_v12, %v3226_v58  ;;  %v2081_v14 = vmul.f32 %v6860_v7, %v6416_v8  ;;  %v9931_v24 = vrot.slane %v7116_v54, 7 }
 0x1d4   : > { %v1646_v50 = vsel %vm1603_vm7, %v9930_v21, %v9548_v27  ;;  %3843 = vst.msk [vmem:[%s5061_s27 + $0x7d] sm:$0x7] %vm3821_vm9, %v3793_v59  ;;  %v9550_v56 = vrot.slane %v7230_v29, 1  ;;  %v7271_v58 = vmul.f32 %v6900_v53, %v9917_v16  ;;  %v9552_v2 = vrot.slane %v7241_v19, 2  ;;  %v7280_v21 = vld [vmem:[#allocation2 + $0x100] sm:$0x3f] }
 0x1d5   : > { %v1757_v30 = vadd.f32 %v1646_v50, %v1482_v15  ;;  %v1920_v12 = vsel %vm744_vm2, %v9931_v24, %v9547_v31  ;;  %v3598_v51 = vadd.f32 %v3488_v26, %v3324_v4  ;;  %v478_v33 = vmul.f32 %v6691_v61, %v6561_v34  ;;  %9932 = vst [vmem:[#allocation12_spill] sm:$0xff] %v7280_v21 }
 0x1d6   : > { %v3277_v54 = vmul.f32 %v6896_v38, %v6702_v45  ;;  %v674_v50 = vmul.f32 %v7280_v21, %v6570_v39  ;;  %v576_v26 = vmul.f32 %v6998_v18, %v6584_v3  ;;  %v1533_v61 = vmul.f32 %v6713_v23, %v6519_v22 }
 0x1d7   : > { %v2031_v59 = vadd.f32 %v1920_v12, %v1757_v30  ;;  %v3696_v24 = vadd.f32 %v3648_v55, %v3598_v51  ;;  %v526_v4 = vadd.f32 %v6581_v25, %v478_v33  ;;  %v9933_v12 = vrot.slane %v7102_v43, 1  ;;  %v7295_v55 = vld [vmem:[#allocation2 + $0x158] sm:$0xff] }
 0x1d8   : > { %v9551_v27 = vrot.slane %v7271_v58, 1  ;;  %v788_v15 = vrot.slane %v674_v50, 7  ;;  %v9934_v33 = vrot.slane %v7108_v41, 2  ;;  %v9935_v43 = vrot.slane %v7245_v52, 3 }
 0x1d9   : > { %v2129_v30 = vadd.f32 %v2081_v14, %v2031_v59  ;;  %v2294_v31 = vsel %vm1117_vm3, %v9933_v12, %v9550_v56  ;;  %v3794_v51 = vadd.f32 %v3746_v60, %v3696_v24  ;;  %v624_v18 = vadd.f32 %v576_v26, %v526_v4  ;;  %v9940_v26 = vld [vmem:[#allocation26_spill] sm:$0xff] }
 0x1da   : > { %v2569_v48 = vsel %vm2524_vm4, %v9934_v33, %v9552_v2  ;;  %v1808_v14 = vmul.f32 %v6738_v46, %v6519_v22  ;;  %v9936_v12 = vrot.slane %v7129_v17, 3  ;;  %v9937_v56 = vrot.slane %v7251_v44, 7 }
 0x1db   : > { %v2403_v59 = vadd.f32 %v2294_v31, %v2129_v30  ;;  %v9938_v60 = vrot.slane %v7149_v13, 7  ;;  %v9939_v41 = vrot.slane %v7168_v20, 7  ;;  %3844 = vst.msk [vmem:[%s5061_s27 + $0x7d] sm:$0xf8] %vm3818_vm8, %v3794_v51  ;;  %v3649_v31 = vmul.f32 %v6833_v5, %v9940_v26 }
 0x1dc   : > { %v2844_v50 = vsel %vm2799_vm5, %v9936_v12, %v9935_v43  ;;  %v949_v17 = vmul.f32 %v7280_v21, %v6615_v0  ;;  %v1647_v33 = vrot.slane %v1533_v61, 6  ;;  %v3490_v13 = vsel %vm1117_vm3, %v3487_v1, %v9551_v27 }
 0x1dd   : > { %v3116_v24 = vsel %vm744_vm2, %v9938_v60, %v9937_v56  ;;  %v789_v4 = vsel %vm744_vm2, %v9939_v41, %v788_v15  ;;  %v2678_v43 = vadd.f32 %v2569_v48, %v2403_v59  ;;  %v3747_v20 = vmul.f32 %v6848_v63, %v7295_v55  ;;  %v9941_v56 = vld [vmem:[#allocation20_spill] sm:$0xff]  ;;  %v9942_v60 = vld [vmem:[#allocation27_spill] sm:$0xff] }
 0x1de   : > { %v899_v30 = vadd.f32 %v789_v4, %v624_v18  ;;  %v479_v15 = vmul.f32 %v9941_v56, %v6561_v34  ;;  %v1921_v12 = vrot.slane %v1808_v14, 7  ;;  %v577_v18 = vmul.f32 %v9942_v60, %v6584_v3  ;;  %v7332_v41 = vld [vmem:[#allocation2 + $0x108] sm:$0xff] }
 0x1df   : > { %v7336_v48 = vmul.f32 %v7332_v41, %v6570_v39  ;;  %v2953_v61 = vadd.f32 %v2844_v50, %v2678_v43  ;;  %v1048_v59 = vmul.f32 %v7332_v41, %v9907_v40  ;;  %v7343_v4 = vmul.f32 %v9907_v40, %v6416_v8 }
 0x1e0   : > { %v997_v51 = vadd.f32 %v949_v17, %v899_v30  ;;  %v527_v1 = vadd.f32 %v6581_v25, %v479_v15  ;;  %v9943_v14 = vrot.slane %v7177_v49, 1  ;;  %v9944_v17 = vrot.slane %v7199_v28, 6 }
 0x1e1   : > { %v2082_v27 = vmul.f32 %v6860_v7, %v6519_v22  ;;  %v3004_v50 = vmul.f32 %v6764_v9, %v9917_v16  ;;  %v3227_v43 = vadd.f32 %v3116_v24, %v2953_v61  ;;  %v9553_v2 = vrot.slane %v7336_v48, 7 }
 0x1e2   : > { %v1272_v30 = vadd.f32 %v9943_v14, %v997_v51  ;;  %v1648_v56 = vsel %vm1603_vm7, %v9944_v17, %v1647_v33  ;;  %v625_v15 = vadd.f32 %v577_v18, %v527_v1  ;;  %v7357_v8 = vmul.f32 %v9914_v11, %v6635_v6 }
 0x1e3   : > { %v9945_v49 = vrot.slane %v7183_v57, 5  ;;  %v1163_v28 = vrot.slane %v1048_v59, 1  ;;  %v9554_v33 = vrot.slane %v7343_v4, 1  ;;  %v7364_v14 = vmul.f32 %v6713_v23, %v6635_v6 }
 0x1e4   : > { %v3325_v17 = vadd.f32 %v3277_v54, %v3227_v43  ;;  %v9946_v24 = vrot.slane %v7206_v42, 7  ;;  %v900_v61 = vadd.f32 %v9553_v2, %v625_v15  ;;  %v950_v1 = vmul.f32 %v7332_v41, %v6615_v0 }
 0x1e5   : > { %v1483_v51 = vadd.f32 %v9945_v49, %v1272_v30  ;;  %v3117_v30 = vrot.slane %v3004_v50, 7  ;;  %v2181_v59 = vmul.f32 %v6798_v37, %v6635_v6  ;;  %v7377_v49 = vmul.f32 %v6798_v37, %v6702_v45 }
 0x1e6   : > { %v1922_v18 = vsel %vm744_vm2, %v9946_v24, %v1921_v12  ;;  %v3599_v54 = vadd.f32 %v3490_v13, %v3325_v17  ;;  %v998_v43 = vadd.f32 %v950_v1, %v900_v61  ;;  %v2455_v42 = vmul.f32 %v6813_v10, %v6635_v6  ;;  %v7390_v24 = vld [vmem:[#allocation2 + $0x160] sm:$0x3f] }
 0x1e7   : > { %v1758_v57 = vadd.f32 %v1648_v56, %v1483_v51  ;;  %v7383_v12 = vmul.f32 %v6813_v10, %v6702_v45  ;;  %v1165_v56 = vsel %vm1117_vm3, %v1163_v28, %v9554_v33  ;;  %v9555_v50 = vrot.slane %v7357_v8, 5 }
 0x1e8   : > { %v3697_v13 = vadd.f32 %v3649_v31, %v3599_v54  ;;  %v1273_v17 = vadd.f32 %v1165_v56, %v998_v43  ;;  %v7394_v61 = vmul.f32 %v6738_v46, %v6635_v6  ;;  %v2295_v1 = vrot.slane %v2181_v59, 1 }
 0x1e9   : > { %v2032_v15 = vadd.f32 %v1922_v18, %v1758_v57  ;;  %v9556_v18 = vrot.slane %v7377_v49, 1  ;;  %v2570_v57 = vrot.slane %v2455_v42, 2  ;;  %v2730_v28 = vmul.f32 %v6829_v36, %v6635_v6 }
 0x1ea   : > { %v3795_v33 = vadd.f32 %v3747_v20, %v3697_v13  ;;  %v1484_v51 = vadd.f32 %v9555_v50, %v1273_v17  ;;  %v7404_v54 = vmul.f32 %v6829_v36, %v6702_v45  ;;  %v9947_v43 = vrot.slane %v7230_v29, 1 }
 0x1eb   : > { %v2130_v2 = vadd.f32 %v2082_v27, %v2032_v15  ;;  %v3278_v27 = vmul.f32 %v6896_v38, %v9917_v16  ;;  %v3650_v42 = vmul.f32 %v6833_v5, %v7118_v35  ;;  %v3748_v20 = vmul.f32 %v6848_v63, %v7390_v24 }
 0x1ec   : > { %3845 = vst.msk [vmem:[%s5061_s27 + $0x85] sm:$0xff] %vm246_vm0, %v3795_v33  ;;  %v9948_v15 = vrot.slane %v7251_v44, 7  ;;  %v9949_v13 = vrot.slane %v7364_v14, 6  ;;  %v1923_v29 = vrot.slane %v7394_v61, 7  ;;  %v2297_v31 = vsel %vm1117_vm3, %v2295_v1, %v9556_v18 }
 0x1ed   : > { %v2404_v59 = vadd.f32 %v9947_v43, %v2130_v2  ;;  %v2083_v2 = vmul.f32 %v6860_v7, %v6635_v6  ;;  %v9950_v43 = vrot.slane %v7241_v19, 2  ;;  %v2845_v33 = vrot.slane %v2730_v28, 3  ;;  %v7443_v28 = vld [vmem:[#allocation2 + $0x110] sm:$0xff] }
 0x1ee   : > { %v3118_v56 = vsel %vm744_vm2, %v9948_v15, %v3117_v30  ;;  %v1759_v17 = vadd.f32 %v9949_v13, %v1484_v51  ;;  %v7431_v44 = vmul.f32 %v6764_v9, %v6935_v62  ;;  %v9951_v51 = vrot.slane %v7383_v12, 2  ;;  %9953 = vst [vmem:[#allocation13_spill] sm:$0xff] %v7443_v28 }
 0x1ef   : > { %v2679_v50 = vadd.f32 %v9950_v43, %v2404_v59  ;;  %v9563_v15 = vrot.slane %v7404_v54, 3  ;;  %v480_v6 = vmul.f32 %v6883_v47, %v6561_v34  ;;  %v9952_v19 = vrot.slane %v7245_v52, 3  ;;  %v9954_v52 = vld [vmem:[#allocation17_spill] sm:$0xff] }
 0x1f0   : > { %v2033_v30 = vadd.f32 %v1923_v29, %v1759_v17  ;;  %v2572_v61 = vsel %vm2524_vm4, %v2570_v57, %v9951_v51  ;;  %v3279_v1 = vmul.f32 %v6896_v38, %v6935_v62  ;;  %v7447_v13 = vmul.f32 %v7443_v28, %v6570_v39 }
 0x1f1   : > { %v2954_v59 = vadd.f32 %v9952_v19, %v2679_v50  ;;  %v7451_v57 = vmul.f32 %v9907_v40, %v6519_v22  ;;  %v3377_v34 = vmul.f32 %v6900_v53, %v6935_v62  ;;  %v528_v47 = vadd.f32 %v6581_v25, %v480_v6 }
 0x1f2   : > { %v2131_v17 = vadd.f32 %v2083_v2, %v2033_v30  ;;  %v578_v50 = vmul.f32 %v9954_v52, %v6584_v3  ;;  %v9557_v19 = vrot.slane %v7447_v13, 7  ;;  %v7462_v39 = vmul.f32 %v9914_v11, %v6702_v45 }
 0x1f3   : > { %v3228_v43 = vadd.f32 %v3118_v56, %v2954_v59  ;;  %v7466_v2 = vmul.f32 %v6900_v53, %v9940_v26  ;;  %v7470_v25 = vmul.f32 %v6713_v23, %v6702_v45  ;;  %v9955_v56 = vrot.slane %v7336_v48, 7 }
 0x1f4   : > { %v2405_v22 = vadd.f32 %v2297_v31, %v2131_v17  ;;  %v626_v30 = vadd.f32 %v578_v50, %v528_v47  ;;  %v7480_v31 = vmul.f32 %v6738_v46, %v6702_v45  ;;  %v3651_v47 = vmul.f32 %v6833_v5, %v7218_v32 }
 0x1f5   : > { %v3326_v3 = vadd.f32 %v3278_v27, %v3228_v43  ;;  %v792_v6 = vsel %vm744_vm2, %v9955_v56, %v9557_v19  ;;  %v951_v27 = vmul.f32 %v7443_v28, %v6615_v0  ;;  %v7486_v43 = vld [vmem:[#allocation2 + $0x168] sm:$0xff]  ;;  %v9957_v48 = vrot.slane %v7271_v58, 1 }
 0x1f6   : > { %v2680_v17 = vadd.f32 %v2572_v61, %v2405_v22  ;;  %v901_v50 = vadd.f32 %v792_v6, %v626_v30  ;;  %9956 = vst [vmem:[#allocation28_spill] sm:$0xff] %v7486_v43  ;;  %v2847_v56 = vsel %vm2799_vm5, %v2845_v33, %v9563_v15  ;;  %v3491_v19 = vrot.slane %v3377_v34, 1  ;;  %v7578_v15 = vld [vmem:[#allocation2 + $0x170] sm:$0xff] }
 0x1f7   : > { %v3600_v18 = vadd.f32 %v9957_v48, %v3326_v3  ;;  %v9561_v51 = vrot.slane %v7462_v39, 5  ;;  %v3492_v22 = vrot.slane %v7466_v2, 1  ;;  %v9562_v30 = vrot.slane %v7470_v25, 6 }
 0x1f8   : > { %v2955_v61 = vadd.f32 %v2847_v56, %v2680_v17  ;;  %v999_v59 = vadd.f32 %v951_v27, %v901_v50  ;;  %v9958_v0 = vrot.slane %v7451_v57, 1  ;;  %v9959_v28 = vrot.slane %v7343_v4, 1 }
 0x1f9   : > { %v3698_v6 = vadd.f32 %v3650_v42, %v3600_v18  ;;  %v9560_v3 = vrot.slane %v7480_v31, 7  ;;  %v7504_v33 = vmul.f32 %v6798_v37, %v9917_v16  ;;  %v9960_v34 = vrot.slane %v7431_v44, 7 }
 0x1fa   : > { %v1167_v58 = vsel %vm1117_vm3, %v9959_v28, %v9958_v0  ;;  %v3749_v17 = vmul.f32 %v6848_v63, %v7486_v43  ;;  %v7512_v42 = vmul.f32 %v6813_v10, %v9917_v16  ;;  %v9961_v28 = vrot.slane %v7357_v8, 5 }
 0x1fb   : > { %v3229_v2 = vadd.f32 %v9960_v34, %v2955_v61  ;;  %v1274_v18 = vadd.f32 %v1167_v58, %v999_v59  ;;  %v3796_v4 = vadd.f32 %v3748_v20, %v3698_v6  ;;  %v7521_v27 = vmul.f32 %v6829_v36, %v9917_v16 }
 0x1fc   : > { %v1390_v50 = vsel %vm1360_vm6, %v9961_v28, %v9561_v51  ;;  %v7525_v48 = vmul.f32 %v6764_v9, %v9940_v26  ;;  %v3493_v56 = vsel %vm1117_vm3, %v3491_v19, %v3492_v22  ;;  %v9962_v20 = vrot.slane %v7364_v14, 6  ;;  %v7566_v51 = vld [vmem:[#allocation3 + $0x1] ss:$0 sm:$0xff] }
 0x1fd   : > { %v3327_v59 = vadd.f32 %v3279_v1, %v3229_v2  ;;  %v1485_v61 = vadd.f32 %v1390_v50, %v1274_v18  ;;  %3846 = vst.msk [vmem:[%s5061_s27 + $0x8d] sm:$0x7] %vm3821_vm9, %v3796_v4  ;;  %v1925_v6 = vsel %vm744_vm2, %v1923_v29, %v9560_v3  ;;  %v2084_v0 = vmul.f32 %v6860_v7, %v6702_v45  ;;  %v7546_v2 = vld [vmem:[#allocation3] ss:$0 sm:$0xff]  ;;  %v9963_v18 = vld [vmem:[#allocation22_spill] sm:$0xff] }
 0x1fe   : > { %v1651_v8 = vsel %vm1603_vm7, %v9962_v20, %v9562_v30  ;;  %v9569_v1 = vrot.slane %v7504_v33, 1  ;;  %v7543_v19 = vmul.f32 %v6900_v53, %v7118_v35  ;;  %v9570_v14 = vrot.slane %v7512_v42, 2  ;;  %v7554_v20 = vld [vmem:[#allocation3 + $0x2] ss:$0 sm:$0xff]  ;;  %v7556_v3 = vld [vmem:[#allocation2 + $0x118] sm:$0x3f] }
 0x1ff   : > { %v3601_v58 = vadd.f32 %v3493_v56, %v3327_v59  ;;  %v1760_v34 = vadd.f32 %v1651_v8, %v1485_v61  ;;  %v481_v4 = vmul.f32 %v7546_v2, %v9963_v18  ;;  %v3280_v50 = vmul.f32 %v6896_v38, %v9940_v26  ;;  %9964 = vst [vmem:[#allocation23_spill] sm:$0xff] %v7556_v3  ;;  %v7563_v8 = vld [vmem:[%s9376_s1] ss:$0 sm:$0xff] }
 0x200   : > { %v677_v59 = vmul.f32 %v7556_v3, %v7554_v20  ;;  %v579_v30 = vmul.f32 %v7566_v51, %v7280_v21  ;;  %v9965_v28 = vrot.slane %v7377_v49, 1  ;;  %v9966_v21 = vrot.slane %v7383_v12, 2 }
 0x201   : > { %v3699_v56 = vadd.f32 %v3651_v47, %v3601_v58  ;;  %v2034_v61 = vadd.f32 %v1925_v6, %v1760_v34  ;;  %v529_v18 = vadd.f32 %v7563_v8, %v481_v4  ;;  %v1536_v34 = vmul.f32 %v6713_v23, %v9917_v16 }
 0x202   : > { %v2299_v47 = vsel %vm1117_vm3, %v9965_v28, %v9569_v1  ;;  %v793_v58 = vrot.slane %v677_v59, 7  ;;  %v2574_v43 = vsel %vm2524_vm4, %v9966_v21, %v9570_v14  ;;  %v9967_v49 = vrot.slane %v7521_v27, 3 }
 0x203   : > { %v3797_v4 = vadd.f32 %v3749_v17, %v3699_v56  ;;  %v2132_v29 = vadd.f32 %v2084_v0, %v2034_v61  ;;  %v627_v53 = vadd.f32 %v579_v30, %v529_v18  ;;  %v9968_v28 = vrot.slane %v7404_v54, 3  ;;  %v7602_v54 = vld [vmem:[#allocation3 + $0x3] ss:$0 sm:$0xff] }
 0x204   : > { %v9969_v1 = vrot.slane %v7525_v48, 7  ;;  %v9970_v6 = vrot.slane %v7431_v44, 7  ;;  %v3652_v0 = vmul.f32 %v6833_v5, %v7295_v55  ;;  %v9971_v12 = vrot.slane %v7447_v13, 7 }
 0x205   : > { %v2849_v59 = vsel %vm2799_vm5, %v9968_v28, %v9967_v49  ;;  %3847 = vst.msk [vmem:[%s5061_s27 + $0x8d] sm:$0xf8] %vm3818_vm8, %v3797_v4  ;;  %v2406_v30 = vadd.f32 %v2299_v47, %v2132_v29  ;;  %v952_v61 = vmul.f32 %v7602_v54, %v7556_v3  ;;  %v1811_v44 = vmul.f32 %v6738_v46, %v9917_v16  ;;  %v7617_v4 = vld [vmem:[#allocation2 + $0x120] sm:$0xff] }
 0x206   : > { %v3121_v17 = vsel %vm744_vm2, %v9970_v6, %v9969_v1  ;;  %v794_v21 = vsel %vm744_vm2, %v9971_v12, %v793_v58  ;;  %v9972_v1 = vrot.slane %v7543_v19, 1  ;;  %v3750_v13 = vmul.f32 %v6848_v63, %v7578_v15  ;;  %9973 = vst [vmem:[#allocation25_spill] sm:$0xff] %v7617_v4 }
 0x207   : > { %v902_v56 = vadd.f32 %v794_v21, %v627_v53  ;;  %v1652_v6 = vrot.slane %v1536_v34, 6  ;;  %v482_v29 = vmul.f32 %v7546_v2, %v9942_v60  ;;  %v2681_v53 = vadd.f32 %v2574_v43, %v2406_v30 }
 0x208   : > { %v3495_v18 = vsel %vm1117_vm3, %v3492_v22, %v9972_v1  ;;  %v2085_v58 = vmul.f32 %v6860_v7, %v9917_v16  ;;  %v7621_v49 = vmul.f32 %v7617_v4, %v7554_v20  ;;  %v580_v28 = vmul.f32 %v7566_v51, %v7332_v41 }
 0x209   : > { %v1000_v47 = vadd.f32 %v952_v61, %v902_v56  ;;  %v530_v22 = vadd.f32 %v7563_v8, %v482_v29  ;;  %v1051_v34 = vmul.f32 %v7617_v4, %v9907_v40  ;;  %v7630_v60 = vmul.f32 %v9907_v40, %v6702_v45 }
 0x20a   : > { %v2956_v43 = vadd.f32 %v2849_v59, %v2681_v53  ;;  %v9974_v12 = vrot.slane %v7451_v57, 1  ;;  %v1926_v30 = vrot.slane %v1811_v44, 7  ;;  %v3007_v56 = vmul.f32 %v6764_v9, %v7118_v35 }
 0x20b   : > { %v9975_v61 = vrot.slane %v7470_v25, 6  ;;  %v7641_v29 = vmul.f32 %v6896_v38, %v7118_v35  ;;  %v628_v14 = vadd.f32 %v580_v28, %v530_v22  ;;  %v795_v45 = vrot.slane %v7621_v49, 7 }
 0x20c   : > { %v1275_v21 = vadd.f32 %v9974_v12, %v1000_v47  ;;  %v3230_v40 = vadd.f32 %v3121_v17, %v2956_v43  ;;  %v9976_v59 = vrot.slane %v7462_v39, 5  ;;  %v1168_v53 = vrot.slane %v1051_v34, 1 }
 0x20d   : > { %v1653_v1 = vsel %vm1603_vm7, %v9975_v61, %v1652_v6  ;;  %v1169_v44 = vrot.slane %v7630_v60, 1  ;;  %v903_v9 = vadd.f32 %v795_v45, %v628_v14  ;;  %v953_v25 = vmul.f32 %v7617_v4, %v7602_v54 }
 0x20e   : > { %v1486_v57 = vadd.f32 %v9976_v59, %v1275_v21  ;;  %v7653_v6 = vmul.f32 %v9914_v11, %v6935_v62  ;;  %v7657_v47 = vmul.f32 %v6713_v23, %v6935_v62  ;;  %v3328_v17 = vadd.f32 %v3280_v50, %v3230_v40  ;;  %v7683_v40 = vld [vmem:[#allocation2 + $0x178] sm:$0x3f] }
 0x20f   : > { %v9977_v22 = vrot.slane %v7480_v31, 7  ;;  %v2184_v14 = vmul.f32 %v6798_v37, %v6935_v62  ;;  %v1001_v34 = vadd.f32 %v953_v25, %v903_v9  ;;  %v7666_v43 = vmul.f32 %v6798_v37, %v9940_v26 }
 0x210   : > { %v1761_v39 = vadd.f32 %v1653_v1, %v1486_v57  ;;  %v2458_v11 = vmul.f32 %v6813_v10, %v6935_v62  ;;  %v7672_v23 = vmul.f32 %v6813_v10, %v9940_v26  ;;  %v3602_v50 = vadd.f32 %v3495_v18, %v3328_v17 }
 0x211   : > { %v1927_v28 = vsel %vm744_vm2, %v9977_v22, %v1926_v30  ;;  %v3122_v31 = vrot.slane %v3007_v56, 7  ;;  %v1170_v21 = vsel %vm1117_vm3, %v1168_v53, %v1169_v44  ;;  %v1391_v61 = vrot.slane %v7653_v6, 5 }
 0x212   : > { %v2035_v12 = vadd.f32 %v1927_v28, %v1761_v39  ;;  %v1276_v30 = vadd.f32 %v1170_v21, %v1001_v34  ;;  %v1654_v37 = vrot.slane %v7657_v47, 6  ;;  %v7681_v1 = vmul.f32 %v6738_v46, %v6935_v62 }
 0x213   : > { %v3700_v10 = vadd.f32 %v3652_v0, %v3602_v50  ;;  %v2300_v59 = vrot.slane %v2184_v14, 1  ;;  %v2733_v56 = vmul.f32 %v6829_v36, %v6935_v62  ;;  %v9573_v53 = vrot.slane %v7666_v43, 1 }
 0x214   : > { %v2133_v18 = vadd.f32 %v2085_v58, %v2035_v12  ;;  %v1487_v57 = vadd.f32 %v1391_v61, %v1276_v30  ;;  %v2575_v9 = vrot.slane %v2458_v11, 2  ;;  %v9572_v25 = vrot.slane %v7672_v23, 2 }
 0x215   : > { %v3798_v17 = vadd.f32 %v3750_v13, %v3700_v10  ;;  %v9978_v46 = vrot.slane %v7504_v33, 1  ;;  %v3653_v0 = vmul.f32 %v6833_v5, %v7390_v24  ;;  %v7697_v58 = vmul.f32 %v6829_v36, %v9940_v26  ;;  %v7734_v10 = vld [vmem:[#allocation2 + $0x128] sm:$0xff] }
 0x216   : > { %v9979_v22 = vrot.slane %v7525_v48, 7  ;;  %v3751_v14 = vmul.f32 %v6848_v63, %v7683_v40  ;;  %v1762_v13 = vadd.f32 %v1654_v37, %v1487_v57  ;;  %v9574_v33 = vrot.slane %v7681_v1, 7  ;;  %v7713_v48 = vld [vmem:[#allocation3 + $0xc] ss:$0 sm:$0xff]  ;;  %9982 = vst [vmem:[#allocation16_spill] sm:$0xff] %v7734_v10  ;;  %v9983_v57 = vld [vmem:[#allocation13_spill] sm:$0xff] }
 0x217   : > { %v2407_v39 = vadd.f32 %v9978_v46, %v2133_v18  ;;  %3848 = vst.msk [vmem:[%s5061_s27 + $0x95] sm:$0xff] %vm246_vm0, %v3798_v17  ;;  %v9980_v5 = vrot.slane %v7512_v42, 2  ;;  %v2086_v36 = vmul.f32 %v6860_v7, %v6935_v62  ;;  %v2850_v11 = vrot.slane %v2733_v56, 3 }
 0x218   : > { %v3123_v28 = vsel %vm744_vm2, %v9979_v22, %v3122_v31  ;;  %v7717_v50 = vmul.f32 %v7713_v48, %v7218_v32  ;;  %v2036_v63 = vadd.f32 %v9574_v33, %v1762_v13  ;;  %v2302_v12 = vsel %vm1117_vm3, %v2300_v59, %v9573_v53  ;;  %v7794_v33 = vld [vmem:[#allocation3 + $0x9] ss:$0 sm:$0xff] }
 0x219   : > { %v2682_v34 = vadd.f32 %v9980_v5, %v2407_v39  ;;  %v2577_v42 = vsel %vm2524_vm4, %v2575_v9, %v9572_v25  ;;  %v483_v62 = vmul.f32 %v7546_v2, %v9954_v52  ;;  %v9981_v7 = vrot.slane %v7521_v27, 3  ;;  %v7743_v9 = vld [vmem:[#allocation3 + $0x4] ss:$0 sm:$0xff]  ;;  %v7751_v39 = vld [vmem:[#allocation3 + $0x5] ss:$0 sm:$0xff] }
 0x21a   : > { %v9575_v21 = vrot.slane %v7697_v58, 3  ;;  %v3282_v30 = vmul.f32 %v6896_v38, %v7218_v32  ;;  %v7738_v18 = vmul.f32 %v7734_v10, %v7554_v20  ;;  %v2134_v59 = vadd.f32 %v2086_v36, %v2036_v63  ;;  %v9984_v5 = vld [vmem:[#allocation21_spill] sm:$0xff] }
 0x21b   : > { %v2957_v31 = vadd.f32 %v9981_v7, %v2682_v34  ;;  %v531_v56 = vadd.f32 %v7563_v8, %v483_v62  ;;  %v581_v52 = vmul.f32 %v7566_v51, %v9983_v57  ;;  %v7747_v27 = vmul.f32 %v7743_v9, %v9917_v16  ;;  %v7770_v7 = vld [vmem:[#allocation3 + $0x6] ss:$0 sm:$0xff] }
 0x21c   : > { %v9579_v38 = vrot.slane %v7717_v50, 7  ;;  %v9571_v46 = vrot.slane %v7738_v18, 7  ;;  %v7755_v22 = vmul.f32 %v7751_v39, %v9940_v26  ;;  %v2408_v13 = vadd.f32 %v2302_v12, %v2134_v59 }
 0x21d   : > { %v3231_v17 = vadd.f32 %v3123_v28, %v2957_v31  ;;  %v3380_v34 = vmul.f32 %v9984_v5, %v7218_v32  ;;  %v7761_v36 = vmul.f32 %v9984_v5, %v7295_v55  ;;  %v629_v16 = vadd.f32 %v581_v52, %v531_v56 }
 0x21e   : > { %v797_v63 = vsel %vm744_vm2, %v795_v45, %v9571_v46  ;;  %v9577_v62 = vrot.slane %v7747_v27, 1  ;;  %v7774_v12 = vmul.f32 %v7770_v7, %v9940_v26  ;;  %v2683_v31 = vadd.f32 %v2577_v42, %v2408_v13  ;;  %v7789_v46 = vld [vmem:[#allocation3 + $0xf] ss:$0 sm:$0xff]  ;;  %v9986_v42 = vld [vmem:[#allocation28_spill] sm:$0xff] }
 0x21f   : > { %v3329_v28 = vadd.f32 %v7641_v29, %v3231_v17  ;;  %v904_v59 = vadd.f32 %v797_v63, %v629_v16  ;;  %v954_v56 = vmul.f32 %v7734_v10, %v7602_v54  ;;  %v7778_v29 = vld [vmem:[#allocation3 + $0x7] ss:$0 sm:$0xff]  ;;  %v9985_v45 = vrot.slane %v7543_v19, 1 }
 0x220   : > { %v7782_v49 = vmul.f32 %v7778_v29, %v9940_v26  ;;  %v2852_v17 = vsel %vm2799_vm5, %v2850_v11, %v9575_v21  ;;  %v3654_v13 = vmul.f32 %v7789_v46, %v9986_v42  ;;  %v9576_v16 = vrot.slane %v7755_v22, 5 }
 0x221   : > { %v3603_v52 = vadd.f32 %v9985_v45, %v3329_v28  ;;  %v2958_v63 = vadd.f32 %v2852_v17, %v2683_v31  ;;  %v3496_v25 = vrot.slane %v3380_v34, 1  ;;  %v1002_v53 = vadd.f32 %v954_v56, %v904_v59  ;;  %v7800_v28 = vld [vmem:[#allocation2 + $0x180] sm:$0xff]  ;;  %v7812_v17 = vld [vmem:[#allocation3 + $0xa] ss:$0 sm:$0xff] }
 0x222   : > { %v7798_v19 = vmul.f32 %v7794_v33, %v7118_v35  ;;  %9987 = vst [vmem:[#allocation24_spill] sm:$0xff] %v7800_v28  ;;  %v3497_v11 = vrot.slane %v7761_v36, 1  ;;  %v1172_v21 = vsel %vm1117_vm3, %v1169_v44, %v9577_v62  ;;  %v9578_v34 = vrot.slane %v7774_v12, 6  ;;  %v7823_v44 = vld [vmem:[#allocation3 + $0xb] ss:$0 sm:$0xff] }
 0x223   : > { %v3701_v45 = vadd.f32 %v3653_v0, %v3603_v52  ;;  %v3232_v31 = vadd.f32 %v9579_v38, %v2958_v63  ;;  %v1277_v59 = vadd.f32 %v1172_v21, %v1002_v53  ;;  %v9582_v56 = vrot.slane %v7782_v49, 7  ;;  %v7833_v63 = vld [vmem:[#allocation3 + $0x10] ss:$0 sm:$0xff]  ;;  %v7846_v62 = vld [vmem:[#allocation3 + $0x8] ss:$0 sm:$0xff]  ;;  %v9989_v38 = vld [vmem:[#allocation12_spill] sm:$0xff] }
 0x224   : > { %v7816_v0 = vmul.f32 %v7812_v17, %v7118_v35  ;;  %v1393_v60 = vsel %vm1360_vm6, %v1391_v61, %v9576_v16  ;;  %v7827_v53 = vmul.f32 %v7823_v44, %v7118_v35  ;;  %v7831_v21 = vmul.f32 %v7713_v48, %v7295_v55 }
 0x225   : > { %v3799_v36 = vadd.f32 %v3751_v14, %v3701_v45  ;;  %v3330_v52 = vadd.f32 %v3282_v30, %v3232_v31  ;;  %v3752_v14 = vmul.f32 %v7833_v63, %v7800_v28  ;;  %v1488_v45 = vadd.f32 %v1393_v60, %v1277_v59  ;;  %v7864_v28 = vld [vmem:[#allocation2 + $0x130] sm:$0x3f] }
 0x226   : > { %v3498_v61 = vsel %vm1117_vm3, %v3496_v25, %v3497_v11  ;;  %v1656_v16 = vsel %vm1603_vm7, %v1654_v37, %v9578_v34  ;;  %v2087_v30 = vmul.f32 %v7846_v62, %v9940_v26  ;;  %v7852_v31 = vmul.f32 %v9984_v5, %v7390_v24  ;;  %9990 = vst [vmem:[#allocation18_spill] sm:$0xff] %v7864_v28 }
 0x227   : > { %3849 = vst.msk [vmem:[%s5061_s27 + $0x9d] sm:$0x7] %vm3821_vm9, %v3799_v36  ;;  %v3604_v59 = vadd.f32 %v3498_v61, %v3330_v52  ;;  %v1763_v60 = vadd.f32 %v1656_v16, %v1488_v45  ;;  %v9988_v25 = vrot.slane %v7681_v1, 7  ;;  %v9586_v47 = vrot.slane %v7816_v0, 2 }
 0x228   : > { %v484_v6 = vmul.f32 %v7546_v2, %v9989_v38  ;;  %v680_v5 = vmul.f32 %v7864_v28, %v7554_v20  ;;  %v9991_v1 = vrot.slane %v7798_v19, 1  ;;  %v9992_v45 = vrot.slane %v7666_v43, 1  ;;  %v7877_v38 = vld [vmem:[#allocation2 + $0x188] sm:$0xff] }
 0x229   : > { %v1930_v36 = vsel %vm744_vm2, %v9988_v25, %v9582_v56  ;;  %v3702_v16 = vadd.f32 %v3654_v13, %v3604_v59  ;;  %v7873_v25 = vld [vmem:[#allocation3 + $0xd] ss:$0 sm:$0xff]  ;;  %9993 = vst [vmem:[#allocation14_spill] sm:$0xff] %v7877_v38  ;;  %v582_v13 = vmul.f32 %v7566_v51, %v7556_v3  ;;  %v9995_v10 = vrot.slane %v7827_v53, 3 }
 0x22a   : > { %v2037_v52 = vadd.f32 %v1930_v36, %v1763_v60  ;;  %v2304_v61 = vsel %vm1117_vm3, %v9992_v45, %v9991_v1  ;;  %v3283_v56 = vmul.f32 %v7873_v25, %v7295_v55  ;;  %v532_v37 = vadd.f32 %v7563_v8, %v484_v6 }
 0x22b   : > { %v798_v59 = vrot.slane %v680_v5, 7  ;;  %v3800_v60 = vadd.f32 %v3752_v14, %v3702_v16  ;;  %v9994_v36 = vrot.slane %v7672_v23, 2  ;;  %v1539_v45 = vmul.f32 %v7770_v7, %v7118_v35 }
 0x22c   : > { %v2135_v43 = vadd.f32 %v2087_v30, %v2037_v52  ;;  %v9996_v34 = vrot.slane %v7697_v58, 3  ;;  %v9997_v3 = vrot.slane %v7831_v21, 7  ;;  %v9998_v14 = vrot.slane %v7717_v50, 7 }
 0x22d   : > { %v2579_v1 = vsel %vm2524_vm4, %v9994_v36, %v9586_v47  ;;  %v630_v5 = vadd.f32 %v582_v13, %v532_v37  ;;  %v9999_v23 = vrot.slane %v7738_v18, 7  ;;  %3850 = vst.msk [vmem:[%s5061_s27 + $0x9d] sm:$0xf8] %vm3818_vm8, %v3800_v60  ;;  %v3655_v36 = vmul.f32 %v7789_v46, %v7578_v15  ;;  %v7920_v60 = vld [vmem:[#allocation2 + $0x138] sm:$0xff] }
 0x22e   : > { %v2854_v6 = vsel %vm2799_vm5, %v9996_v34, %v9995_v10  ;;  %v3126_v30 = vsel %vm744_vm2, %v9998_v14, %v9997_v3  ;;  %v2409_v52 = vadd.f32 %v2304_v61, %v2135_v43  ;;  %v3753_v58 = vmul.f32 %v7833_v63, %v7877_v38  ;;  %10001 = vst [vmem:[#allocation15_spill] sm:$0xff] %v7920_v60 }
 0x22f   : > { %v799_v16 = vsel %vm744_vm2, %v9999_v23, %v798_v59  ;;  %v1814_v10 = vmul.f32 %v7778_v29, %v7118_v35  ;;  %v10000_v50 = vrot.slane %v7852_v31, 1  ;;  %v955_v18 = vmul.f32 %v7864_v28, %v7602_v54 }
 0x230   : > { %v905_v34 = vadd.f32 %v799_v16, %v630_v5  ;;  %v485_v37 = vmul.f32 %v7546_v2, %v7332_v41  ;;  %v2684_v61 = vadd.f32 %v2579_v1, %v2409_v52  ;;  %v1657_v13 = vrot.slane %v1539_v45, 6 }
 0x231   : > { %v3500_v3 = vsel %vm1117_vm3, %v3497_v11, %v10000_v50  ;;  %v2088_v59 = vmul.f32 %v7846_v62, %v7118_v35  ;;  %v7924_v43 = vmul.f32 %v7920_v60, %v7554_v20  ;;  %v583_v5 = vmul.f32 %v7617_v4, %v7566_v51 }
 0x232   : > { %v1003_v14 = vadd.f32 %v955_v18, %v905_v34  ;;  %v533_v11 = vadd.f32 %v7563_v8, %v485_v37  ;;  %v1054_v41 = vmul.f32 %v7920_v60, %v7743_v9  ;;  %v2959_v1 = vadd.f32 %v2854_v6, %v2684_v61 }
 0x233   : > { %v1931_v45 = vrot.slane %v1814_v10, 7  ;;  %v3010_v23 = vmul.f32 %v7713_v48, %v7390_v24  ;;  %v7935_v16 = vmul.f32 %v7743_v9, %v9940_v26  ;;  %v10002_v52 = vrot.slane %v7747_v27, 1 }
 0x234   : > { %v7941_v34 = vmul.f32 %v7873_v25, %v7390_v24  ;;  %v631_v18 = vadd.f32 %v583_v5, %v533_v11  ;;  %v800_v37 = vrot.slane %v7924_v43, 7  ;;  %v3233_v47 = vadd.f32 %v3126_v30, %v2959_v1 }
 0x235   : > { %v1278_v50 = vadd.f32 %v10002_v52, %v1003_v14  ;;  %v10003_v6 = vrot.slane %v7774_v12, 6  ;;  %v1173_v61 = vrot.slane %v1054_v41, 1  ;;  %v9595_v4 = vrot.slane %v7935_v16, 1 }
 0x236   : > { %v10004_v26 = vrot.slane %v7755_v22, 5  ;;  %v906_v27 = vadd.f32 %v800_v37, %v631_v18  ;;  %v956_v14 = vmul.f32 %v7920_v60, %v7602_v54  ;;  %v7956_v11 = vmul.f32 %v7751_v39, %v7218_v32 }
 0x237   : > { %v1658_v10 = vsel %vm1603_vm7, %v10003_v6, %v1657_v13  ;;  %v3331_v30 = vadd.f32 %v3283_v56, %v3233_v47  ;;  %v10005_v12 = vrot.slane %v7782_v49, 7  ;;  %v3127_v5 = vrot.slane %v3010_v23, 7 }
 0x238   : > { %v1489_v38 = vadd.f32 %v10004_v26, %v1278_v50  ;;  %v2187_v22 = vmul.f32 %v7794_v33, %v7218_v32  ;;  %v1004_v1 = vadd.f32 %v956_v14, %v906_v27  ;;  %v7965_v52 = vmul.f32 %v7770_v7, %v7218_v32 }
 0x239   : > { %v1932_v13 = vsel %vm744_vm2, %v10005_v12, %v1931_v45  ;;  %v7969_v50 = vmul.f32 %v7794_v33, %v7295_v55  ;;  %v3605_v18 = vadd.f32 %v3500_v3, %v3331_v30  ;;  %v1175_v49 = vsel %vm1117_vm3, %v1173_v61, %v9595_v4  ;;  %v7985_v3 = vld [vmem:[#allocation2 + $0x190] sm:$0x3f] }
 0x23a   : > { %v1764_v41 = vadd.f32 %v1658_v10, %v1489_v38  ;;  %v2461_v56 = vmul.f32 %v7812_v17, %v7218_v32  ;;  %v7978_v47 = vmul.f32 %v7812_v17, %v7295_v55  ;;  %v1279_v45 = vadd.f32 %v1175_v49, %v1004_v1  ;;  %10006 = vst [vmem:[#allocation19_spill] sm:$0xff] %v7985_v3 }
 0x23b   : > { %v9590_v23 = vrot.slane %v7956_v11, 5  ;;  %v7983_v6 = vmul.f32 %v7778_v29, %v7218_v32  ;;  %v3703_v10 = vadd.f32 %v3655_v36, %v3605_v18  ;;  %v2305_v61 = vrot.slane %v2187_v22, 1 }
 0x23c   : > { %v2038_v38 = vadd.f32 %v1932_v13, %v1764_v41  ;;  %v9592_v26 = vrot.slane %v7969_v50, 1  ;;  %v2736_v27 = vmul.f32 %v7823_v44, %v7218_v32  ;;  %v3656_v30 = vmul.f32 %v7789_v46, %v7683_v40 }
 0x23d   : > { %v1490_v12 = vadd.f32 %v9590_v23, %v1279_v45  ;;  %v9594_v13 = vrot.slane %v7965_v52, 6  ;;  %v3801_v41 = vadd.f32 %v3753_v58, %v3703_v10  ;;  %v2580_v1 = vrot.slane %v2461_v56, 2 }
 0x23e   : > { %v2136_v14 = vadd.f32 %v2088_v59, %v2038_v38  ;;  %v9591_v36 = vrot.slane %v7978_v47, 2  ;;  %v7998_v22 = vmul.f32 %v7823_v44, %v7295_v55  ;;  %v10007_v18 = vrot.slane %v7798_v19, 1 }
 0x23f   : > { %v3754_v59 = vmul.f32 %v7833_v63, %v7985_v3  ;;  %v1765_v38 = vadd.f32 %v9594_v13, %v1490_v12  ;;  %v9593_v45 = vrot.slane %v7983_v6, 7  ;;  %3851 = vst.msk [vmem:[%s5061_s27 + $0xa5] sm:$0xff] %vm246_vm0, %v3801_v41  ;;  %v10008_v58 = vrot.slane %v7831_v21, 7 }
 0x240   : > { %v2410_v49 = vadd.f32 %v10007_v18, %v2136_v14  ;;  %v2089_v10 = vmul.f32 %v7846_v62, %v7218_v32  ;;  %v2307_v19 = vsel %vm1117_vm3, %v2305_v61, %v9592_v26  ;;  %v2855_v14 = vrot.slane %v2736_v27, 3  ;;  %v10010_v61 = vld [vmem:[#allocation16_spill] sm:$0xff]  ;;  %v8033_v27 = vld [vmem:[#allocation2 + $0x140] sm:$0xff]  ;;  %v8048_v26 = vld [vmem:[#allocation3 + $0xe] ss:$0 sm:$0xff] }
 0x241   : > { %v3128_v56 = vsel %vm744_vm2, %v10008_v58, %v3127_v5  ;;  %v10009_v18 = vrot.slane %v7816_v0, 2  ;;  %v2039_v12 = vadd.f32 %v9593_v45, %v1765_v38  ;;  %v8023_v41 = vmul.f32 %v7713_v48, %v9986_v42 }
 0x242   : > { %v486_v21 = vmul.f32 %v7546_v2, %v9983_v57  ;;  %v2582_v32 = vsel %vm2524_vm4, %v2580_v1, %v9591_v36  ;;  %v9603_v5 = vrot.slane %v7998_v22, 3  ;;  %v584_v0 = vmul.f32 %v10010_v61, %v7566_v51 }
 0x243   : > { %v2685_v23 = vadd.f32 %v10009_v18, %v2410_v49  ;;  %v8037_v49 = vmul.f32 %v8033_v27, %v7554_v20  ;;  %v10011_v38 = vrot.slane %v7827_v53, 3  ;;  %v2137_v18 = vadd.f32 %v2089_v10, %v2039_v12 }
 0x244   : > { %v534_v57 = vadd.f32 %v7563_v8, %v486_v21  ;;  %v8044_v1 = vmul.f32 %v7743_v9, %v7118_v35  ;;  %v3285_v36 = vmul.f32 %v7873_v25, %v9986_v42  ;;  %v3383_v45 = vmul.f32 %v8048_v26, %v9986_v42 }
 0x245   : > { %v2960_v58 = vadd.f32 %v10011_v38, %v2685_v23  ;;  %v9596_v13 = vrot.slane %v8037_v49, 7  ;;  %v8055_v53 = vmul.f32 %v7751_v39, %v7295_v55  ;;  %v2411_v10 = vadd.f32 %v2307_v19, %v2137_v18  ;;  %v8083_v38 = vld [vmem:[#allocation2 + $0x198] sm:$0xff] }
 0x246   : > { %v8059_v35 = vmul.f32 %v8048_v26, %v7578_v15  ;;  %v632_v12 = vadd.f32 %v584_v0, %v534_v57  ;;  %v8069_v4 = vmul.f32 %v7770_v7, %v7295_v55  ;;  %v957_v18 = vmul.f32 %v8033_v27, %v7602_v54 }
 0x247   : > { %v3234_v23 = vadd.f32 %v3128_v56, %v2960_v58  ;;  %v802_v21 = vsel %vm744_vm2, %v800_v37, %v9596_v13  ;;  %v8073_v56 = vmul.f32 %v7778_v29, %v7295_v55  ;;  %v2686_v58 = vadd.f32 %v2582_v32, %v2411_v10 }
 0x248   : > { %v907_v0 = vadd.f32 %v802_v21, %v632_v12  ;;  %v2857_v43 = vsel %vm2799_vm5, %v2855_v14, %v9603_v5  ;;  %v3129_v37 = vrot.slane %v8023_v41, 7  ;;  %v3501_v57 = vrot.slane %v3383_v45, 1  ;;  %v8158_v5 = vld [vmem:[#allocation2 + $0x1a0] sm:$0xff] }
 0x249   : > { %v3332_v19 = vadd.f32 %v7941_v34, %v3234_v23  ;;  %v9599_v13 = vrot.slane %v8055_v53, 5  ;;  %v10012_v61 = vrot.slane %v7852_v31, 1  ;;  %v2961_v34 = vadd.f32 %v2857_v43, %v2686_v58 }
 0x24a   : > { %v9602_v32 = vrot.slane %v8059_v35, 1  ;;  %v1005_v23 = vadd.f32 %v957_v18, %v907_v0  ;;  %v10013_v10 = vrot.slane %v8044_v1, 1  ;;  %v10014_v12 = vrot.slane %v7935_v16, 1  ;;  %v10015_v0 = vld [vmem:[#allocation24_spill] sm:$0xff] }
 0x24b   : > { %v3606_v3 = vadd.f32 %v10012_v61, %v3332_v19  ;;  %v9601_v41 = vrot.slane %v8069_v4, 6  ;;  %v9600_v45 = vrot.slane %v8073_v56, 7  ;;  %v8097_v21 = vmul.f32 %v7794_v33, %v7390_v24 }
 0x24c   : > { %v1177_v14 = vsel %vm1117_vm3, %v10014_v12, %v10013_v10  ;;  %v3235_v61 = vadd.f32 %v3129_v37, %v2961_v34  ;;  %v8101_v58 = vmul.f32 %v7812_v17, %v7390_v24  ;;  %v3657_v16 = vmul.f32 %v7789_v46, %v10015_v0 }
 0x24d   : > { %v3704_v31 = vadd.f32 %v3656_v30, %v3606_v3  ;;  %v1280_v19 = vadd.f32 %v1177_v14, %v1005_v23  ;;  %v3755_v18 = vmul.f32 %v7833_v63, %v8083_v38  ;;  %v10016_v43 = vrot.slane %v7956_v11, 5 }
 0x24e   : > { %v8114_v3 = vmul.f32 %v7823_v44, %v7390_v24  ;;  %v3333_v34 = vadd.f32 %v3285_v36, %v3235_v61  ;;  %v8118_v12 = vmul.f32 %v7713_v48, %v7578_v15  ;;  %v3503_v14 = vsel %vm1117_vm3, %v3501_v57, %v9602_v32 }
 0x24f   : > { %v1396_v10 = vsel %vm1360_vm6, %v10016_v43, %v9599_v13  ;;  %v3802_v30 = vadd.f32 %v3754_v59, %v3704_v31  ;;  %v10017_v11 = vrot.slane %v7965_v52, 6  ;;  %v10018_v59 = vrot.slane %v7983_v6, 7  ;;  %v10019_v6 = vld [vmem:[#allocation23_spill] sm:$0xff]  ;;  %v8146_v13 = vld [vmem:[#allocation2 + $0x148] sm:$0x3f] }
 0x250   : > { %v1491_v23 = vadd.f32 %v1396_v10, %v1280_v19  ;;  %v2090_v31 = vmul.f32 %v7846_v62, %v7295_v55  ;;  %v3607_v61 = vadd.f32 %v3503_v14, %v3333_v34  ;;  %v9607_v57 = vrot.slane %v8097_v21, 1  ;;  %10020 = vst [vmem:[#allocation26_spill] sm:$0xff] %v8146_v13 }
 0x251   : > { %v1661_v43 = vsel %vm1603_vm7, %v10017_v11, %v9601_v41  ;;  %v1935_v36 = vsel %vm744_vm2, %v10018_v59, %v9600_v45  ;;  %3852 = vst.msk [vmem:[%s5061_s27 + $0xad] sm:$0x7] %vm3821_vm9, %v3802_v30  ;;  %v9605_v10 = vrot.slane %v8101_v58, 2  ;;  %v8142_v11 = vmul.f32 %v8048_v26, %v7683_v40 }
 0x252   : > { %v1766_v19 = vadd.f32 %v1661_v43, %v1491_v23  ;;  %v487_v59 = vmul.f32 %v10019_v6, %v7546_v2  ;;  %v683_v30 = vmul.f32 %v8146_v13, %v7554_v20  ;;  %v3705_v34 = vadd.f32 %v3657_v16, %v3607_v61 }
 0x253   : > { %v3286_v43 = vmul.f32 %v7873_v25, %v7578_v15  ;;  %v585_v41 = vmul.f32 %v7864_v28, %v7566_v51  ;;  %v1542_v6 = vmul.f32 %v7770_v7, %v7390_v24  ;;  %v9606_v14 = vrot.slane %v8142_v11, 1 }
 0x254   : > { %v2040_v23 = vadd.f32 %v1935_v36, %v1766_v19  ;;  %v535_v45 = vadd.f32 %v7563_v8, %v487_v59  ;;  %v803_v32 = vrot.slane %v683_v30, 7  ;;  %v3803_v52 = vadd.f32 %v3755_v18, %v3705_v34 }
 0x255   : > { %v10021_v36 = vrot.slane %v7969_v50, 1  ;;  %v1817_v19 = vmul.f32 %v7778_v29, %v7390_v24  ;;  %v10022_v59 = vrot.slane %v7978_v47, 2  ;;  %v10023_v18 = vrot.slane %v8037_v49, 7 }
 0x256   : > { %v2138_v16 = vadd.f32 %v2090_v31, %v2040_v23  ;;  %v633_v28 = vadd.f32 %v585_v41, %v535_v45  ;;  %3853 = vst.msk [vmem:[%s5061_s27 + $0xad] sm:$0xf8] %vm3818_vm8, %v3803_v52  ;;  %v10024_v34 = vrot.slane %v8114_v3, 3  ;;  %v10025_v23 = vrot.slane %v7998_v22, 3  ;;  %v10028_v22 = vld [vmem:[#allocation25_spill] sm:$0xff] }
 0x257   : > { %v2309_v61 = vsel %vm1117_vm3, %v10021_v36, %v9607_v57  ;;  %v2584_v30 = vsel %vm2524_vm4, %v10022_v59, %v9605_v10  ;;  %v804_v31 = vsel %vm744_vm2, %v10023_v18, %v803_v32  ;;  %v10026_v47 = vrot.slane %v8118_v12, 7  ;;  %v10027_v10 = vld [vmem:[#allocation14_spill] sm:$0xff] }
 0x258   : > { %v2412_v50 = vadd.f32 %v2309_v61, %v2138_v16  ;;  %v2859_v36 = vsel %vm2799_vm5, %v10025_v23, %v10024_v34  ;;  %v3658_v41 = vmul.f32 %v7789_v46, %v10027_v10  ;;  %v3756_v49 = vmul.f32 %v7833_v63, %v8158_v5  ;;  %v8194_v34 = vld [vmem:[#allocation2 + $0x150] sm:$0xff] }
 0x259   : > { %v3131_v59 = vsel %vm744_vm2, %v3129_v37, %v10026_v47  ;;  %v908_v32 = vadd.f32 %v804_v31, %v633_v28  ;;  %v958_v45 = vmul.f32 %v8146_v13, %v7602_v54  ;;  %v1662_v52 = vrot.slane %v1542_v6, 6  ;;  %10029 = vst [vmem:[#allocation20_spill] sm:$0xff] %v8194_v34 }
 0x25a   : > { %v2687_v16 = vadd.f32 %v2584_v30, %v2412_v50  ;;  %v1936_v61 = vrot.slane %v1817_v19, 7  ;;  %v488_v18 = vmul.f32 %v10028_v22, %v7546_v2  ;;  %v8198_v37 = vmul.f32 %v8194_v34, %v7554_v20 }
 0x25b   : > { %v10030_v23 = vrot.slane %v8059_v35, 1  ;;  %v1006_v31 = vadd.f32 %v958_v45, %v908_v32  ;;  %v2091_v6 = vmul.f32 %v7846_v62, %v7390_v24  ;;  %v1057_v19 = vmul.f32 %v8194_v34, %v7743_v9 }
 0x25c   : > { %v2962_v30 = vadd.f32 %v2859_v36, %v2687_v16  ;;  %v536_v50 = vadd.f32 %v7563_v8, %v488_v18  ;;  %v586_v47 = vmul.f32 %v7920_v60, %v7566_v51  ;;  %v8214_v22 = vmul.f32 %v7743_v9, %v7295_v55 }
 0x25d   : > { %v3505_v28 = vsel %vm1117_vm3, %v10030_v23, %v9606_v14  ;;  %v10031_v35 = vrot.slane %v8044_v1, 1  ;;  %v10032_v32 = vrot.slane %v8069_v4, 6  ;;  %v3013_v14 = vmul.f32 %v7713_v48, %v7683_v40 }
 0x25e   : > { %v8225_v36 = vmul.f32 %v7873_v25, %v7683_v40  ;;  %v3236_v16 = vadd.f32 %v3131_v59, %v2962_v30  ;;  %v10033_v18 = vrot.slane %v8073_v56, 7  ;;  %v634_v57 = vadd.f32 %v586_v47, %v536_v50 }
 0x25f   : > { %v1281_v23 = vadd.f32 %v10031_v35, %v1006_v31  ;;  %v1663_v45 = vsel %vm1603_vm7, %v10032_v32, %v1662_v52  ;;  %v9610_v1 = vrot.slane %v8198_v37, 7  ;;  %v10034_v31 = vrot.slane %v8055_v53, 5 }
 0x260   : > { %v1937_v55 = vsel %vm744_vm2, %v10033_v18, %v1936_v61  ;;  %v1178_v35 = vrot.slane %v1057_v19, 1  ;;  %v9609_v52 = vrot.slane %v8214_v22, 1  ;;  %v8236_v32 = vmul.f32 %v7751_v39, %v9986_v42 }
 0x261   : > { %v1492_v4 = vadd.f32 %v10034_v31, %v1281_v23  ;;  %v3334_v60 = vadd.f32 %v3286_v43, %v3236_v16  ;;  %v909_v59 = vadd.f32 %v9610_v1, %v634_v57  ;;  %v959_v56 = vmul.f32 %v8194_v34, %v7602_v54 }
 0x262   : > { %v8244_v61 = vmul.f32 %v7770_v7, %v9986_v42  ;;  %v2190_v19 = vmul.f32 %v7794_v33, %v9986_v42  ;;  %v8250_v30 = vmul.f32 %v7794_v33, %v7578_v15  ;;  %v2464_v43 = vmul.f32 %v7812_v17, %v9986_v42 }
 0x263   : > { %v1767_v53 = vadd.f32 %v1663_v45, %v1492_v4  ;;  %v3608_v50 = vadd.f32 %v3505_v28, %v3334_v60  ;;  %v3132_v57 = vrot.slane %v3013_v14, 7  ;;  %v1007_v47 = vadd.f32 %v959_v56, %v909_v59  ;;  %v8266_v4 = vld [vmem:[#allocation2 + $0x1a8] sm:$0x3f] }
 0x264   : > { %v8256_v23 = vmul.f32 %v7812_v17, %v7578_v15  ;;  %v1180_v45 = vsel %vm1117_vm3, %v1178_v35, %v9609_v52  ;;  %v9614_v18 = vrot.slane %v8236_v32, 5  ;;  %v8264_v31 = vmul.f32 %v7778_v29, %v9986_v42 }
 0x265   : > { %v2041_v16 = vadd.f32 %v1937_v55, %v1767_v53  ;;  %v3706_v60 = vadd.f32 %v3658_v41, %v3608_v50  ;;  %v1282_v14 = vadd.f32 %v1180_v45, %v1007_v47  ;;  %v9613_v28 = vrot.slane %v8244_v61, 6 }
 0x266   : > { %v2739_v55 = vmul.f32 %v7823_v44, %v9986_v42  ;;  %v2310_v56 = vrot.slane %v2190_v19, 1  ;;  %v9616_v35 = vrot.slane %v8250_v30, 1  ;;  %v2585_v53 = vrot.slane %v2464_v43, 2  ;;  %v10037_v19 = vld [vmem:[#allocation19_spill] sm:$0xff] }
 0x267   : > { %v2139_v59 = vadd.f32 %v2091_v6, %v2041_v16  ;;  %v3804_v52 = vadd.f32 %v3756_v49, %v3706_v60  ;;  %v1493_v1 = vadd.f32 %v9614_v18, %v1282_v14  ;;  %v9615_v34 = vrot.slane %v8256_v23, 2  ;;  %v8312_v18 = vld [vmem:[#allocation2 + $0x158] sm:$0xff] }
 0x268   : > { %v8277_v41 = vmul.f32 %v7823_v44, %v7578_v15  ;;  %v10035_v50 = vrot.slane %v8097_v21, 1  ;;  %v10036_v45 = vrot.slane %v8118_v12, 7  ;;  %v3659_v43 = vmul.f32 %v7789_v46, %v10037_v19  ;;  %10040 = vst [vmem:[#allocation27_spill] sm:$0xff] %v8312_v18 }
 0x269   : > { %v3757_v49 = vmul.f32 %v7833_v63, %v8266_v4  ;;  %3854 = vst.msk [vmem:[%s5061_s27 + $0xb5] sm:$0xff] %vm246_vm0, %v3804_v52  ;;  %v1768_v16 = vadd.f32 %v9613_v28, %v1493_v1  ;;  %v9617_v60 = vrot.slane %v8264_v31, 7  ;;  %v2092_v21 = vmul.f32 %v7846_v62, %v9986_v42 }
 0x26a   : > { %v2413_v47 = vadd.f32 %v10035_v50, %v2139_v59  ;;  %v3133_v6 = vsel %vm744_vm2, %v10036_v45, %v3132_v57  ;;  %v8297_v12 = vmul.f32 %v7713_v48, %v10015_v0  ;;  %v10038_v57 = vrot.slane %v8101_v58, 2  ;;  %v10039_v50 = vld [vmem:[#allocation16_spill] sm:$0xff] }
 0x26b   : > { %v2312_v59 = vsel %vm1117_vm3, %v2310_v56, %v9616_v35  ;;  %v2860_v52 = vrot.slane %v2739_v55, 3  ;;  %v489_v1 = vmul.f32 %v10039_v50, %v7546_v2  ;;  %v2042_v45 = vadd.f32 %v9617_v60, %v1768_v16  ;;  %v8366_v60 = vld [vmem:[#allocation2 + $0x1b0] sm:$0xff] }
 0x26c   : > { %v2688_v14 = vadd.f32 %v10038_v57, %v2413_v47  ;;  %v2587_v42 = vsel %vm2524_vm4, %v2585_v53, %v9615_v34  ;;  %v8316_v58 = vmul.f32 %v8312_v18, %v7554_v20  ;;  %v10041_v55 = vrot.slane %v8114_v3, 3  ;;  %10045 = vst [vmem:[#allocation17_spill] sm:$0xff] %v8366_v60 }
 0x26d   : > { %v537_v47 = vadd.f32 %v7563_v8, %v489_v1  ;;  %v587_v16 = vmul.f32 %v8033_v27, %v7566_v51  ;;  %v8325_v57 = vmul.f32 %v7743_v9, %v7390_v24  ;;  %v2140_v53 = vadd.f32 %v2092_v21, %v2042_v45 }
 0x26e   : > { %v2963_v56 = vadd.f32 %v10041_v55, %v2688_v14  ;;  %v9618_v34 = vrot.slane %v8316_v58, 7  ;;  %v8331_v35 = vmul.f32 %v7751_v39, %v7578_v15  ;;  %v3386_v14 = vmul.f32 %v8048_v26, %v10015_v0 }
 0x26f   : > { %v8337_v1 = vmul.f32 %v8048_v26, %v10027_v10  ;;  %v635_v55 = vadd.f32 %v587_v16, %v537_v47  ;;  %v2414_v24 = vadd.f32 %v2312_v59, %v2140_v53  ;;  %v10042_v21 = vrot.slane %v8198_v37, 7 }
 0x270   : > { %v3237_v3 = vadd.f32 %v3133_v6, %v2963_v56  ;;  %v8347_v6 = vmul.f32 %v7770_v7, %v7578_v15  ;;  %v960_v28 = vmul.f32 %v8312_v18, %v7602_v54  ;;  %v8354_v59 = vmul.f32 %v7778_v29, %v7578_v15 }
 0x271   : > { %v807_v45 = vsel %vm744_vm2, %v10042_v21, %v9618_v34  ;;  %v2689_v47 = vadd.f32 %v2587_v42, %v2414_v24  ;;  %v10043_v37 = vrot.slane %v8277_v41, 3  ;;  %v3288_v53 = vmul.f32 %v7873_v25, %v10015_v0 }
 0x272   : > { %v3335_v56 = vadd.f32 %v8225_v36, %v3237_v3  ;;  %v910_v50 = vadd.f32 %v807_v45, %v635_v55  ;;  %v10044_v36 = vrot.slane %v8142_v11, 1  ;;  %v3506_v55 = vrot.slane %v3386_v14, 1 }
 0x273   : > { %v2862_v16 = vsel %vm2799_vm5, %v2860_v52, %v10043_v37  ;;  %v3660_v45 = vmul.f32 %v7789_v46, %v8083_v38  ;;  %v3507_v24 = vrot.slane %v8337_v1, 1  ;;  %v10046_v52 = vrot.slane %v8325_v57, 1 }
 0x274   : > { %v3609_v3 = vadd.f32 %v10044_v36, %v3335_v56  ;;  %v1008_v34 = vadd.f32 %v960_v28, %v910_v50  ;;  %v2964_v42 = vadd.f32 %v2862_v16, %v2689_v47  ;;  %v10047_v37 = vrot.slane %v8214_v22, 1 }
 0x275   : > { %v9622_v21 = vrot.slane %v8347_v6, 6  ;;  %v9621_v56 = vrot.slane %v8354_v59, 7  ;;  %v8378_v28 = vmul.f32 %v7794_v33, %v7683_v40  ;;  %v10048_v50 = vrot.slane %v8297_v12, 7 }
 0x276   : > { %v1182_v18 = vsel %vm1117_vm3, %v10047_v37, %v10046_v52  ;;  %v3707_v11 = vadd.f32 %v3659_v43, %v3609_v3  ;;  %v10049_v47 = vrot.slane %v8331_v35, 5  ;;  %v10050_v22 = vrot.slane %v8236_v32, 5 }
 0x277   : > { %v1283_v14 = vadd.f32 %v1182_v18, %v1008_v34  ;;  %v3238_v1 = vadd.f32 %v10048_v50, %v2964_v42  ;;  %v8389_v43 = vmul.f32 %v7812_v17, %v7683_v40  ;;  %v8393_v34 = vmul.f32 %v7823_v44, %v7683_v40 }
 0x278   : > { %v1399_v16 = vsel %vm1360_vm6, %v10050_v22, %v10049_v47  ;;  %v3805_v18 = vadd.f32 %v3757_v49, %v3707_v11  ;;  %v3758_v36 = vmul.f32 %v7833_v63, %v8366_v60  ;;  %v8399_v42 = vmul.f32 %v7713_v48, %v10027_v10 }
 0x279   : > { %v1494_v3 = vadd.f32 %v1399_v16, %v1283_v14  ;;  %v3336_v32 = vadd.f32 %v3288_v53, %v3238_v1  ;;  %v3508_v52 = vsel %vm1117_vm3, %v3506_v55, %v3507_v24  ;;  %v10051_v37 = vrot.slane %v8244_v61, 6  ;;  %v10053_v16 = vld [vmem:[#allocation18_spill] sm:$0xff] }
 0x27a   : > { %v2093_v49 = vmul.f32 %v7846_v62, %v7578_v15  ;;  %3855 = vst.msk [vmem:[%s5061_s27 + $0xbd] sm:$0x7] %vm3821_vm9, %v3805_v18  ;;  %v10052_v14 = vrot.slane %v8264_v31, 7  ;;  %v9626_v55 = vrot.slane %v8378_v28, 1  ;;  %v8419_v1 = vmul.f32 %v8048_v26, %v10037_v19 }
 0x27b   : > { %v1666_v50 = vsel %vm1603_vm7, %v10051_v37, %v9622_v21  ;;  %v3610_v61 = vadd.f32 %v3508_v52, %v3336_v32  ;;  %v2588_v47 = vrot.slane %v8389_v43, 2  ;;  %v490_v18 = vmul.f32 %v10053_v16, %v7546_v2  ;;  %v8587_v43 = vld [vmem:[#allocation3] ss:$0 sm:$0xff] }
 0x27c   : > { %v1769_v11 = vadd.f32 %v1666_v50, %v1494_v3  ;;  %v1940_v53 = vsel %vm744_vm2, %v10052_v14, %v9621_v56  ;;  %v3289_v31 = vmul.f32 %v7873_v25, %v10027_v10  ;;  %v8428_v50 = vld [vmem:[#allocation2 + $0x160] sm:$0x3f]  ;;  %v588_v52 = vmul.f32 %v8146_v13, %v7566_v51 }
 0x27d   : > { %v686_v14 = vmul.f32 %v8428_v50, %v7554_v20  ;;  %v3708_v56 = vadd.f32 %v3660_v45, %v3610_v61  ;;  %v538_v32 = vadd.f32 %v7563_v8, %v490_v18  ;;  %v10054_v16 = vrot.slane %v8250_v30, 1  ;;  %v8443_v45 = vld [vmem:[#allocation2 + $0x1b8] sm:$0xff] }
 0x27e   : > { %v2043_v3 = vadd.f32 %v1940_v53, %v1769_v11  ;;  %v1545_v11 = vmul.f32 %v7770_v7, %v7683_v40  ;;  %v3509_v37 = vrot.slane %v8419_v1, 1  ;;  %v10055_v18 = vrot.slane %v8256_v23, 2 }
 0x27f   : > { %v2314_v21 = vsel %vm1117_vm3, %v10054_v16, %v9626_v55  ;;  %v808_v22 = vrot.slane %v686_v14, 7  ;;  %v3806_v61 = vadd.f32 %v3758_v36, %v3708_v56  ;;  %v636_v60 = vadd.f32 %v588_v52, %v538_v32 }
 0x280   : > { %v2141_v53 = vadd.f32 %v2093_v49, %v2043_v3  ;;  %v2589_v13 = vsel %vm2524_vm4, %v10055_v18, %v2588_v47  ;;  %v1820_v49 = vmul.f32 %v7778_v29, %v7683_v40  ;;  %v10056_v30 = vrot.slane %v8393_v34, 3 }
 0x281   : > { %v10057_v16 = vrot.slane %v8277_v41, 3  ;;  %v10058_v55 = vrot.slane %v8399_v42, 7  ;;  %v10059_v56 = vrot.slane %v8297_v12, 7  ;;  %v10060_v23 = vrot.slane %v8316_v58, 7  ;;  %3856 = vst.msk [vmem:[%s5061_s27 + $0xbd] sm:$0xf8] %vm3818_vm8, %v3806_v61 }
 0x282   : > { %v2415_v3 = vadd.f32 %v2314_v21, %v2141_v53  ;;  %v3661_v21 = vmul.f32 %v7789_v46, %v8158_v5  ;;  %v961_v41 = vmul.f32 %v8428_v50, %v7602_v54  ;;  %v1667_v53 = vrot.slane %v1545_v11, 6 }
 0x283   : > { %v2864_v14 = vsel %vm2799_vm5, %v10057_v16, %v10056_v30  ;;  %v3136_v36 = vsel %vm744_vm2, %v10059_v56, %v10058_v55  ;;  %v809_v32 = vsel %vm744_vm2, %v10060_v23, %v808_v22  ;;  %v3510_v12 = vsel %vm1117_vm3, %v3507_v24, %v3509_v37  ;;  %v10061_v55 = vld [vmem:[#allocation15_spill] sm:$0xff]  ;;  %v10062_v16 = vld [vmem:[#allocation20_spill] sm:$0xff] }
 0x284   : > { %v911_v52 = vadd.f32 %v809_v32, %v636_v60  ;;  %v2690_v18 = vadd.f32 %v2589_v13, %v2415_v3  ;;  %v3759_v58 = vmul.f32 %v7833_v63, %v8443_v45  ;;  %v491_v22 = vmul.f32 %v10061_v55, %v7546_v2  ;;  %v8480_v56 = vld [vmem:[#allocation2 + $0x168] sm:$0xff] }
 0x285   : > { %v1941_v30 = vrot.slane %v1820_v49, 7  ;;  %v589_v60 = vmul.f32 %v10062_v16, %v7566_v51  ;;  %10063 = vst [vmem:[#allocation22_spill] sm:$0xff] %v8480_v56  ;;  %v8484_v13 = vmul.f32 %v8480_v56, %v7554_v20  ;;  %v1060_v3 = vmul.f32 %v8480_v56, %v7743_v9 }
 0x286   : > { %v1009_v61 = vadd.f32 %v961_v41, %v911_v52  ;;  %v2965_v11 = vadd.f32 %v2864_v14, %v2690_v18  ;;  %v539_v24 = vadd.f32 %v7563_v8, %v491_v22  ;;  %v8491_v2 = vmul.f32 %v7743_v9, %v7578_v15 }
 0x287   : > { %v10064_v49 = vrot.slane %v8325_v57, 1  ;;  %v10065_v51 = vrot.slane %v8347_v6, 6  ;;  %v2094_v20 = vmul.f32 %v7846_v62, %v7683_v40  ;;  %v3016_v8 = vmul.f32 %v7713_v48, %v10037_v19 }
 0x288   : > { %v3239_v14 = vadd.f32 %v3136_v36, %v2965_v11  ;;  %v637_v52 = vadd.f32 %v589_v60, %v539_v24  ;;  %v810_v41 = vrot.slane %v8484_v13, 7  ;;  %v8505_v15 = vmul.f32 %v7751_v39, %v10015_v0 }
 0x289   : > { %v1284_v23 = vadd.f32 %v10064_v49, %v1009_v61  ;;  %v1668_v32 = vsel %vm1603_vm7, %v10065_v51, %v1667_v53  ;;  %v10066_v57 = vrot.slane %v8331_v35, 5  ;;  %v1183_v6 = vrot.slane %v1060_v3, 1 }
 0x28a   : > { %v9632_v53 = vrot.slane %v8491_v2, 1  ;;  %v8512_v55 = vmul.f32 %v7770_v7, %v10015_v0  ;;  %v3337_v22 = vadd.f32 %v3289_v31, %v3239_v14  ;;  %v10067_v36 = vrot.slane %v8354_v59, 7  ;;  %v8538_v14 = vld [vmem:[#allocation2 + $0x1c0] sm:$0x3f] }
 0x28b   : > { %v1495_v18 = vadd.f32 %v10066_v57, %v1284_v23  ;;  %v912_v60 = vadd.f32 %v810_v41, %v637_v52  ;;  %v962_v11 = vmul.f32 %v8480_v56, %v7602_v54  ;;  %v3137_v24 = vrot.slane %v3016_v8, 7 }
 0x28c   : > { %v1942_v61 = vsel %vm744_vm2, %v10067_v36, %v1941_v30  ;;  %v2193_v3 = vmul.f32 %v7794_v33, %v10015_v0  ;;  %v8525_v49 = vmul.f32 %v7794_v33, %v10027_v10  ;;  %v3611_v31 = vadd.f32 %v3510_v12, %v3337_v22 }
 0x28d   : > { %v1770_v35 = vadd.f32 %v1668_v32, %v1495_v18  ;;  %v1010_v23 = vadd.f32 %v962_v11, %v912_v60  ;;  %v2467_v59 = vmul.f32 %v7812_v17, %v10015_v0  ;;  %v8531_v30 = vmul.f32 %v7812_v17, %v10027_v10 }
 0x28e   : > { %v1185_v54 = vsel %vm1117_vm3, %v1183_v6, %v9632_v53  ;;  %v9631_v32 = vrot.slane %v8505_v15, 5  ;;  %v9630_v8 = vrot.slane %v8512_v55, 6  ;;  %v3709_v12 = vadd.f32 %v3661_v21, %v3611_v31 }
 0x28f   : > { %v2044_v51 = vadd.f32 %v1942_v61, %v1770_v35  ;;  %v1285_v52 = vadd.f32 %v1185_v54, %v1010_v23  ;;  %v8542_v57 = vmul.f32 %v7778_v29, %v10015_v0  ;;  %v2315_v18 = vrot.slane %v2193_v3, 1 }
 0x290   : > { %v9628_v36 = vrot.slane %v8525_v49, 1  ;;  %v2590_v61 = vrot.slane %v2467_v59, 2  ;;  %v2742_v6 = vmul.f32 %v7823_v44, %v10015_v0  ;;  %v3807_v60 = vadd.f32 %v3759_v58, %v3709_v12 }
 0x291   : > { %v2142_v22 = vadd.f32 %v2094_v20, %v2044_v51  ;;  %v1496_v11 = vadd.f32 %v9631_v32, %v1285_v52  ;;  %v9627_v21 = vrot.slane %v8531_v30, 2  ;;  %v8552_v35 = vmul.f32 %v7823_v44, %v10027_v10 }
 0x292   : > { %v10068_v31 = vrot.slane %v8378_v28, 1  ;;  %v3290_v20 = vmul.f32 %v7873_v25, %v10037_v19  ;;  %v3662_v23 = vmul.f32 %v7789_v46, %v8266_v4  ;;  %v3760_v58 = vmul.f32 %v7833_v63, %v8538_v14  ;;  %3857 = vst.msk [vmem:[%s5061_s27 + $0xc5] sm:$0xff] %vm246_vm0, %v3807_v60 }
 0x293   : > { %v10069_v59 = vrot.slane %v8399_v42, 7  ;;  %v1771_v54 = vadd.f32 %v9630_v8, %v1496_v11  ;;  %v9629_v28 = vrot.slane %v8542_v57, 7  ;;  %v2095_v12 = vmul.f32 %v7846_v62, %v10015_v0 }
 0x294   : > { %v2416_v3 = vadd.f32 %v10068_v31, %v2142_v22  ;;  %v2317_v22 = vsel %vm1117_vm3, %v2315_v18, %v9628_v36  ;;  %v2865_v60 = vrot.slane %v2742_v6, 3  ;;  %v8579_v42 = vmul.f32 %v7713_v48, %v8083_v38  ;;  %v8595_v31 = vld [vmem:[#allocation3 + $0x2] ss:$0 sm:$0xff] }
 0x295   : > { %v3138_v51 = vsel %vm744_vm2, %v10069_v59, %v3137_v24  ;;  %v2045_v24 = vadd.f32 %v9629_v28, %v1771_v54  ;;  %v2592_v11 = vsel %vm2524_vm4, %v2590_v61, %v9627_v21  ;;  %v2866_v0 = vrot.slane %v8552_v35, 3  ;;  %v10072_v21 = vld [vmem:[#allocation27_spill] sm:$0xff] }
 0x296   : > { %v2691_v52 = vadd.f32 %v2588_v47, %v2416_v3  ;;  %v492_v47 = vmul.f32 %v8587_v43, %v8033_v27  ;;  %v10070_v18 = vrot.slane %v8393_v34, 3  ;;  %v3291_v48 = vmul.f32 %v7873_v25, %v8083_v38  ;;  %v8597_v3 = vld [vmem:[#allocation2 + $0x170] sm:$0xff]  ;;  %v8612_v34 = vld [vmem:[%s9376_s1] ss:$0 sm:$0xff] }
 0x297   : > { %10071 = vst [vmem:[#allocation13_spill] sm:$0xff] %v8597_v3  ;;  %v8601_v61 = vmul.f32 %v8597_v3, %v8595_v31  ;;  %v8605_v59 = vmul.f32 %v7743_v9, %v7683_v40  ;;  %v2143_v54 = vadd.f32 %v2095_v12, %v2045_v24  ;;  %v3389_v27 = vmul.f32 %v8048_v26, %v8083_v38 }
 0x298   : > { %v2966_v6 = vadd.f32 %v10070_v18, %v2691_v52  ;;  %v540_v52 = vadd.f32 %v8612_v34, %v492_v47  ;;  %v8615_v18 = vld [vmem:[#allocation3 + $0x1] ss:$0 sm:$0xff]  ;;  %v3139_v40 = vrot.slane %v8579_v42, 7  ;;  %v8623_v12 = vmul.f32 %v7751_v39, %v10027_v10 }
 0x299   : > { %v590_v36 = vmul.f32 %v8615_v18, %v10072_v21  ;;  %v9633_v9 = vrot.slane %v8601_v61, 7  ;;  %v2417_v24 = vadd.f32 %v2317_v22, %v2143_v54  ;;  %v8627_v8 = vmul.f32 %v8048_v26, %v8158_v5  ;;  %v10073_v54 = vld [vmem:[#allocation17_spill] sm:$0xff] }
 0x29a   : > { %v3240_v28 = vadd.f32 %v3138_v51, %v2966_v6  ;;  %v8631_v32 = vmul.f32 %v7770_v7, %v10027_v10  ;;  %v9637_v39 = vrot.slane %v8605_v59, 1  ;;  %v8641_v22 = vmul.f32 %v7778_v29, %v10027_v10  ;;  %v8645_v7 = vld [vmem:[#allocation3 + $0x3] ss:$0 sm:$0xff] }
 0x29b   : > { %v638_v47 = vadd.f32 %v590_v36, %v540_v52  ;;  %v812_v51 = vsel %vm744_vm2, %v810_v41, %v9633_v9  ;;  %v2692_v6 = vadd.f32 %v2592_v11, %v2417_v24  ;;  %v3663_v36 = vmul.f32 %v7789_v46, %v10073_v54  ;;  %v8651_v41 = vld [vmem:[#allocation2 + $0x1c8] sm:$0xff] }
 0x29c   : > { %v3338_v53 = vadd.f32 %v3290_v20, %v3240_v28  ;;  %v963_v20 = vmul.f32 %v8645_v7, %v8597_v3  ;;  %v2867_v29 = vsel %vm2799_vm5, %v2865_v60, %v2866_v0  ;;  %v3511_v28 = vrot.slane %v3389_v27, 1 }
 0x29d   : > { %v913_v52 = vadd.f32 %v812_v51, %v638_v47  ;;  %v9635_v11 = vrot.slane %v8623_v12, 5  ;;  %v2967_v24 = vadd.f32 %v2867_v29, %v2692_v6  ;;  %v3512_v46 = vrot.slane %v8627_v8, 1 }
 0x29e   : > { %v3612_v13 = vadd.f32 %v3509_v37, %v3338_v53  ;;  %v9636_v51 = vrot.slane %v8631_v32, 6  ;;  %v10074_v1 = vrot.slane %v8491_v2, 1  ;;  %v9634_v53 = vrot.slane %v8641_v22, 7 }
 0x29f   : > { %v1011_v47 = vadd.f32 %v963_v20, %v913_v52  ;;  %v8667_v60 = vmul.f32 %v7794_v33, %v10037_v19  ;;  %v3241_v8 = vadd.f32 %v3139_v40, %v2967_v24  ;;  %v3761_v27 = vmul.f32 %v7833_v63, %v8651_v41 }
 0x2a0   : > { %v3710_v9 = vadd.f32 %v3662_v23, %v3612_v13  ;;  %v1187_v37 = vsel %vm1117_vm3, %v10074_v1, %v9637_v39  ;;  %v8675_v6 = vmul.f32 %v7812_v17, %v10037_v19  ;;  %v10075_v52 = vrot.slane %v8505_v15, 5  ;;  %v8686_v13 = vld [vmem:[#allocation3 + $0xc] ss:$0 sm:$0xff]  ;;  %v8738_v39 = vld [vmem:[#allocation3 + $0x7] ss:$0 sm:$0xff] }
 0x2a1   : > { %v1286_v23 = vadd.f32 %v1187_v37, %v1011_v47  ;;  %v8684_v33 = vmul.f32 %v7823_v44, %v10037_v19  ;;  %v8690_v29 = vmul.f32 %v8686_v13, %v8158_v5  ;;  %v3339_v24 = vadd.f32 %v3291_v48, %v3241_v8 }
 0x2a2   : > { %v3808_v2 = vadd.f32 %v3760_v58, %v3710_v9  ;;  %v1402_v20 = vsel %vm1360_vm6, %v10075_v52, %v9635_v11  ;;  %v3513_v17 = vsel %vm1117_vm3, %v3511_v28, %v3512_v46  ;;  %v10076_v15 = vrot.slane %v8512_v55, 6 }
 0x2a3   : > { %v1497_v58 = vadd.f32 %v1402_v20, %v1286_v23  ;;  %v10077_v44 = vrot.slane %v8542_v57, 7  ;;  %v2096_v48 = vmul.f32 %v7846_v62, %v10027_v10  ;;  %v9643_v28 = vrot.slane %v8667_v60, 1  ;;  %v10078_v23 = vld [vmem:[#allocation26_spill] sm:$0xff] }
 0x2a4   : > { %v1671_v9 = vsel %vm1603_vm7, %v10076_v15, %v9636_v51  ;;  %3858 = vst.msk [vmem:[%s5061_s27 + $0xcd] sm:$0x7] %vm3821_vm9, %v3808_v2  ;;  %v8710_v1 = vmul.f32 %v8048_v26, %v8266_v4  ;;  %v3613_v55 = vadd.f32 %v3513_v17, %v3339_v24  ;;  %v9640_v8 = vrot.slane %v8675_v6, 2  ;;  %v8719_v20 = vld [vmem:[#allocation2 + $0x178] sm:$0x3f] }
 0x2a5   : > { %v1945_v47 = vsel %vm744_vm2, %v10077_v44, %v9634_v53  ;;  %v1772_v37 = vadd.f32 %v1671_v9, %v1497_v58  ;;  %v493_v2 = vmul.f32 %v8587_v43, %v10078_v23  ;;  %v9639_v57 = vrot.slane %v8684_v33, 3  ;;  %10079 = vst [vmem:[#allocation21_spill] sm:$0xff] %v8719_v20  ;;  %v8732_v51 = vld [vmem:[#allocation3 + $0x6] ss:$0 sm:$0xff] }
 0x2a6   : > { %v9641_v52 = vrot.slane %v8690_v29, 7  ;;  %v3292_v62 = vmul.f32 %v7873_v25, %v8158_v5  ;;  %v689_v15 = vmul.f32 %v8719_v20, %v8595_v31  ;;  %v3711_v44 = vadd.f32 %v3663_v36, %v3613_v55  ;;  %v8736_v55 = vld [vmem:[#allocation2 + $0x1d0] sm:$0xff] }
 0x2a7   : > { %v2046_v24 = vadd.f32 %v1945_v47, %v1772_v37  ;;  %v541_v17 = vadd.f32 %v8612_v34, %v493_v2  ;;  %v591_v58 = vmul.f32 %v8615_v18, %v8428_v50  ;;  %v10080_v9 = vrot.slane %v8525_v49, 1 }
 0x2a8   : > { %v9638_v53 = vrot.slane %v8710_v1, 1  ;;  %v813_v11 = vrot.slane %v689_v15, 7  ;;  %v1548_v36 = vmul.f32 %v8732_v51, %v10037_v19  ;;  %v3809_v47 = vadd.f32 %v3761_v27, %v3711_v44 }
 0x2a9   : > { %v2319_v23 = vsel %vm1117_vm3, %v10080_v9, %v9643_v28  ;;  %v2144_v37 = vadd.f32 %v2096_v48, %v2046_v24  ;;  %v639_v2 = vadd.f32 %v591_v58, %v541_v17  ;;  %v1823_v49 = vmul.f32 %v8738_v39, %v10037_v19  ;;  %v8762_v17 = vld [vmem:[#allocation3 + $0xf] ss:$0 sm:$0xff] }
 0x2aa   : > { %v10081_v9 = vrot.slane %v8531_v30, 2  ;;  %v2869_v27 = vsel %vm2799_vm5, %v2866_v0, %v9639_v57  ;;  %v3141_v48 = vsel %vm744_vm2, %v3139_v40, %v9641_v52  ;;  %v10082_v44 = vrot.slane %v8601_v61, 7  ;;  %3859 = vst.msk [vmem:[%s5061_s27 + $0xcd] sm:$0xf8] %vm3818_vm8, %v3809_v47 }
 0x2ab   : > { %v2418_v30 = vadd.f32 %v2319_v23, %v2144_v37  ;;  %v3664_v35 = vmul.f32 %v8762_v17, %v8443_v45  ;;  %v964_v0 = vmul.f32 %v8719_v20, %v8645_v7  ;;  %v3515_v42 = vsel %vm1117_vm3, %v3512_v46, %v9638_v53 }
 0x2ac   : > { %v2594_v15 = vsel %vm2524_vm4, %v10081_v9, %v9640_v8  ;;  %v814_v24 = vsel %vm744_vm2, %v10082_v44, %v813_v11  ;;  %v3762_v61 = vmul.f32 %v7833_v63, %v8736_v55  ;;  %v1672_v40 = vrot.slane %v1548_v36, 6  ;;  %v8775_v9 = vld [vmem:[#allocation2 + $0x180] sm:$0xff] }
 0x2ad   : > { %v914_v58 = vadd.f32 %v814_v24, %v639_v2  ;;  %v494_v11 = vmul.f32 %v8587_v43, %v10062_v16  ;;  %v2693_v23 = vadd.f32 %v2594_v15, %v2418_v30  ;;  %v1946_v37 = vrot.slane %v1823_v49, 7  ;;  %10083 = vst [vmem:[#allocation28_spill] sm:$0xff] %v8775_v9  ;;  %v8784_v24 = vld [vmem:[#allocation3 + $0x4] ss:$0 sm:$0xff]  ;;  %v8794_v30 = vld [vmem:[#allocation3 + $0x8] ss:$0 sm:$0xff] }
 0x2ae   : > { %v8779_v2 = vmul.f32 %v8775_v9, %v8595_v31  ;;  %v592_v46 = vmul.f32 %v8615_v18, %v8480_v56  ;;  %v1063_v63 = vmul.f32 %v8784_v24, %v8775_v9  ;;  %v8790_v16 = vmul.f32 %v8784_v24, %v10027_v10 }
 0x2af   : > { %v1012_v47 = vadd.f32 %v964_v0, %v914_v58  ;;  %v542_v44 = vadd.f32 %v8612_v34, %v494_v11  ;;  %v2968_v36 = vadd.f32 %v2869_v27, %v2693_v23  ;;  %v10084_v49 = vrot.slane %v8605_v59, 1 }
 0x2b0   : > { %v2097_v58 = vmul.f32 %v8794_v30, %v10037_v19  ;;  %v3019_v0 = vmul.f32 %v8686_v13, %v8266_v4  ;;  %v10085_v11 = vrot.slane %v8631_v32, 6  ;;  %v8805_v10 = vmul.f32 %v7873_v25, %v8266_v4 }
 0x2b1   : > { %v1287_v15 = vadd.f32 %v10084_v49, %v1012_v47  ;;  %v640_v27 = vadd.f32 %v592_v46, %v542_v44  ;;  %v9642_v59 = vrot.slane %v8779_v2, 7  ;;  %v3242_v23 = vadd.f32 %v3141_v48, %v2968_v36  ;;  %v8818_v44 = vld [vmem:[#allocation3 + $0x5] ss:$0 sm:$0xff] }
 0x2b2   : > { %v1673_v53 = vsel %vm1603_vm7, %v10085_v11, %v1672_v40  ;;  %v10086_v47 = vrot.slane %v8623_v12, 5  ;;  %v1188_v57 = vrot.slane %v1063_v63, 1  ;;  %v9651_v8 = vrot.slane %v8790_v16, 1 }
 0x2b3   : > { %v10087_v52 = vrot.slane %v8641_v22, 7  ;;  %v915_v40 = vadd.f32 %v9642_v59, %v640_v27  ;;  %v965_v25 = vmul.f32 %v8775_v9, %v8645_v7  ;;  %v8822_v48 = vmul.f32 %v8818_v44, %v8083_v38  ;;  %v8828_v22 = vld [vmem:[#allocation3 + $0x9] ss:$0 sm:$0xff] }
 0x2b4   : > { %v1498_v49 = vadd.f32 %v10086_v47, %v1287_v15  ;;  %v3340_v12 = vadd.f32 %v3292_v62, %v3242_v23  ;;  %v8826_v63 = vmul.f32 %v8732_v51, %v8083_v38  ;;  %v8834_v36 = vmul.f32 %v8828_v22, %v8158_v5  ;;  %v8836_v15 = vld [vmem:[#allocation3 + $0xa] ss:$0 sm:$0xff] }
 0x2b5   : > { %v1947_v32 = vsel %vm744_vm2, %v10087_v52, %v1946_v37  ;;  %v2196_v52 = vmul.f32 %v8828_v22, %v8083_v38  ;;  %v1013_v37 = vadd.f32 %v965_v25, %v915_v40  ;;  %v2470_v62 = vmul.f32 %v8836_v15, %v8083_v38  ;;  %v8852_v9 = vld [vmem:[#allocation2 + $0x1d8] sm:$0x3f] }
 0x2b6   : > { %v1773_v46 = vadd.f32 %v1673_v53, %v1498_v49  ;;  %v8842_v53 = vmul.f32 %v8836_v15, %v8158_v5  ;;  %v3614_v11 = vadd.f32 %v3515_v42, %v3340_v12  ;;  %v3142_v23 = vrot.slane %v3019_v0, 7  ;;  %10088 = vst [vmem:[#allocation12_spill] sm:$0xff] %v8852_v9  ;;  %v8855_v0 = vld [vmem:[#allocation3 + $0xb] ss:$0 sm:$0xff] }
 0x2b7   : > { %v1190_v47 = vsel %vm1117_vm3, %v1188_v57, %v9651_v8  ;;  %v9646_v40 = vrot.slane %v8822_v48, 5  ;;  %v8850_v25 = vmul.f32 %v8738_v39, %v8083_v38  ;;  %v2320_v59 = vrot.slane %v2196_v52, 1 }
 0x2b8   : > { %v2047_v27 = vadd.f32 %v1947_v32, %v1773_v46  ;;  %v1288_v49 = vadd.f32 %v1190_v47, %v1013_v37  ;;  %v3712_v28 = vadd.f32 %v3664_v35, %v3614_v11  ;;  %v9648_v42 = vrot.slane %v8834_v36, 1 }
 0x2b9   : > { %v2745_v57 = vmul.f32 %v8855_v0, %v8083_v38  ;;  %v9650_v12 = vrot.slane %v8826_v63, 6  ;;  %v2595_v46 = vrot.slane %v2470_v62, 2  ;;  %v9647_v52 = vrot.slane %v8842_v53, 2 }
 0x2ba   : > { %v2145_v56 = vadd.f32 %v2097_v58, %v2047_v27  ;;  %v1499_v32 = vadd.f32 %v9646_v40, %v1288_v49  ;;  %v3810_v35 = vadd.f32 %v3762_v61, %v3712_v28  ;;  %v10089_v37 = vrot.slane %v8667_v60, 1  ;;  %v8874_v40 = vld [vmem:[#allocation3 + $0x10] ss:$0 sm:$0xff] }
 0x2bb   : > { %v3665_v11 = vmul.f32 %v8762_v17, %v8538_v14  ;;  %v8869_v27 = vmul.f32 %v8855_v0, %v8158_v5  ;;  %v10090_v47 = vrot.slane %v8690_v29, 7  ;;  %v3763_v62 = vmul.f32 %v8874_v40, %v8852_v9 }
 0x2bc   : > { %v2419_v58 = vadd.f32 %v10089_v37, %v2145_v56  ;;  %v1774_v60 = vadd.f32 %v9650_v12, %v1499_v32  ;;  %v9649_v56 = vrot.slane %v8850_v25, 7  ;;  %3860 = vst.msk [vmem:[%s5061_s27 + $0xd5] sm:$0xff] %vm246_vm0, %v3810_v35  ;;  %v10091_v28 = vrot.slane %v8675_v6, 2 }
 0x2bd   : > { %v3143_v49 = vsel %vm744_vm2, %v10090_v47, %v3142_v23  ;;  %v2098_v29 = vmul.f32 %v8794_v30, %v8083_v38  ;;  %v2322_v23 = vsel %vm1117_vm3, %v2320_v59, %v9648_v42  ;;  %v2870_v37 = vrot.slane %v2745_v57, 3  ;;  %v8904_v57 = vld [vmem:[#allocation3 + $0xd] ss:$0 sm:$0xff] }
 0x2be   : > { %v2694_v61 = vadd.f32 %v10091_v28, %v2419_v58  ;;  %v2048_v47 = vadd.f32 %v9649_v56, %v1774_v60  ;;  %v2597_v32 = vsel %vm2524_vm4, %v2595_v46, %v9647_v52  ;;  %v8897_v35 = vmul.f32 %v8686_v13, %v10073_v54  ;;  %v8908_v28 = vld [vmem:[#allocation2 + $0x188] sm:$0xff] }
 0x2bf   : > { %v495_v6 = vmul.f32 %v8587_v43, %v10072_v21  ;;  %v10092_v38 = vrot.slane %v8684_v33, 3  ;;  %v3294_v60 = vmul.f32 %v8904_v57, %v10073_v54  ;;  %v8912_v46 = vmul.f32 %v8908_v28, %v8595_v31 }
 0x2c0   : > { %v2146_v52 = vadd.f32 %v2098_v29, %v2048_v47  ;;  %v593_v21 = vmul.f32 %v8615_v18, %v8597_v3  ;;  %v8919_v33 = vmul.f32 %v8784_v24, %v10037_v19  ;;  %v8926_v12 = vmul.f32 %v8818_v44, %v8158_v5 }
 0x2c1   : > { %v2969_v58 = vadd.f32 %v10092_v38, %v2694_v61  ;;  %v543_v42 = vadd.f32 %v8612_v34, %v495_v6  ;;  %v3392_v38 = vmul.f32 %v8048_v26, %v10073_v54  ;;  %v9652_v56 = vrot.slane %v8912_v46, 7 }
 0x2c2   : > { %v2420_v29 = vadd.f32 %v2322_v23, %v2146_v52  ;;  %v8930_v47 = vmul.f32 %v8048_v26, %v8443_v45  ;;  %v8934_v19 = vmul.f32 %v8732_v51, %v8158_v5  ;;  %v8945_v52 = vmul.f32 %v8738_v39, %v8158_v5 }
 0x2c3   : > { %v3243_v61 = vadd.f32 %v3143_v49, %v2969_v58  ;;  %v641_v6 = vadd.f32 %v593_v21, %v543_v42  ;;  %v10093_v58 = vrot.slane %v8779_v2, 7  ;;  %v3144_v42 = vrot.slane %v8897_v35, 7 }
 0x2c4   : > { %v2695_v26 = vadd.f32 %v2597_v32, %v2420_v29  ;;  %v966_v21 = vmul.f32 %v8908_v28, %v8645_v7  ;;  %v10095_v2 = vrot.slane %v8869_v27, 3  ;;  %v9657_v59 = vrot.slane %v8926_v12, 5  ;;  %v8961_v29 = vld [vmem:[#allocation2 + $0x1e0] sm:$0xff] }
 0x2c5   : > { %v3341_v49 = vadd.f32 %v8805_v10, %v3243_v61  ;;  %v817_v8 = vsel %vm744_vm2, %v10093_v58, %v9652_v56  ;;  %v10094_v10 = vrot.slane %v8710_v1, 1  ;;  %v3516_v56 = vrot.slane %v3392_v38, 1 }
 0x2c6   : > { %v916_v23 = vadd.f32 %v817_v8, %v641_v6  ;;  %v2872_v58 = vsel %vm2799_vm5, %v2870_v37, %v10095_v2  ;;  %v9659_v3 = vrot.slane %v8930_v47, 1  ;;  %v8959_v8 = vmul.f32 %v8828_v22, %v8266_v4 }
 0x2c7   : > { %v3615_v61 = vadd.f32 %v10094_v10, %v3341_v49  ;;  %v2970_v9 = vadd.f32 %v2872_v58, %v2695_v26  ;;  %v10096_v1 = vrot.slane %v8919_v33, 1  ;;  %v10097_v6 = vrot.slane %v8790_v16, 1 }
 0x2c8   : > { %v1014_v32 = vadd.f32 %v966_v21, %v916_v23  ;;  %v9658_v38 = vrot.slane %v8934_v19, 6  ;;  %v9656_v49 = vrot.slane %v8945_v52, 7  ;;  %v3666_v23 = vmul.f32 %v8762_v17, %v8651_v41 }
 0x2c9   : > { %v3713_v35 = vadd.f32 %v3665_v11, %v3615_v61  ;;  %v1192_v37 = vsel %vm1117_vm3, %v10097_v6, %v10096_v1  ;;  %v3244_v26 = vadd.f32 %v3144_v42, %v2970_v9  ;;  %v8974_v11 = vmul.f32 %v8836_v15, %v8266_v4 }
 0x2ca   : > { %v1289_v21 = vadd.f32 %v1192_v37, %v1014_v32  ;;  %v10098_v16 = vrot.slane %v8822_v48, 5  ;;  %v8983_v2 = vmul.f32 %v8855_v0, %v8266_v4  ;;  %v8987_v9 = vmul.f32 %v8686_v13, %v8443_v45 }
 0x2cb   : > { %v3811_v10 = vadd.f32 %v3763_v62, %v3713_v35  ;;  %v3342_v58 = vadd.f32 %v3294_v60, %v3244_v26  ;;  %v3764_v32 = vmul.f32 %v8874_v40, %v8961_v29  ;;  %v9660_v62 = vrot.slane %v8959_v8, 1 }
 0x2cc   : > { %v1405_v61 = vsel %vm1360_vm6, %v10098_v16, %v9657_v59  ;;  %v3518_v48 = vsel %vm1117_vm3, %v3516_v56, %v9659_v3  ;;  %v10099_v35 = vrot.slane %v8826_v63, 6  ;;  %v10100_v60 = vrot.slane %v8850_v25, 7  ;;  %v9010_v56 = vld [vmem:[#allocation3 + $0xe] ss:$0 sm:$0xff] }
 0x2cd   : > { %v1500_v1 = vadd.f32 %v1405_v61, %v1289_v21  ;;  %3861 = vst.msk [vmem:[%s5061_s27 + $0xdd] sm:$0x7] %vm3821_vm9, %v3811_v10  ;;  %v2099_v26 = vmul.f32 %v8794_v30, %v8158_v5  ;;  %v3616_v21 = vadd.f32 %v3518_v48, %v3342_v58  ;;  %v9664_v16 = vrot.slane %v8974_v11, 2 }
 0x2ce   : > { %v1676_v6 = vsel %vm1603_vm7, %v10099_v35, %v9658_v38  ;;  %v1950_v37 = vsel %vm744_vm2, %v10100_v60, %v9656_v49  ;;  %v9014_v63 = vmul.f32 %v9010_v56, %v8538_v14  ;;  %v9662_v61 = vrot.slane %v8983_v2, 3  ;;  %v9020_v60 = vld [vmem:[#allocation2 + $0x190] sm:$0x3f]  ;;  %v9031_v38 = vld [vmem:[#allocation2 + $0x1e8] sm:$0xff] }
 0x2cf   : > { %v1775_v10 = vadd.f32 %v1676_v6, %v1500_v1  ;;  %v496_v25 = vmul.f32 %v8587_v43, %v8428_v50  ;;  %10101 = vst [vmem:[#allocation24_spill] sm:$0xff] %v9020_v60  ;;  %v692_v58 = vmul.f32 %v9020_v60, %v8595_v31  ;;  %v3714_v1 = vadd.f32 %v3666_v23, %v3616_v21 }
 0x2d0   : > { %v10102_v6 = vrot.slane %v8834_v36, 1  ;;  %v3295_v59 = vmul.f32 %v8904_v57, %v8443_v45  ;;  %10103 = vst [vmem:[#allocation23_spill] sm:$0xff] %v9031_v38  ;;  %v594_v3 = vmul.f32 %v8719_v20, %v8615_v18  ;;  %v1551_v23 = vmul.f32 %v8732_v51, %v8266_v4 }
 0x2d1   : > { %v2049_v48 = vadd.f32 %v1950_v37, %v1775_v10  ;;  %v544_v50 = vadd.f32 %v8612_v34, %v496_v25  ;;  %v818_v35 = vrot.slane %v692_v58, 7  ;;  %v3812_v37 = vadd.f32 %v3764_v32, %v3714_v1 }
 0x2d2   : > { %v2324_v49 = vsel %vm1117_vm3, %v10102_v6, %v9660_v62  ;;  %v10104_v36 = vrot.slane %v8842_v53, 2  ;;  %v9663_v6 = vrot.slane %v9014_v63, 1  ;;  %v10105_v25 = vrot.slane %v8869_v27, 3 }
 0x2d3   : > { %v2147_v21 = vadd.f32 %v2099_v26, %v2049_v48  ;;  %v10106_v58 = vrot.slane %v8987_v9, 7  ;;  %v642_v32 = vadd.f32 %v594_v3, %v544_v50  ;;  %v10107_v26 = vrot.slane %v8912_v46, 7  ;;  %3862 = vst.msk [vmem:[%s5061_s27 + $0xdd] sm:$0xf8] %vm3818_vm8, %v3812_v37  ;;  %v10108_v46 = vld [vmem:[#allocation22_spill] sm:$0xff] }
 0x2d4   : > { %v2599_v10 = vsel %vm2524_vm4, %v10104_v36, %v9664_v16  ;;  %v2874_v62 = vsel %vm2799_vm5, %v10105_v25, %v9662_v61  ;;  %v3667_v48 = vmul.f32 %v8762_v17, %v8736_v55  ;;  %v3765_v27 = vmul.f32 %v8874_v40, %v9031_v38 }
 0x2d5   : > { %v3146_v20 = vsel %vm744_vm2, %v3144_v42, %v10106_v58  ;;  %v819_v1 = vsel %vm744_vm2, %v10107_v26, %v818_v35  ;;  %v2421_v53 = vadd.f32 %v2324_v49, %v2147_v21  ;;  %v1826_v36 = vmul.f32 %v8738_v39, %v8266_v4  ;;  %v4225_v58 = vld [vmem:[#allocation2 + $0x198] sm:$0xff] }
 0x2d6   : > { %v917_v25 = vadd.f32 %v819_v1, %v642_v32  ;;  %v967_v3 = vmul.f32 %v9020_v60, %v8645_v7  ;;  %v1677_v42 = vrot.slane %v1551_v23, 6  ;;  %v497_v35 = vmul.f32 %v8587_v43, %v10108_v46  ;;  %v10110_v1 = vld [vmem:[#allocation28_spill] sm:$0xff] }
 0x2d7   : > { %v2696_v50 = vadd.f32 %v2599_v10, %v2421_v53  ;;  %v10109_v49 = vrot.slane %v8930_v47, 1  ;;  %v2100_v21 = vmul.f32 %v8794_v30, %v8266_v4  ;;  %v9075_v32 = vmul.f32 %v4225_v58, %v8595_v31 }
 0x2d8   : > { %v1015_v26 = vadd.f32 %v967_v3, %v917_v25  ;;  %v545_v23 = vadd.f32 %v8612_v34, %v497_v35  ;;  %v595_v46 = vmul.f32 %v10110_v1, %v8615_v18  ;;  %v1066_v10 = vmul.f32 %v4225_v58, %v8784_v24 }
 0x2d9   : > { %v3520_v37 = vsel %vm1117_vm3, %v10109_v49, %v9663_v6  ;;  %v2971_v53 = vadd.f32 %v2874_v62, %v2696_v50  ;;  %v1951_v61 = vrot.slane %v1826_v36, 7  ;;  %v3022_v47 = vmul.f32 %v8686_v13, %v8538_v14 }
 0x2da   : > { %v9085_v49 = vmul.f32 %v8784_v24, %v8158_v5  ;;  %v10111_v6 = vrot.slane %v8919_v33, 1  ;;  %v10112_v25 = vrot.slane %v8934_v19, 6  ;;  %v643_v35 = vadd.f32 %v595_v46, %v545_v23 }
 0x2db   : > { %v820_v1 = vrot.slane %v9075_v32, 7  ;;  %v3245_v38 = vadd.f32 %v3146_v20, %v2971_v53  ;;  %v1193_v62 = vrot.slane %v1066_v10, 1  ;;  %v9096_v50 = vmul.f32 %v8818_v44, %v10073_v54 }
 0x2dc   : > { %v1290_v16 = vadd.f32 %v10111_v6, %v1015_v26  ;;  %v1678_v3 = vsel %vm1603_vm7, %v10112_v25, %v1677_v42  ;;  %v1194_v36 = vrot.slane %v9085_v49, 1  ;;  %v10113_v5 = vrot.slane %v8926_v12, 5 }
 0x2dd   : > { %v918_v33 = vadd.f32 %v820_v1, %v643_v35  ;;  %v968_v19 = vmul.f32 %v4225_v58, %v8645_v7  ;;  %v9105_v6 = vmul.f32 %v8732_v51, %v10073_v54  ;;  %v3343_v20 = vadd.f32 %v3295_v59, %v3245_v38 }
 0x2de   : > { %v1501_v60 = vadd.f32 %v10113_v5, %v1290_v16  ;;  %v10114_v42 = vrot.slane %v8945_v52, 7  ;;  %v3147_v23 = vrot.slane %v3022_v47, 7  ;;  %v2199_v46 = vmul.f32 %v8828_v22, %v10073_v54 }
 0x2df   : > { %v1016_v16 = vadd.f32 %v968_v19, %v918_v33  ;;  %v9114_v10 = vmul.f32 %v8828_v22, %v8443_v45  ;;  %v2473_v58 = vmul.f32 %v8836_v15, %v10073_v54  ;;  %v3617_v53 = vadd.f32 %v3520_v37, %v3343_v20 }
 0x2e0   : > { %v1952_v26 = vsel %vm744_vm2, %v10114_v42, %v1951_v61  ;;  %v1776_v12 = vadd.f32 %v1678_v3, %v1501_v60  ;;  %v1195_v59 = vsel %vm1117_vm3, %v1193_v62, %v1194_v36  ;;  %v1406_v52 = vrot.slane %v9096_v50, 5 }
 0x2e1   : > { %v9124_v38 = vmul.f32 %v8836_v15, %v8443_v45  ;;  %v1291_v60 = vadd.f32 %v1195_v59, %v1016_v16  ;;  %v1679_v47 = vrot.slane %v9105_v6, 6  ;;  %v9129_v25 = vmul.f32 %v8738_v39, %v10073_v54 }
 0x2e2   : > { %v2050_v61 = vadd.f32 %v1952_v26, %v1776_v12  ;;  %v3715_v37 = vadd.f32 %v3667_v48, %v3617_v53  ;;  %v2325_v3 = vrot.slane %v2199_v46, 1  ;;  %v9668_v35 = vrot.slane %v9114_v10, 1 }
 0x2e3   : > { %v2748_v62 = vmul.f32 %v8855_v0, %v10073_v54  ;;  %v1502_v33 = vadd.f32 %v1406_v52, %v1291_v60  ;;  %v2600_v19 = vrot.slane %v2473_v58, 2  ;;  %v9667_v20 = vrot.slane %v9124_v38, 2 }
 0x2e4   : > { %v2148_v5 = vadd.f32 %v2100_v21, %v2050_v61  ;;  %v3813_v42 = vadd.f32 %v3765_v27, %v3715_v37  ;;  %v9139_v26 = vmul.f32 %v8855_v0, %v8443_v45  ;;  %v9143_v48 = vmul.f32 %v8686_v13, %v8651_v41 }
 0x2e5   : > { %v10115_v46 = vrot.slane %v8959_v8, 1  ;;  %v3296_v21 = vmul.f32 %v8904_v57, %v8538_v14  ;;  %v1777_v16 = vadd.f32 %v1679_v47, %v1502_v33  ;;  %v1953_v58 = vrot.slane %v9129_v25, 7 }
 0x2e6   : > { %3863 = vst.msk [vmem:[%s5061_s27 + $0xe5] sm:$0xff] %vm246_vm0, %v3813_v42  ;;  %v10116_v27 = vrot.slane %v8987_v9, 7  ;;  %v2101_v59 = vmul.f32 %v8794_v30, %v10073_v54  ;;  %v2327_v8 = vsel %vm1117_vm3, %v2325_v3, %v9668_v35  ;;  %v2875_v61 = vrot.slane %v2748_v62, 3  ;;  %v4226_v62 = vld [vmem:[#allocation2 + $0x1a0] sm:$0xff] }
 0x2e7   : > { %v2422_v12 = vadd.f32 %v10115_v46, %v2148_v5  ;;  %v10117_v60 = vrot.slane %v8974_v11, 2  ;;  %v2051_v5 = vadd.f32 %v1953_v58, %v1777_v16  ;;  %v2602_v9 = vsel %vm2524_vm4, %v2600_v19, %v9667_v20 }
 0x2e8   : > { %v3148_v53 = vsel %vm744_vm2, %v10116_v27, %v3147_v23  ;;  %v10118_v23 = vld [vmem:[#allocation13_spill] sm:$0xff]  ;;  %v2876_v54 = vrot.slane %v9139_v26, 3  ;;  %v3149_v42 = vrot.slane %v9143_v48, 7  ;;  %v596_v3 = vmul.f32 %v8908_v28, %v8615_v18  ;;  %v10126_v48 = vld [vmem:[#allocation23_spill] sm:$0xff] }
 0x2e9   : > { %v2697_v37 = vadd.f32 %v10117_v60, %v2422_v12  ;;  %v498_v33 = vmul.f32 %v10118_v23, %v8587_v43  ;;  %v9176_v11 = vmul.f32 %v4226_v62, %v8595_v31  ;;  %v10119_v46 = vrot.slane %v8983_v2, 3 }
 0x2ea   : > { %v2149_v16 = vadd.f32 %v2101_v59, %v2051_v5  ;;  %v9183_v27 = vmul.f32 %v8784_v24, %v8266_v4  ;;  %v3395_v60 = vmul.f32 %v9010_v56, %v8651_v41  ;;  %v9189_v28 = vmul.f32 %v9010_v56, %v8736_v55  ;;  %v9196_v59 = vld [vmem:[#allocation2 + $0x1f0] sm:$0x3f] }
 0x2eb   : > { %v2972_v12 = vadd.f32 %v10119_v46, %v2697_v37  ;;  %v546_v19 = vadd.f32 %v8612_v34, %v498_v33  ;;  %v821_v23 = vrot.slane %v9176_v11, 7  ;;  %v9194_v2 = vmul.f32 %v8818_v44, %v8443_v45 }
 0x2ec   : > { %v2423_v5 = vadd.f32 %v2327_v8, %v2149_v16  ;;  %v969_v4 = vmul.f32 %v4226_v62, %v8645_v7  ;;  %v1196_v46 = vrot.slane %v9183_v27, 1  ;;  %v9208_v44 = vmul.f32 %v8732_v51, %v8443_v45  ;;  %v10120_v62 = vld [vmem:[#allocation12_spill] sm:$0xff] }
 0x2ed   : > { %v3246_v37 = vadd.f32 %v3148_v53, %v2972_v12  ;;  %v644_v33 = vadd.f32 %v596_v3, %v546_v19  ;;  %v822_v24 = vsel %vm744_vm2, %v820_v1, %v821_v23  ;;  %v1407_v20 = vrot.slane %v9194_v2, 5 }
 0x2ee   : > { %v2698_v53 = vadd.f32 %v2602_v9, %v2423_v5  ;;  %v9212_v3 = vmul.f32 %v8738_v39, %v8443_v45  ;;  %v3668_v32 = vmul.f32 %v8762_v17, %v10120_v62  ;;  %v3766_v1 = vmul.f32 %v8874_v40, %v9196_v59 }
 0x2ef   : > { %v3344_v35 = vadd.f32 %v3296_v21, %v3246_v37  ;;  %v919_v8 = vadd.f32 %v822_v24, %v644_v33  ;;  %v2877_v12 = vsel %vm2799_vm5, %v2875_v61, %v2876_v54  ;;  %v3297_v16 = vmul.f32 %v8904_v57, %v8651_v41  ;;  %v442_v61 = vld [vmem:[#allocation2 + $0x1f8] sm:$0xff] }
 0x2f0   : > { %v10121_v21 = vrot.slane %v9014_v63, 1  ;;  %v2973_v19 = vadd.f32 %v2877_v12, %v2698_v53  ;;  %v3521_v37 = vrot.slane %v3395_v60, 1  ;;  %v3522_v33 = vrot.slane %v9189_v28, 1 }
 0x2f1   : > { %v1017_v5 = vadd.f32 %v969_v4, %v919_v8  ;;  %v1197_v24 = vsel %vm1117_vm3, %v1194_v36, %v1196_v46  ;;  %v1408_v41 = vsel %vm1360_vm6, %v1406_v52, %v1407_v20  ;;  %v1680_v63 = vrot.slane %v9208_v44, 6 }
 0x2f2   : > { %v3618_v9 = vadd.f32 %v10121_v21, %v3344_v35  ;;  %v3247_v60 = vadd.f32 %v3149_v42, %v2973_v19  ;;  %v1954_v53 = vrot.slane %v9212_v3, 7  ;;  %v9242_v49 = vmul.f32 %v8828_v22, %v8538_v14 }
 0x2f3   : > { %v1292_v4 = vadd.f32 %v1197_v24, %v1017_v5  ;;  %v3669_v50 = vmul.f32 %v8762_v17, %v8961_v29  ;;  %v3767_v12 = vmul.f32 %v8874_v40, %v442_v61  ;;  %v1681_v21 = vsel %vm1603_vm7, %v1679_v47, %v1680_v63 }
 0x2f4   : > { %v3716_v35 = vadd.f32 %v3668_v32, %v3618_v9  ;;  %v3345_v8 = vadd.f32 %v3297_v16, %v3247_v60  ;;  %v3523_v32 = vsel %vm1117_vm3, %v3521_v37, %v3522_v33  ;;  %v9257_v22 = vmul.f32 %v8836_v15, %v8538_v14  ;;  %v10122_v15 = vld [vmem:[#allocation21_spill] sm:$0xff]  ;;  %v4227_v37 = vld [vmem:[#allocation2 + $0x1a8] sm:$0x3f] }
 0x2f5   : > { %v1503_v52 = vadd.f32 %v1408_v41, %v1292_v4  ;;  %v1955_v16 = vsel %vm744_vm2, %v1953_v58, %v1954_v53  ;;  %v2750_v9 = vmul.f32 %v8855_v0, %v8538_v14  ;;  %v2328_v6 = vrot.slane %v9242_v49, 1 }
 0x2f6   : > { %v3814_v36 = vadd.f32 %v3766_v1, %v3716_v35  ;;  %v3619_v29 = vadd.f32 %v3523_v32, %v3345_v8  ;;  %v3024_v47 = vmul.f32 %v8686_v13, %v8736_v55  ;;  %v499_v19 = vmul.f32 %v10122_v15, %v8587_v43  ;;  %v10123_v35 = vld [vmem:[#allocation24_spill] sm:$0xff] }
 0x2f7   : > { %v1778_v1 = vadd.f32 %v1681_v21, %v1503_v52  ;;  %v695_v5 = vmul.f32 %v4227_v37, %v8595_v31  ;;  %v2102_v25 = vmul.f32 %v8794_v30, %v8443_v45  ;;  %v2603_v58 = vrot.slane %v9257_v22, 2 }
 0x2f8   : > { %3864 = vst.msk [vmem:[%s5061_s27 + $0xed] sm:$0x7] %vm3821_vm9, %v3814_v36  ;;  %v3717_v24 = vadd.f32 %v3669_v50, %v3619_v29  ;;  %v547_v0 = vadd.f32 %v8612_v34, %v499_v19  ;;  %v597_v61 = vmul.f32 %v10123_v35, %v8615_v18  ;;  %v2878_v43 = vrot.slane %v2750_v9, 3 }
 0x2f9   : > { %v2052_v41 = vadd.f32 %v1955_v16, %v1778_v1  ;;  %v823_v60 = vrot.slane %v695_v5, 7  ;;  %v10124_v36 = vrot.slane %v9114_v10, 1  ;;  %v3150_v8 = vrot.slane %v3024_v47, 7  ;;  %v443_v47 = vld [vmem:[#allocation2 + $0x200] sm:$0xff] }
 0x2fa   : > { %v3815_v4 = vadd.f32 %v3767_v12, %v3717_v24  ;;  %v645_v50 = vadd.f32 %v597_v61, %v547_v0  ;;  %v1554_v18 = vmul.f32 %v8732_v51, %v8538_v14  ;;  %v10125_v52 = vrot.slane %v9124_v38, 2 }
 0x2fb   : > { %v2150_v49 = vadd.f32 %v2102_v25, %v2052_v41  ;;  %v2329_v31 = vsel %vm1117_vm3, %v10124_v36, %v2328_v6  ;;  %v824_v45 = vsel %vm744_vm2, %v821_v23, %v823_v60  ;;  %v3397_v10 = vmul.f32 %v9010_v56, %v10120_v62 }
 0x2fc   : > { %3865 = vst.msk [vmem:[%s5061_s27 + $0xed] sm:$0xf8] %vm3818_vm8, %v3815_v4  ;;  %v2604_v32 = vsel %vm2524_vm4, %v10125_v52, %v2603_v58  ;;  %v920_v12 = vadd.f32 %v824_v45, %v645_v50  ;;  %v970_v21 = vmul.f32 %v4227_v37, %v8645_v7  ;;  %v1829_v11 = vmul.f32 %v8738_v39, %v8538_v14 }
 0x2fd   : > { %v2424_v34 = vadd.f32 %v2329_v31, %v2150_v49  ;;  %v2879_v23 = vsel %vm2799_vm5, %v2876_v54, %v2878_v43  ;;  %v3151_v51 = vsel %vm744_vm2, %v3149_v42, %v3150_v8  ;;  %v1682_v1 = vrot.slane %v1554_v18, 6 }
 0x2fe   : > { %v1018_v38 = vadd.f32 %v970_v21, %v920_v12  ;;  %v3524_v16 = vrot.slane %v3397_v10, 1  ;;  %v3298_v9 = vmul.f32 %v8904_v57, %v8736_v55  ;;  %v1956_v39 = vrot.slane %v1829_v11, 7 }
 0x2ff   : > { %v2699_v22 = vadd.f32 %v2604_v32, %v2424_v34  ;;  %v3670_v42 = vmul.f32 %v8762_v17, %v10126_v48  ;;  %v1683_v15 = vsel %vm1603_vm7, %v1680_v63, %v1682_v1  ;;  %v3768_v19 = vmul.f32 %v8874_v40, %v443_v47 }
 0x300   : > { %v1293_v56 = vadd.f32 %v1196_v46, %v1018_v38  ;;  %v3525_v27 = vsel %vm1117_vm3, %v3522_v33, %v3524_v16  ;;  %v3025_v2 = vmul.f32 %v8686_v13, %v10120_v62  ;;  %v2103_v44 = vmul.f32 %v8794_v30, %v8538_v14  ;;  %v444_v14 = vld [vmem:[#allocation2 + $0x208] sm:$0x3f] }
 0x301   : > { %v2974_v29 = vadd.f32 %v2879_v23, %v2699_v22  ;;  %v3769_v0 = vmul.f32 %v8874_v40, %v444_v14 }
 0x302   : > { %v1504_v26 = vadd.f32 %v1407_v20, %v1293_v56  ;;  %v1957_v20 = vsel %vm744_vm2, %v1954_v53, %v1956_v39  ;;  %v3152_v33 = vrot.slane %v3025_v2, 7  ;;  %v3299_v53 = vmul.f32 %v8904_v57, %v10120_v62 }
 0x303   : > { %v3248_v7 = vadd.f32 %v3151_v51, %v2974_v29 }
 0x304   : > { %v1779_v46 = vadd.f32 %v1683_v15, %v1504_v26  ;;  %v3153_v3 = vsel %vm744_vm2, %v3150_v8, %v3152_v33 }
 0x305   : > { %v3346_v54 = vadd.f32 %v3298_v9, %v3248_v7 }
 0x306   : > { %v2053_v37 = vadd.f32 %v1957_v20, %v1779_v46 }
 0x307   : > { %v3620_v55 = vadd.f32 %v3525_v27, %v3346_v54 }
 0x308   : > { %v2151_v28 = vadd.f32 %v2103_v44, %v2053_v37 }
 0x309   : > { %v3718_v63 = vadd.f32 %v3670_v42, %v3620_v55 }
 0x30a   : > { %v2425_v24 = vadd.f32 %v2328_v6, %v2151_v28  ;;  %v3671_v6 = vmul.f32 %v8762_v17, %v9196_v59 }
 0x30b   : > { %v3816_v5 = vadd.f32 %v3768_v19, %v3718_v63 }
 0x30c   : > { %v2700_v41 = vadd.f32 %v2603_v58, %v2425_v24 }
 0x30d   : > { %3866 = vst.msk [vmem:[%s5061_s27 + $0xf5] sm:$0xff] %vm246_vm0, %v3816_v5 }
 0x30e   : > { %v2975_v25 = vadd.f32 %v2878_v43, %v2700_v41 }
 0x310   : > { %v3249_v13 = vadd.f32 %v3153_v3, %v2975_v25 }
 0x312   : > { %v3347_v30 = vadd.f32 %v3299_v53, %v3249_v13 }
 0x314   : > { %v3621_v58 = vadd.f32 %v3524_v16, %v3347_v30 }
 0x316   : > { %v3719_v35 = vadd.f32 %v3671_v6, %v3621_v58 }
 0x318   : > { %v3817_v61 = vadd.f32 %v3769_v0, %v3719_v35 }
 0x31a   : > { %3867 = vst.msk [vmem:[%s5061_s27 + $0xfd] sm:$0x7] %vm3821_vm9, %v3817_v61 }
 0x31b   : > { %4315 = shalt.err (!%p4312_p0)
}
 0x31c   : > { %s4380_s6 = smov 128   ;;  %s4381_s27 = smov 8  }
 0x31d   : > { %4022 = dma.vmem_to_hbm [thread:$0]  (%p4484_p5), %s3883_s9, 4096, %s3885_s15, %s3869_s0, %s4380_s6, %s4380_s6, %s4381_s27  }
 0x31e PF: > { %s3899_s24 = sand.u32 1, %s4354_s12   ;;  %p4033_p3 = pnand %p4001_p11, %p4451_p6 }
 0x31f   : > { %s3900_s25 = scalar_lea.sflag [#allocation5], %s3899_s24 }
 0x320   : > { %p4034_p7 = pneg %p4033_p3 }
 0x322   : > { %4349 = dma.done.wait (%p4034_p7), %s3900_s25, 4096  }
 0x323   : > { %4351 = vsyncadd (%p4034_p7), %s3900_s25, 4294963200  ;;  %s20_s17 = sadd.s32 1, %s4374_s17   ;;  %s10127_s12 = smov %s4358_s13 }
 0x324   : > { %p17_p9 = scmp.ge.s32.totalorder %s20_s17, 4   ;;  %s10128_s13 = smov %s4362_s14 }
 0x325   : > { %s10129_s14 = smov %s4493_s18  ;;  %s10130_s15 = smov %s4370_s16 }
 0x326   : > { %s10131_s16 = smov %s10133_s5  ;;  %19 = sbr.rel (!%p17_p9) target bundleno = 9 (0x9), region = 87 }
 0x32b   :  { %3906 = vsyncpa [#allocation4], 1 }
 0x32c   :  { %3908 = vsyncpa [#allocation4 + $0x1], 1 }
 0x32d   :  { %3909 = vsyncpa [#allocation7], 1 }
 0x32e   :  { %3911 = vsyncpa [#allocation7 + $0x1], 1 }
 0x32f   :  { %3912 = vsyncpa [#allocation5], 1 }
 0x330   :  { %3914 = vsyncpa [#allocation5 + $0x1], 1 }

</bundles_post_ra>
